<compile_context>
chip_gen: v7x
topology: tpu7x:2x2x1
jax: 0.10.0
libtpu: 0.0.40
codegen_flags: <defaults>
</compile_context>

<pallas_src>
import functools

import jax
import jax.numpy as jnp
import numpy as np
from jax import lax
from jax.experimental import pallas as pl
from jax.experimental.pallas import tpu as pltpu


# ----------------------------- fused Pallas kernel ---------------------------

def _spade_block_kernel(xs2d_ref, segp_ref, w_main_ref, w_sh_ref, b_sh_ref,
                        w_gb_ref, b_gb_ref, out_ref, actv_g_ref,
                        *, Wp, Ho, Wo, G, L, Cout, nh):
    """One batch element per grid step; everything lives on the padded (Hp, Wp) grid.

    Every 3x3 convolution is a SINGLE MXU matmul: the shifted taps (stride-2 main
    conv -> 4 taps over a 2x2 space-to-depth input; stride-1 convs -> 9 taps) are
    sliced from bf16 refs and K-packed along the contraction axis in VMEM.
    Only interior pixels are written back (halo rows/cols never leave the kernel).
    """
    f32 = jnp.float32

    # ---- interior-pixel mask, built in-kernel (no (L, 1) HBM input) ---------
    # row/col on the padded grid; float floor-reciprocal trick avoids s32 div.
    lf = lax.broadcasted_iota(jnp.int32, (L, 1), 0).astype(f32)
    rowf = jnp.floor((lf + 0.5) * (1.0 / Wp))
    colf = lf - rowf * Wp
    mask = ((rowf > 0.5) & (rowf < Ho + 0.5) &
            (colf > 0.5) & (colf < Wo + 0.5)).astype(f32)        # (L, 1)

    # ---- main conv: Conv2d(dim_in -> dim_out, k=3, s=2, p=1, bias=False) ----
    # stride-2 3x3 conv == 4-tap stride-1 conv over the 2x2 space-to-depth input.
    taps = [xs2d_ref[0, pl.ds(G + (t // 2 - 1) * Wp + (t % 2 - 1), L), :]
            for t in range(4)]
    conv = jnp.dot(jnp.concatenate(taps, axis=-1), w_main_ref[...],
                   preferred_element_type=f32)                    # (L, Cout) f32

    # ---- SPADE mlp_shared: Conv2d(dim_c -> nhidden, k=3, p=1) + ReLU --------
    taps = [segp_ref[0, pl.ds(G + (k // 3 - 1) * Wp + (k % 3 - 1), L), :]
            for k in range(9)]
    acc = jnp.dot(jnp.concatenate(taps, axis=-1), w_sh_ref[...],
                  preferred_element_type=f32)                     # (L, nh) f32
    # masking the halo rows/cols implements the zero padding of the next conv.
    actv = jnp.maximum(acc + b_sh_ref[...], 0.0) * mask

    # guarded actv in a persistent bf16 VMEM scratch: zero guard rows, store the
    # interior once (single f32->bf16 cast), then slice it per tap below.
    actv_g_ref[pl.ds(0, G), :] = jnp.zeros((G, nh), actv_g_ref.dtype)
    actv_g_ref[pl.ds(G + L, G), :] = jnp.zeros((G, nh), actv_g_ref.dtype)
    actv_g_ref[pl.ds(G, L), :] = actv.astype(actv_g_ref.dtype)

    # ---- gamma & beta convs, packed into a single (9*nh, 2*Cout) RHS --------
    taps = [actv_g_ref[pl.ds(G + (k // 3 - 1) * Wp + (k % 3 - 1), L), :]
            for k in range(9)]
    gb = jnp.dot(jnp.concatenate(taps, axis=-1), w_gb_ref[...],
                 preferred_element_type=f32) + b_gb_ref[...]      # (L, 2*Cout)
    gamma = gb[:, :Cout]
    beta = gb[:, Cout:]

    # ---- InstanceNorm2d (affine=False, eps=1e-5): two-pass centered stats ---
    inv_hw = 1.0 / (Ho * Wo)
    mean = jnp.sum(conv * mask, axis=0, keepdims=True) * inv_hw
    diff = (conv - mean) * mask
    var = jnp.sum(diff * diff, axis=0, keepdims=True) * inv_hw
    inv_std = lax.rsqrt(var + 1e-5)

    # ---- SPADE modulation + ReLU --------------------------------------------
    y = jnp.maximum((conv - mean) * inv_std * (1.0 + gamma) + beta, 0.0)

    # ---- store interior pixels only (bf16; halo never written back) ---------
    rows = [lax.slice_in_dim(y, (r + 1) * Wp + 1, (r + 1) * Wp + 1 + Wo, axis=0)
            for r in range(Ho)]
    out_ref[0] = jnp.concatenate(rows, axis=0).astype(out_ref.dtype)


# ------------------------- VMEM budget (with headroom) -----------------------

def _vmem_limit_bytes(Lg, L, Cin, Cc, nh, Cout, Ho, Wo):
    """Rough per-step VMEM footprint (lane-padded), 2x headroom, capped for v7x."""
    lanes = lambda c: ((c + 127) // 128) * 128
    bf, f4 = 2, 4
    est = 0
    est += 2 * Lg * lanes(16 * Cin) * bf                 # xs2d block (double buf)
    est += 2 * Lg * lanes(Cc) * bf                       # segp block
    est += 2 * (16 * Cin) * lanes(Cout) * bf             # packed main weights
    est += 2 * (9 * Cc) * lanes(nh) * bf                 # packed shared weights
    est += 2 * (9 * nh) * lanes(2 * Cout) * bf           # packed gamma/beta weights
    est += 2 * (lanes(nh) + lanes(2 * Cout)) * f4        # biases
    est += 2 * (Ho * Wo) * lanes(Cout) * bf              # output block
    est += Lg * lanes(nh) * bf                           # actv scratch
    est += L * (lanes(16 * Cin) + lanes(9 * Cc) + lanes(9 * nh)) * bf  # packed LHS
    est += L * (lanes(Cout) + lanes(nh) + lanes(2 * Cout) + lanes(Cout)) * f4
    return int(min(48 * 2**20, max(16 * 2**20, 2 * est)))


# ------------------------------ JAX wrapper ----------------------------------

def spade_block_forward(x_nchw, seg_nchw, params):
    """y = ReLU(SPADE(Conv2d(k=3, s=2, p=1, bias=False)(x), seg)); NCHW in/out (bf16 out)."""
    N, Cin, H, W = x_nchw.shape
    _, Cc, Hs, Ws = seg_nchw.shape
    Cout = params["w_conv"].shape[0]
    nh = params["w_shared"].shape[0]
    bf16 = jnp.bfloat16

    Ho = (H - 1) // 2 + 1
    Wo = (W - 1) // 2 + 1
    Hp, Wp = Ho + 2, Wo + 2                 # shared, zero-padded internal grid
    L = Hp * Wp
    G = ((Wp + 1 + 7) // 8) * 8             # guard rows (>= Wp+1), sublane aligned
    Lg = L + 2 * G

    # ---- main-conv input: 2x2 space-to-depth of zero-padded x on (Hp, Wp) ---
    # (stride-2 3x3 conv -> 4-tap stride-1 conv; same HBM bytes as x itself)
    x_nhwc = jnp.transpose(x_nchw, (0, 2, 3, 1)).astype(bf16)
    xp = jnp.pad(x_nhwc, ((0, 0), (1, 2 * Hp - H - 1), (1, 2 * Wp - W - 1), (0, 0)))
    xs2d = (xp.reshape(N, Hp, 2, Wp, 2, Cin)
              .transpose(0, 1, 3, 2, 4, 5)
              .reshape(N, L, 4 * Cin))
    xs2d = jnp.pad(xs2d, ((0, 0), (G, G), (0, 0)))                 # (N, Lg, 4*Cin)

    # ---- seg: nearest resize to conv-output size, zero-pad by 1 -------------
    seg_nhwc = jnp.transpose(seg_nchw, (0, 2, 3, 1)).astype(bf16)
    if Hs % Ho == 0 and Ws % Wo == 0:
        seg_r = seg_nhwc[:, ::Hs // Ho, ::Ws // Wo]     # integer ratio: strided slice
    else:
        rows = (jnp.arange(Ho) * Hs) // Ho              # PyTorch 'nearest' = floor
        cols = (jnp.arange(Wo) * Ws) // Wo
        seg_r = seg_nhwc[:, rows][:, :, cols]
    segp = jnp.pad(seg_r, ((0, 0), (1, 1), (1, 1), (0, 0))).reshape(N, L, Cc)
    segp = jnp.pad(segp, ((0, 0), (G, G), (0, 0)))                 # (N, Lg, Cc)

    # ---- weights: K-packed RHS matrices (one matmul per stage) --------------
    # stride-2 3x3 conv -> 4 space-to-depth taps stacked along K: (16*Cin, Cout)
    w_pad = jnp.pad(params["w_conv"], ((0, 0), (0, 0), (0, 1), (0, 1)))
    w_main = (w_pad.reshape(Cout, Cin, 2, 2, 2, 2)
                    .transpose(2, 4, 3, 5, 1, 0)
                    .reshape(16 * Cin, Cout)).astype(bf16)
    # stride-1 3x3 convs -> 9 taps stacked along K
    w_sh = (jnp.transpose(params["w_shared"], (2, 3, 1, 0))
              .reshape(9 * Cc, nh)).astype(bf16)
    b_sh = params["b_shared"].reshape(1, nh).astype(jnp.float32)
    w_g = jnp.transpose(params["w_gamma"], (2, 3, 1, 0))           # (3,3,nh,Cout)
    w_b = jnp.transpose(params["w_beta"], (2, 3, 1, 0))
    w_gb = (jnp.concatenate([w_g, w_b], axis=-1)
              .reshape(9 * nh, 2 * Cout)).astype(bf16)             # (9*nh, 2*Cout)
    b_gb = jnp.concatenate([params["b_gamma"], params["b_beta"]]
                           ).reshape(1, 2 * Cout).astype(jnp.float32)

    kernel = functools.partial(_spade_block_kernel, Wp=Wp, Ho=Ho, Wo=Wo, G=G,
                               L=L, Cout=Cout, nh=nh)

    out = pl.pallas_call(
        kernel,
        out_shape=jax.ShapeDtypeStruct((N, Ho * Wo, Cout), bf16),
        grid=(N,),
        in_specs=[
            pl.BlockSpec((1, Lg, 4 * Cin), lambda n: (n, 0, 0)),
            pl.BlockSpec((1, Lg, Cc), lambda n: (n, 0, 0)),
            pl.BlockSpec((16 * Cin, Cout), lambda n: (0, 0)),
            pl.BlockSpec((9 * Cc, nh), lambda n: (0, 0)),
            pl.BlockSpec((1, nh), lambda n: (0, 0)),
            pl.BlockSpec((9 * nh, 2 * Cout), lambda n: (0, 0)),
            pl.BlockSpec((1, 2 * Cout), lambda n: (0, 0)),
        ],
        out_specs=pl.BlockSpec((1, Ho * Wo, Cout), lambda n: (n, 0, 0)),
        scratch_shapes=[pltpu.VMEM((Lg, nh), bf16)],
        compiler_params=pltpu.CompilerParams(
            dimension_semantics=("parallel",),
            vmem_limit_bytes=_vmem_limit_bytes(Lg, L, Cin, Cc, nh, Cout, Ho, Wo)),
    )(xs2d, segp, w_main, w_sh, b_sh, w_gb, b_gb)

    # interior-only bf16 output -> NCHW (append .astype(f32) if strict f32 needed)
    out = out.reshape(N, Ho, Wo, Cout)
    return jnp.transpose(out, (0, 3, 1, 2))


# --------------------------- pure-JAX reference -----------------------------

def _conv_ref(x, w, stride, bias=None):
    y = lax.conv_general_dilated(
        x, w, (stride, stride), ((1, 1), (1, 1)),
        dimension_numbers=("NCHW", "OIHW", "NCHW"),
        precision=lax.Precision.HIGHEST)
    if bias is not None:
        y = y + bias[None, :, None, None]
    return y


def spade_block_reference(x, seg, params, bf16_inputs=False):
    rd = ((lambda a: a.astype(jnp.bfloat16).astype(jnp.float32))
          if bf16_inputs else (lambda a: a))
    conv = _conv_ref(rd(x), rd(params["w_conv"]), 2)
    Ho, Wo = conv.shape[2], conv.shape[3]
    rows = (jnp.arange(Ho) * seg.shape[2]) // Ho
    cols = (jnp.arange(Wo) * seg.shape[3]) // Wo
    seg_r = seg[:, :, rows][:, :, :, cols]
    actv = jax.nn.relu(_conv_ref(rd(seg_r), rd(params["w_shared"]), 1,
                                 params["b_shared"]))
    gamma = _conv_ref(rd(actv), rd(params["w_gamma"]), 1, params["b_gamma"])
    beta = _conv_ref(rd(actv), rd(params["w_beta"]), 1, params["b_beta"])
    mean = conv.mean(axis=(2, 3), keepdims=True)
    var = ((conv - mean) ** 2).mean(axis=(2, 3), keepdims=True)
    normalized = (conv - mean) / jnp.sqrt(var + 1e-5)
    return jax.nn.relu(normalized * (1.0 + gamma) + beta)


# --------------------------------- main --------------------------------------

if __name__ == "__main__":
    N, Cin, Cout, Cc, H, W, nhidden = 2, 4, 8, 3, 16, 16, 32

    key = jax.random.PRNGKey(0)
    ks = jax.random.split(key, 9)
    params = {
        "w_conv":   0.2 * jax.random.normal(ks[0], (Cout, Cin, 3, 3), jnp.float32),
        "w_shared": 0.2 * jax.random.normal(ks[1], (nhidden, Cc, 3, 3), jnp.float32),
        "b_shared": 0.1 * jax.random.normal(ks[2], (nhidden,), jnp.float32),
        "w_gamma":  0.1 * jax.random.normal(ks[3], (Cout, nhidden, 3, 3), jnp.float32),
        "b_gamma":  0.1 * jax.random.normal(ks[4], (Cout,), jnp.float32),
        "w_beta":   0.1 * jax.random.normal(ks[5], (Cout, nhidden, 3, 3), jnp.float32),
        "b_beta":   0.1 * jax.random.normal(ks[6], (Cout,), jnp.float32),
    }
    x = jax.random.normal(ks[7], (N, Cin, H, W), jnp.float32)
    seg = jax.random.normal(ks[8], (N, Cc, H, W), jnp.float32)

    out = jax.jit(spade_block_forward)(x, seg, params)
    out = jax.block_until_ready(out)
    out_f32 = np.asarray(out).astype(np.float32)

    # tight check vs. a reference fed the same bf16-rounded operands
    # (kernel emits bf16, so allow one extra bf16 ulp of rounding)
    ref_bf16 = jax.block_until_ready(
        spade_block_reference(x, seg, params, bf16_inputs=True))
    np.testing.assert_allclose(out_f32, np.asarray(ref_bf16),
                               rtol=1e-2, atol=1e-2)
    # loose sanity check vs. the pure-f32 module semantics
    ref_f32 = jax.block_until_ready(spade_block_reference(x, seg, params))
    np.testing.assert_allclose(out_f32, np.asarray(ref_f32),
                               rtol=1e-1, atol=2e-1)

    print("KERNEL_OK")
</pallas_src>

<mosaic_0001>
module attributes {stable_mosaic.version = 11 : i64} {
  func.func @_spade_block_kernel(%arg0: i32, %arg1: memref<1x132x16xbf16, #tpu.memory_space<vmem>>, %arg2: memref<1x132x3xbf16, #tpu.memory_space<vmem>>, %arg3: memref<64x8xbf16, #tpu.memory_space<vmem>>, %arg4: memref<27x32xbf16, #tpu.memory_space<vmem>>, %arg5: memref<1x32xf32, #tpu.memory_space<vmem>>, %arg6: memref<288x16xbf16, #tpu.memory_space<vmem>>, %arg7: memref<1x16xf32, #tpu.memory_space<vmem>>, %arg8: memref<1x64x8xbf16, #tpu.memory_space<vmem>>, %arg9: memref<132x32xbf16, #tpu.memory_space<vmem>>) attributes {dimension_semantics = [#tpu.dimension_semantics<parallel>], iteration_bounds = array<i64: 2>, scalar_prefetch = 0 : i64, scratch_operands = 1 : i64, tpu.core_type = #tpu.core_type<tc>, window_params = [{transform_indices = @transform_0, window_bounds = array<i64: 1, 132, 16>}, {transform_indices = @transform_1, window_bounds = array<i64: 1, 132, 3>}, {pipeline_mode = #tpu.pipeline_mode<synchronous>, transform_indices = @transform_2, window_bounds = array<i64: 64, 8>}, {pipeline_mode = #tpu.pipeline_mode<synchronous>, transform_indices = @transform_3, window_bounds = array<i64: 27, 32>}, {pipeline_mode = #tpu.pipeline_mode<synchronous>, transform_indices = @transform_4, window_bounds = array<i64: 1, 32>}, {pipeline_mode = #tpu.pipeline_mode<synchronous>, transform_indices = @transform_5, window_bounds = array<i64: 288, 16>}, {pipeline_mode = #tpu.pipeline_mode<synchronous>, transform_indices = @transform_6, window_bounds = array<i64: 1, 16>}, {transform_indices = @transform_7, window_bounds = array<i64: 1, 64, 8>}]} {
    %0 = tpu.iota {dimensions = array<i32: 0>} : vector<100x1xi32>
    %1 = arith.sitofp %0 : vector<100x1xi32> to vector<100x1xf32>
    %cst = arith.constant 5.000000e-01 : f32
    %2 = vector.broadcast %cst : f32 to vector<100x1xf32>
    %3 = arith.addf %1, %2 : vector<100x1xf32>
    %cst_0 = arith.constant 1.000000e-01 : f32
    %4 = vector.broadcast %cst_0 : f32 to vector<100x1xf32>
    %5 = arith.mulf %3, %4 : vector<100x1xf32>
    %6 = math.floor %5 : vector<100x1xf32>
    %cst_1 = arith.constant 1.000000e+01 : f32
    %7 = vector.broadcast %cst_1 : f32 to vector<100x1xf32>
    %8 = arith.mulf %6, %7 : vector<100x1xf32>
    %9 = arith.subf %1, %8 : vector<100x1xf32>
    %cst_2 = arith.constant 5.000000e-01 : f32
    %10 = vector.broadcast %cst_2 : f32 to vector<100x1xf32>
    %11 = arith.cmpf ogt, %6, %10 : vector<100x1xf32>
    %cst_3 = arith.constant 8.500000e+00 : f32
    %12 = vector.broadcast %cst_3 : f32 to vector<100x1xf32>
    %13 = arith.cmpf olt, %6, %12 : vector<100x1xf32>
    %14 = arith.andi %11, %13 : vector<100x1xi1>
    %cst_4 = arith.constant 5.000000e-01 : f32
    %15 = vector.broadcast %cst_4 : f32 to vector<100x1xf32>
    %16 = arith.cmpf ogt, %9, %15 : vector<100x1xf32>
    %17 = arith.andi %14, %16 : vector<100x1xi1>
    %cst_5 = arith.constant 8.500000e+00 : f32
    %18 = vector.broadcast %cst_5 : f32 to vector<100x1xf32>
    %19 = arith.cmpf olt, %9, %18 : vector<100x1xf32>
    %20 = arith.andi %17, %19 : vector<100x1xi1>
    %21 = arith.extui %20 : vector<100x1xi1> to vector<100x1xi32>
    %22 = arith.sitofp %21 : vector<100x1xi32> to vector<100x1xf32>
    %c0 = arith.constant 0 : index
    %c5 = arith.constant 5 : index
    %c0_6 = arith.constant 0 : index
    %23 = vector.load %arg1[%c0, %c5, %c0_6] : memref<1x132x16xbf16, #tpu.memory_space<vmem>>, vector<1x100x16xbf16>
    %24 = vector.shape_cast %23 : vector<1x100x16xbf16> to vector<100x16xbf16>
    %c0_7 = arith.constant 0 : index
    %c6 = arith.constant 6 : index
    %c0_8 = arith.constant 0 : index
    %25 = vector.load %arg1[%c0_7, %c6, %c0_8] : memref<1x132x16xbf16, #tpu.memory_space<vmem>>, vector<1x100x16xbf16>
    %26 = vector.shape_cast %25 : vector<1x100x16xbf16> to vector<100x16xbf16>
    %c0_9 = arith.constant 0 : index
    %c15 = arith.constant 15 : index
    %c0_10 = arith.constant 0 : index
    %27 = vector.load %arg1[%c0_9, %c15, %c0_10] : memref<1x132x16xbf16, #tpu.memory_space<vmem>>, vector<1x100x16xbf16>
    %28 = vector.shape_cast %27 : vector<1x100x16xbf16> to vector<100x16xbf16>
    %c0_11 = arith.constant 0 : index
    %c16 = arith.constant 16 : index
    %c0_12 = arith.constant 0 : index
    %29 = vector.load %arg1[%c0_11, %c16, %c0_12] : memref<1x132x16xbf16, #tpu.memory_space<vmem>>, vector<1x100x16xbf16>
    %30 = vector.shape_cast %29 : vector<1x100x16xbf16> to vector<100x16xbf16>
    %31 = tpu.concatenate %24, %26, %28, %30 in 1 : vector<100x16xbf16>, vector<100x16xbf16>, vector<100x16xbf16>, vector<100x16xbf16> -> vector<100x64xbf16>
    %c0_13 = arith.constant 0 : index
    %c0_14 = arith.constant 0 : index
    %32 = vector.load %arg3[%c0_13, %c0_14] : memref<64x8xbf16, #tpu.memory_space<vmem>>, vector<64x8xbf16>
    %cst_15 = arith.constant dense<0.000000e+00> : vector<100x8xf32>
    %33 = tpu.matmul %31, %32, %cst_15 {dimension_numbers = #tpu.dot_dimension_numbers<[1], [0], [0], [1], [0, 0, 1, 1], [], []>} : vector<100x64xbf16>, vector<64x8xbf16>, vector<100x8xf32> -> vector<100x8xf32>
    %c0_16 = arith.constant 0 : index
    %c5_17 = arith.constant 5 : index
    %c0_18 = arith.constant 0 : index
    %34 = vector.load %arg2[%c0_16, %c5_17, %c0_18] : memref<1x132x3xbf16, #tpu.memory_space<vmem>>, vector<1x100x3xbf16>
    %35 = vector.shape_cast %34 : vector<1x100x3xbf16> to vector<100x3xbf16>
    %c0_19 = arith.constant 0 : index
    %c6_20 = arith.constant 6 : index
    %c0_21 = arith.constant 0 : index
    %36 = vector.load %arg2[%c0_19, %c6_20, %c0_21] : memref<1x132x3xbf16, #tpu.memory_space<vmem>>, vector<1x100x3xbf16>
    %37 = vector.shape_cast %36 : vector<1x100x3xbf16> to vector<100x3xbf16>
    %c0_22 = arith.constant 0 : index
    %c7 = arith.constant 7 : index
    %c0_23 = arith.constant 0 : index
    %38 = vector.load %arg2[%c0_22, %c7, %c0_23] : memref<1x132x3xbf16, #tpu.memory_space<vmem>>, vector<1x100x3xbf16>
    %39 = vector.shape_cast %38 : vector<1x100x3xbf16> to vector<100x3xbf16>
    %c0_24 = arith.constant 0 : index
    %c15_25 = arith.constant 15 : index
    %c0_26 = arith.constant 0 : index
    %40 = vector.load %arg2[%c0_24, %c15_25, %c0_26] : memref<1x132x3xbf16, #tpu.memory_space<vmem>>, vector<1x100x3xbf16>
    %41 = vector.shape_cast %40 : vector<1x100x3xbf16> to vector<100x3xbf16>
    %c0_27 = arith.constant 0 : index
    %c16_28 = arith.constant 16 : index
    %c0_29 = arith.constant 0 : index
    %42 = vector.load %arg2[%c0_27, %c16_28, %c0_29] : memref<1x132x3xbf16, #tpu.memory_space<vmem>>, vector<1x100x3xbf16>
    %43 = vector.shape_cast %42 : vector<1x100x3xbf16> to vector<100x3xbf16>
    %c0_30 = arith.constant 0 : index
    %c17 = arith.constant 17 : index
    %c0_31 = arith.constant 0 : index
    %44 = vector.load %arg2[%c0_30, %c17, %c0_31] : memref<1x132x3xbf16, #tpu.memory_space<vmem>>, vector<1x100x3xbf16>
    %45 = vector.shape_cast %44 : vector<1x100x3xbf16> to vector<100x3xbf16>
    %c0_32 = arith.constant 0 : index
    %c25 = arith.constant 25 : index
    %c0_33 = arith.constant 0 : index
    %46 = vector.load %arg2[%c0_32, %c25, %c0_33] : memref<1x132x3xbf16, #tpu.memory_space<vmem>>, vector<1x100x3xbf16>
    %47 = vector.shape_cast %46 : vector<1x100x3xbf16> to vector<100x3xbf16>
    %c0_34 = arith.constant 0 : index
    %c26 = arith.constant 26 : index
    %c0_35 = arith.constant 0 : index
    %48 = vector.load %arg2[%c0_34, %c26, %c0_35] : memref<1x132x3xbf16, #tpu.memory_space<vmem>>, vector<1x100x3xbf16>
    %49 = vector.shape_cast %48 : vector<1x100x3xbf16> to vector<100x3xbf16>
    %c0_36 = arith.constant 0 : index
    %c27 = arith.constant 27 : index
    %c0_37 = arith.constant 0 : index
    %50 = vector.load %arg2[%c0_36, %c27, %c0_37] : memref<1x132x3xbf16, #tpu.memory_space<vmem>>, vector<1x100x3xbf16>
    %51 = vector.shape_cast %50 : vector<1x100x3xbf16> to vector<100x3xbf16>
    %52 = tpu.concatenate %35, %37, %39, %41, %43, %45, %47, %49, %51 in 1 : vector<100x3xbf16>, vector<100x3xbf16>, vector<100x3xbf16>, vector<100x3xbf16>, vector<100x3xbf16>, vector<100x3xbf16>, vector<100x3xbf16>, vector<100x3xbf16>, vector<100x3xbf16> -> vector<100x27xbf16>
    %c0_38 = arith.constant 0 : index
    %c0_39 = arith.constant 0 : index
    %53 = vector.load %arg4[%c0_38, %c0_39] : memref<27x32xbf16, #tpu.memory_space<vmem>>, vector<27x32xbf16>
    %cst_40 = arith.constant dense<0.000000e+00> : vector<100x32xf32>
    %54 = tpu.matmul %52, %53, %cst_40 {dimension_numbers = #tpu.dot_dimension_numbers<[1], [0], [0], [1], [0, 0, 1, 1], [], []>} : vector<100x27xbf16>, vector<27x32xbf16>, vector<100x32xf32> -> vector<100x32xf32>
    %c0_41 = arith.constant 0 : index
    %c0_42 = arith.constant 0 : index
    %55 = vector.load %arg5[%c0_41, %c0_42] : memref<1x32xf32, #tpu.memory_space<vmem>>, vector<1x32xf32>
    %56 = vector.broadcast %55 : vector<1x32xf32> to vector<100x32xf32>
    %57 = arith.addf %54, %56 : vector<100x32xf32>
    %cst_43 = arith.constant 0.000000e+00 : f32
    %58 = vector.broadcast %cst_43 : f32 to vector<100x32xf32>
    %59 = arith.maximumf %57, %58 : vector<100x32xf32>
    %60 = vector.broadcast %22 : vector<100x1xf32> to vector<100x32xf32>
    %61 = arith.mulf %59, %60 : vector<100x32xf32>
    %cst_44 = arith.constant 0.000000e+00 : bf16
    %62 = vector.broadcast %cst_44 : bf16 to vector<16x32xbf16>
    %c0_45 = arith.constant 0 : index
    %c0_46 = arith.constant 0 : index
    %63 = vector.load %arg9[%c0_45, %c0_46] : memref<132x32xbf16, #tpu.memory_space<vmem>>, vector<16x32xbf16>
    tpu.vector_store %arg9[%c0_45, %c0_46], %62 {strides = array<i32>} : memref<132x32xbf16, #tpu.memory_space<vmem>>, vector<16x32xbf16>,
    %cst_47 = arith.constant 0.000000e+00 : bf16
    %64 = vector.broadcast %cst_47 : bf16 to vector<16x32xbf16>
    %c116 = arith.constant 116 : index
    %c0_48 = arith.constant 0 : index
    %65 = vector.load %arg9[%c116, %c0_48] : memref<132x32xbf16, #tpu.memory_space<vmem>>, vector<16x32xbf16>
    tpu.vector_store %arg9[%c116, %c0_48], %64 {strides = array<i32>} : memref<132x32xbf16, #tpu.memory_space<vmem>>, vector<16x32xbf16>,
    %66 = arith.truncf %61 : vector<100x32xf32> to vector<100x32xbf16>
    %c16_49 = arith.constant 16 : index
    %c0_50 = arith.constant 0 : index
    %67 = vector.load %arg9[%c16_49, %c0_50] : memref<132x32xbf16, #tpu.memory_space<vmem>>, vector<100x32xbf16>
    tpu.vector_store %arg9[%c16_49, %c0_50], %66 {strides = array<i32>} : memref<132x32xbf16, #tpu.memory_space<vmem>>, vector<100x32xbf16>,
    %c5_51 = arith.constant 5 : index
    %c0_52 = arith.constant 0 : index
    %68 = vector.load %arg9[%c5_51, %c0_52] : memref<132x32xbf16, #tpu.memory_space<vmem>>, vector<100x32xbf16>
    %c6_53 = arith.constant 6 : index
    %c0_54 = arith.constant 0 : index
    %69 = vector.load %arg9[%c6_53, %c0_54] : memref<132x32xbf16, #tpu.memory_space<vmem>>, vector<100x32xbf16>
    %c7_55 = arith.constant 7 : index
    %c0_56 = arith.constant 0 : index
    %70 = vector.load %arg9[%c7_55, %c0_56] : memref<132x32xbf16, #tpu.memory_space<vmem>>, vector<100x32xbf16>
    %c15_57 = arith.constant 15 : index
    %c0_58 = arith.constant 0 : index
    %71 = vector.load %arg9[%c15_57, %c0_58] : memref<132x32xbf16, #tpu.memory_space<vmem>>, vector<100x32xbf16>
    %c16_59 = arith.constant 16 : index
    %c0_60 = arith.constant 0 : index
    %72 = vector.load %arg9[%c16_59, %c0_60] : memref<132x32xbf16, #tpu.memory_space<vmem>>, vector<100x32xbf16>
    %c17_61 = arith.constant 17 : index
    %c0_62 = arith.constant 0 : index
    %73 = vector.load %arg9[%c17_61, %c0_62] : memref<132x32xbf16, #tpu.memory_space<vmem>>, vector<100x32xbf16>
    %c25_63 = arith.constant 25 : index
    %c0_64 = arith.constant 0 : index
    %74 = vector.load %arg9[%c25_63, %c0_64] : memref<132x32xbf16, #tpu.memory_space<vmem>>, vector<100x32xbf16>
    %c26_65 = arith.constant 26 : index
    %c0_66 = arith.constant 0 : index
    %75 = vector.load %arg9[%c26_65, %c0_66] : memref<132x32xbf16, #tpu.memory_space<vmem>>, vector<100x32xbf16>
    %c27_67 = arith.constant 27 : index
    %c0_68 = arith.constant 0 : index
    %76 = vector.load %arg9[%c27_67, %c0_68] : memref<132x32xbf16, #tpu.memory_space<vmem>>, vector<100x32xbf16>
    %77 = tpu.concatenate %68, %69, %70, %71, %72, %73, %74, %75, %76 in 1 : vector<100x32xbf16>, vector<100x32xbf16>, vector<100x32xbf16>, vector<100x32xbf16>, vector<100x32xbf16>, vector<100x32xbf16>, vector<100x32xbf16>, vector<100x32xbf16>, vector<100x32xbf16> -> vector<100x288xbf16>
    %c0_69 = arith.constant 0 : index
    %c0_70 = arith.constant 0 : index
    %78 = vector.load %arg6[%c0_69, %c0_70] : memref<288x16xbf16, #tpu.memory_space<vmem>>, vector<288x16xbf16>
    %cst_71 = arith.constant dense<0.000000e+00> : vector<100x16xf32>
    %79 = tpu.matmul %77, %78, %cst_71 {dimension_numbers = #tpu.dot_dimension_numbers<[1], [0], [0], [1], [0, 0, 1, 1], [], []>} : vector<100x288xbf16>, vector<288x16xbf16>, vector<100x16xf32> -> vector<100x16xf32>
    %c0_72 = arith.constant 0 : index
    %c0_73 = arith.constant 0 : index
    %80 = vector.load %arg7[%c0_72, %c0_73] : memref<1x16xf32, #tpu.memory_space<vmem>>, vector<1x16xf32>
    %81 = vector.broadcast %80 : vector<1x16xf32> to vector<100x16xf32>
    %82 = arith.addf %79, %81 : vector<100x16xf32>
    %83 = vector.extract_strided_slice %82 {offsets = [0, 0], sizes = [100, 8], strides = [1, 1]} : vector<100x16xf32> to vector<100x8xf32>
    %84 = vector.extract_strided_slice %82 {offsets = [0, 8], sizes = [100, 8], strides = [1, 1]} : vector<100x16xf32> to vector<100x8xf32>
    %85 = vector.broadcast %22 : vector<100x1xf32> to vector<100x8xf32>
    %86 = arith.mulf %33, %85 : vector<100x8xf32>
    %cst_74 = arith.constant dense<0.000000e+00> : vector<8xf32>
    %87 = vector.multi_reduction <add>, %86, %cst_74 [0] : vector<100x8xf32> to vector<8xf32>
    %88 = vector.shape_cast %87 : vector<8xf32> to vector<1x8xf32>
    %cst_75 = arith.constant 1.562500e-02 : f32
    %89 = vector.broadcast %cst_75 : f32 to vector<1x8xf32>
    %90 = arith.mulf %88, %89 : vector<1x8xf32>
    %91 = vector.broadcast %90 : vector<1x8xf32> to vector<100x8xf32>
    %92 = arith.subf %33, %91 : vector<100x8xf32>
    %93 = vector.broadcast %22 : vector<100x1xf32> to vector<100x8xf32>
    %94 = arith.mulf %92, %93 : vector<100x8xf32>
    %95 = arith.mulf %94, %94 : vector<100x8xf32>
    %cst_76 = arith.constant dense<0.000000e+00> : vector<8xf32>
    %96 = vector.multi_reduction <add>, %95, %cst_76 [0] : vector<100x8xf32> to vector<8xf32>
    %97 = vector.shape_cast %96 : vector<8xf32> to vector<1x8xf32>
    %cst_77 = arith.constant 1.562500e-02 : f32
    %98 = vector.broadcast %cst_77 : f32 to vector<1x8xf32>
    %99 = arith.mulf %97, %98 : vector<1x8xf32>
    %cst_78 = arith.constant 9.99999974E-6 : f32
    %100 = vector.broadcast %cst_78 : f32 to vector<1x8xf32>
    %101 = arith.addf %99, %100 : vector<1x8xf32>
    %102 = math.rsqrt %101 : vector<1x8xf32>
    %103 = vector.broadcast %90 : vector<1x8xf32> to vector<100x8xf32>
    %104 = arith.subf %33, %103 : vector<100x8xf32>
    %105 = vector.broadcast %102 : vector<1x8xf32> to vector<100x8xf32>
    %106 = arith.mulf %104, %105 : vector<100x8xf32>
    %cst_79 = arith.constant 1.000000e+00 : f32
    %107 = vector.broadcast %cst_79 : f32 to vector<100x8xf32>
    %108 = arith.addf %107, %83 : vector<100x8xf32>
    %109 = arith.mulf %106, %108 : vector<100x8xf32>
    %110 = arith.addf %109, %84 : vector<100x8xf32>
    %cst_80 = arith.constant 0.000000e+00 : f32
    %111 = vector.broadcast %cst_80 : f32 to vector<100x8xf32>
    %112 = arith.maximumf %110, %111 : vector<100x8xf32>
    %113 = vector.extract_strided_slice %112 {offsets = [11, 0], sizes = [8, 8], strides = [1, 1]} : vector<100x8xf32> to vector<8x8xf32>
    %114 = vector.extract_strided_slice %112 {offsets = [21, 0], sizes = [8, 8], strides = [1, 1]} : vector<100x8xf32> to vector<8x8xf32>
    %115 = vector.extract_strided_slice %112 {offsets = [31, 0], sizes = [8, 8], strides = [1, 1]} : vector<100x8xf32> to vector<8x8xf32>
    %116 = vector.extract_strided_slice %112 {offsets = [41, 0], sizes = [8, 8], strides = [1, 1]} : vector<100x8xf32> to vector<8x8xf32>
    %117 = vector.extract_strided_slice %112 {offsets = [51, 0], sizes = [8, 8], strides = [1, 1]} : vector<100x8xf32> to vector<8x8xf32>
    %118 = vector.extract_strided_slice %112 {offsets = [61, 0], sizes = [8, 8], strides = [1, 1]} : vector<100x8xf32> to vector<8x8xf32>
    %119 = vector.extract_strided_slice %112 {offsets = [71, 0], sizes = [8, 8], strides = [1, 1]} : vector<100x8xf32> to vector<8x8xf32>
    %120 = vector.extract_strided_slice %112 {offsets = [81, 0], sizes = [8, 8], strides = [1, 1]} : vector<100x8xf32> to vector<8x8xf32>
    %121 = tpu.concatenate %113, %114, %115, %116, %117, %118, %119, %120 in 0 : vector<8x8xf32>, vector<8x8xf32>, vector<8x8xf32>, vector<8x8xf32>, vector<8x8xf32>, vector<8x8xf32>, vector<8x8xf32>, vector<8x8xf32> -> vector<64x8xf32>
    %122 = arith.truncf %121 : vector<64x8xf32> to vector<64x8xbf16>
    %c0_81 = arith.constant 0 : index
    %c0_82 = arith.constant 0 : index
    %c0_83 = arith.constant 0 : index
    %123 = vector.load %arg8[%c0_81, %c0_82, %c0_83] : memref<1x64x8xbf16, #tpu.memory_space<vmem>>, vector<1x64x8xbf16>
    %124 = vector.shape_cast %123 : vector<1x64x8xbf16> to vector<64x8xbf16>
    %125 = vector.shape_cast %122 : vector<64x8xbf16> to vector<1x64x8xbf16>
    tpu.vector_store %arg8[%c0_81, %c0_82, %c0_83], %125 {strides = array<i32>} : memref<1x64x8xbf16, #tpu.memory_space<vmem>>, vector<1x64x8xbf16>,
    return
  }
  func.func @transform_0(%arg0: i32) -> (i32, i32, i32) {
    %c0_i32 = arith.constant 0 : i32
    %c0_i32_0 = arith.constant 0 : i32
    %c0_i32_1 = arith.constant 0 : i32
    return %arg0, %c0_i32, %c0_i32_0 : i32, i32, i32
  }
  func.func @transform_1(%arg0: i32) -> (i32, i32, i32) {
    %c0_i32 = arith.constant 0 : i32
    %c0_i32_0 = arith.constant 0 : i32
    %c0_i32_1 = arith.constant 0 : i32
    return %arg0, %c0_i32, %c0_i32_0 : i32, i32, i32
  }
  func.func @transform_2(%arg0: i32) -> (i32, i32) {
    %c0_i32 = arith.constant 0 : i32
    %c0_i32_0 = arith.constant 0 : i32
    %c0_i32_1 = arith.constant 0 : i32
    return %c0_i32, %c0_i32_0 : i32, i32
  }
  func.func @transform_3(%arg0: i32) -> (i32, i32) {
    %c0_i32 = arith.constant 0 : i32
    %c0_i32_0 = arith.constant 0 : i32
    %c0_i32_1 = arith.constant 0 : i32
    return %c0_i32, %c0_i32_0 : i32, i32
  }
  func.func @transform_4(%arg0: i32) -> (i32, i32) {
    %c0_i32 = arith.constant 0 : i32
    %c0_i32_0 = arith.constant 0 : i32
    %c0_i32_1 = arith.constant 0 : i32
    return %c0_i32, %c0_i32_0 : i32, i32
  }
  func.func @transform_5(%arg0: i32) -> (i32, i32) {
    %c0_i32 = arith.constant 0 : i32
    %c0_i32_0 = arith.constant 0 : i32
    %c0_i32_1 = arith.constant 0 : i32
    return %c0_i32, %c0_i32_0 : i32, i32
  }
  func.func @transform_6(%arg0: i32) -> (i32, i32) {
    %c0_i32 = arith.constant 0 : i32
    %c0_i32_0 = arith.constant 0 : i32
    %c0_i32_1 = arith.constant 0 : i32
    return %c0_i32, %c0_i32_0 : i32, i32
  }
  func.func @transform_7(%arg0: i32) -> (i32, i32, i32) {
    %c0_i32 = arith.constant 0 : i32
    %c0_i32_0 = arith.constant 0 : i32
    %c0_i32_1 = arith.constant 0 : i32
    return %arg0, %c0_i32, %c0_i32_0 : i32, i32, i32
  }
}

</mosaic_0001>

<bundles_post_ra>
// kernel: spade_block_forward.1
= control target key start
LH: loop header
LB: loop body
LE: loop exit
PB: predicated region body
PF: predicated region fallthrough
CT: control target
= control target key end

     0   :  { %s3750_s24 = smov 0   ;;  %s5525_s0 = inlined_call_operand.vmem [shape: bf16[2,132,16], index: 0, kind: input, shape index: {}]   ;;  %s5526_s1 = inlined_call_operand.vmem [shape: bf16[2,132,3], index: 1, kind: input, shape index: {}]   ;;  %s5527_s2 = inlined_call_operand.vmem [shape: bf16[64,8], index: 2, kind: input, shape index: {}]   ;;  %s5528_s3 = inlined_call_operand.vmem [shape: bf16[27,32], index: 3, kind: input, shape index: {}]   ;;  %s5529_s4 = inlined_call_operand.vmem [shape: f32[1,32], index: 4, kind: input, shape index: {}]   ;;  %s5530_s5 = inlined_call_operand.vmem [shape: bf16[288,16], index: 5, kind: input, shape index: {}]   ;;  %s5531_s6 = inlined_call_operand.vmem [shape: f32[1,16], index: 6, kind: input, shape index: {}]   ;;  %s5532_s7 = inlined_call_operand.vmem [shape: bf16[2,64,8], index: 7, kind: output, shape index: {}]  }
   0x1 LB: > { %s3211_s25 = sadd.s32 4294967295, %s3690_s24   ;;  %p3215_p0 = scmp.ge.s32.totalorder %s3690_s24, 1  ;;  %s3690_s24 = sphi %s3750_s24, %s17_s24  }
   0x2   : > { %p247_p1 = scmp.lt.s32.totalorder %s3690_s24, 3 }
   0x4   : > { %p248_p2 = pnand %p3215_p0, %p247_p1 }
   0x5   : > { %p284_p3 = scmp.lt.s32.totalorder (!%p248_p2), %s3211_s25, 1  ;;  %vm648_vm0 = vcmask (!%p248_p2), 1046528   ;;  %s3692_s30 = smov (!%p248_p2), 15   ;;  %vm5541_vm1 = vsmask.f32 (!%p248_p2), 7424  ;;  %vm1231_vm2 = vcmask (!%p248_p2), 1041408  }
   0x6   : > { %251 = sbr.rel (%p248_p2) target bundleno = 986 (0x3da), region = 48  ;;  %s3693_s8 = smov (!%p248_p2), 6   ;;  %vm678_vm3 = vsmask.f32 (!%p248_p2), 2304  ;;  %vm5534_vm4 = vsmask.f32 (!%p248_p2), 1280 }
   0x7   : > { %s3694_s9 = smov (!%p248_p2), 9   ;;  %s3695_s10 = smov (!%p248_p2), 12   ;;  %vm5540_vm5 = vcmask (!%p248_p2), 1040384   ;;  %vm5533_vm6 = vcmask (!%p248_p2), 1044480   ;;  %vm1624_vm7 = vcmask (!%p248_p2), 1045504   ;;  %vm5536_vm8 = vmmov (!%p248_p2), 0  }
   0x8   : > { %s3696_s11 = smov (!%p248_p2), 3   ;;  %s3697_s12 = smov (!%p248_p2), 18   ;;  %vm1403_vm9 = vcmask (!%p248_p2), 23552   ;;  %vm1419_vm10 = vcmask (!%p248_p2), 48128   ;;  %vm1434_vm11 = vcmask (!%p248_p2), 72704   ;;  %vm1449_vm12 = vcmask (!%p248_p2), 97280  }
   0x9   : > { %s3698_s13 = smov (!%p248_p2), 21   ;;  %s3699_s14 = smov (!%p248_p2), 24   ;;  %vm1464_vm13 = vcmask (!%p248_p2), 121856   ;;  %vm1479_vm14 = vcmask (!%p248_p2), 146432   ;;  %vm1494_vm15 = vcmask (!%p248_p2), 171008  }
   0xa   : > { %s3703_s22 = smov (!%p248_p2), 16   ;;  %s3704_s23 = smov (!%p248_p2), 32  }
   0xb   : > { %s3707_s18 = smov (!%p248_p2), 64  }
   0xd   : > { %s5643_s25 = smov (!%p284_p3, %s3211_s25), 1 }
   0xe   : > { %s3575_s26 = smul.u32 68, %s5643_s25 }
  0x10   : > { %s3766_s29 = scalar_lea.vmem %s5526_s1, %s3575_s26  ;;  %s4033_s21 = scalar_lea.vmem %s5525_s0, %s3575_s26 }
  0x11   : > { %v976_v0 = vld [vmem:[%s3766_s29 + $0x8] sm:$0xf]  ;;  %v977_v1 = vld [vmem:[%s3766_s29 + $0xc] sm:$0xf]  ;;  %v3771_v2 = vld [vmem:[%s3766_s29 + $0x4] sm:$0xf] }
  0x12   : > { %v3773_v3 = vcombine.low %v976_v0, %v977_v1  ;;  %v988_v4 = vld [vmem:[%s3766_s29] sm:$0x8]  ;;  %v978_v5 = vld [vmem:[%s3766_s29 + $0x10] sm:$0xf]  ;;  %v979_v6 = vld [vmem:[%s3766_s29 + $0x14] sm:$0xf] }
  0x13   : > { %v3268_v7 = vcombine.low %v988_v4, %v3771_v2  ;;  %v3780_v8 = vld [vmem:[%s3766_s29 + $0x18] sm:$0xf]  ;;  %v990_v9 = vld [vmem:[%s3766_s29 + $0x4] sm:$0x8]  ;;  %v3783_v10 = vcombine.low %v978_v5, %v979_v6  ;;  %v3785_v11 = vcombine.low %v977_v1, %v978_v5  ;;  %v996_v34 = vld [vmem:[%s3766_s29 + $0xc] sm:$0xe] }
  0x14   : > { %v1232_v12 = vrot.slane %v3773_v3, 6  ;;  %v1109_v13 = vrot.slane %v3773_v3, 1  ;;  %v3270_v14 = vcombine.low %v990_v9, %v976_v0  ;;  %v3790_v16 = vcombine.low %v979_v6, %v3780_v8  ;;  %v981_v51 = vld [vmem:[%s3766_s29 + $0x1c] sm:$0xf]  ;;  %v982_v0 = vld [vmem:[%s3766_s29 + $0x20] sm:$0xf] }
  0x15   : > { %v1108_v15 = vrot.slane %v3268_v7, 1  ;;  %v1149_v17 = vrot.slane %v3785_v11, 1  ;;  %v1111_v18 = vrot.slane %v3783_v10, 1  ;;  %v1044_v20 = vshll.u32 %v3773_v3, 16 }
  0x16   : > { %1245 = vrot.lane.b32.xlu0 %v1232_v12, %s3692_s30  ;;  %v1148_v19 = vrot.slane %v3270_v14, 1  ;;  %v1048_v21 = vshrl.u32 %v3773_v3, 16  ;;  %v1037_v23 = vshrl.u32 %v3268_v7, 16  ;;  %v1039_v24 = vshll.u32 %v3268_v7, 16 }
  0x17   : > { %v1110_v22 = vsel %vm648_vm0, %v1108_v15, %v1109_v13  ;;  %v1178_v27 = vrot.slane %v1044_v20, 6  ;;  %v1112_v28 = vsel %vm648_vm0, %v1109_v13, %v1111_v18  ;;  %v1151_v29 = vrot.slane %v3790_v16, 1 }
  0x18   : > { %1121 = vrot.lane.b32.xlu1 %v1110_v22, %s3693_s8  ;;  %v1150_v25 = vsel %vm648_vm0, %v1148_v19, %v1149_v17  ;;  %v1177_v26 = vrot.slane %v1048_v21, 5  ;;  %v1041_v30 = vrot.slane %v1039_v24, 1  ;;  %v1052_v31 = vshll.u32 %v3783_v10, 16  ;;  %v983_v22 = vld [vmem:[%s3766_s29 + $0x24] sm:$0xf] }
  0x19   : > { %v1056_v33 = vshrl.u32 %v3783_v10, 16  ;;  %v1046_v36 = vrot.slane %v1044_v20, 1  ;;  %v1233_v37 = vrot.slane %v3783_v10, 6  ;;  %v1152_v38 = vsel %vm648_vm0, %v1149_v17, %v1151_v29 }
  0x1a   : > { %1161 = vrot.lane.b32.xlu0 %v1150_v25, %s3694_s9  ;;  %v1179_v32 = vor.u32 %v1178_v27, %v1177_v26  ;;  %v1042_v35 = vor.u32 %v1041_v30, %v1037_v23  ;;  %v1181_v40 = vrot.slane %v1052_v31, 6  ;;  %v3282_v41 = vcombine.low %v996_v34, %v978_v5 }
  0x1b   : > { %v1180_v39 = vrot.slane %v1056_v33, 5  ;;  %v1050_v43 = vor.u32 %v1048_v21, %v1046_v36  ;;  %v1054_v44 = vrot.slane %v1052_v31, 1  ;;  %v1305_v45 = vshrl.u32 %v3790_v16, 16 }
  0x1c   : > { %1123 = vrot.lane.b32.xlu1 %v1112_v28, %s3693_s8  ;;  %v1047_v42 = vsel %vm5541_vm1, %v1042_v35, %v1046_v36  ;;  %v1308_v46 = vshll.u32 %v3790_v16, 16  ;;  %v1234_v47 = vsel %vm1231_vm2, %v1232_v12, %v1233_v37  ;;  %v1297_v49 = vshrl.u32 %v3282_v41, 16 }
  0x1d   : > { %v1182_v48 = vor.u32 %v1181_v40, %v1180_v39  ;;  %v1300_v50 = vshll.u32 %v3282_v41, 16  ;;  %v1055_v52 = vsel %vm5541_vm1, %v1050_v43, %v1054_v44  ;;  %v1265_v53 = vrot.slane %v3785_v11, 6 }
  0x1e   : > { %1214 = vrot.lane.b32.xlu0 %v1179_v32, %s3695_s10  ;;  %v1266_v54 = vrot.slane %v3790_v16, 6  ;;  %v1307_v55 = vrot.slane %v1305_v45, 6  ;;  %v1310_v56 = vrot.slane %v1308_v46, 7  ;;  %v1299_v58 = vrot.slane %v1297_v49, 6 }
  0x1f   : > { %v1183_v57 = vsel %vm678_vm3, %v1179_v32, %v1182_v48  ;;  %v1302_v59 = vrot.slane %v1300_v50, 7  ;;  %v3830_v60 = vcombine.low %v3780_v8, %v981_v51  ;;  %v1377_v4 = vrot.slane %v3790_v16, 7 }
  0x20   : > { %1163 = vrot.lane.b32.xlu1 %v1152_v38, %s3694_s9  ;;  %v1267_v61 = vsel %vm1231_vm2, %v1265_v53, %v1266_v54  ;;  %v1311_v63 = vor.u32 %v1310_v56, %v1307_v55  ;;  %v1376_v6 = vrot.slane %v3282_v41, 7  ;;  %v3842_v8 = vcombine.low %v981_v51, %v982_v0  ;;  %v3892_v41 = vld [vmem:[%s3766_s29] sm:$0xc] }
  0x21   : > { %v1303_v62 = vor.u32 %v1302_v59, %v1299_v58  ;;  %v1060_v1 = vshll.u32 %v3830_v60, 16  ;;  %v1064_v7 = vshrl.u32 %v3830_v60, 16  ;;  %v1058_v9 = vor.u32 %v1056_v33, %v1054_v44  ;;  %v984_v33 = vld [vmem:[%s3766_s29 + $0x28] sm:$0xf] }
  0x22   : > { %1091 = vrot.lane.b32.xlu0 %v1047_v42, %s3696_s11  ;;  %v1378_v12 = vsel %vm5540_vm5, %v1376_v6, %v1377_v4  ;;  %v1113_v13 = vrot.slane %v3830_v60, 1  ;;  %v1153_v17 = vrot.slane %v3842_v8, 1  ;;  %v1314_v20 = vshrl.u32 %v3842_v8, 16 }
  0x23   : > { %v1312_v5 = vsel %vm5534_vm4, %v1303_v62, %v1311_v63  ;;  %v1062_v11 = vrot.slane %v1060_v1, 1  ;;  %v1184_v14 = vrot.slane %v1064_v7, 5  ;;  %v1185_v15 = vrot.slane %v1060_v1, 6 }
  0x24   : > { %1247 = vrot.lane.b32.xlu1 %v1234_v47, %s3692_s30  ;;  %v1317_v21 = vshll.u32 %v3842_v8, 16  ;;  %v1114_v23 = vsel %vm648_vm0, %v1111_v18, %v1113_v13  ;;  %v1235_v25 = vrot.slane %v3830_v60, 6  ;;  %v1154_v26 = vsel %vm648_vm0, %v1151_v29, %v1153_v17  ;;  %v3625_v47 = vld [vmem:[%s5528_s3] sm:$0xff]  }
  0x25   : > { %v1063_v19 = vsel %vm5541_vm1, %v1058_v9, %v1062_v11  ;;  %v3857_v24 = vor.u32 %v1185_v15, %v1184_v14  ;;  %v1316_v27 = vrot.slane %v1314_v20, 6  ;;  %v3864_v30 = vcombine.low %v982_v0, %v983_v22 }
  0x26   : > { %1093 = vrot.lane.b32.xlu0 %v1055_v52, %s3696_s11  ;;  %v1319_v28 = vrot.slane %v1317_v21, 7  ;;  %v1268_v31 = vrot.slane %v3842_v8, 6  ;;  %v1236_v16 = vsel %vm1231_vm2, %v1233_v37, %v1235_v25  ;;  %v1379_v35 = vrot.slane %v3842_v8, 7  ;;  %v985_v52 = vld [vmem:[%s3766_s29 + $0x2c] sm:$0xf] }
  0x27   : > { %v1187_v18 = vsel %vm678_vm3, %v1182_v48, %v3857_v24  ;;  %v1068_v32 = vshll.u32 %v3864_v30, 16  ;;  %v1072_v36 = vshrl.u32 %v3864_v30, 16  ;;  %v1066_v38 = vor.u32 %v1064_v7, %v1062_v11  ;;  %v987_v8 = vld [vmem:[%s3766_s29 + $0x34] sm:$0x1] }
  0x28   : > { %1216 = vrot.lane.b32.xlu1 %v1183_v57, %s3695_s10  ;;  %v3876_v29 = vor.u32 %v1319_v28, %v1316_v27  ;;  %v1269_v34 = vsel %vm1231_vm2, %v1266_v54, %v1268_v31  ;;  %v3889_v40 = vcombine.low %v983_v22, %v984_v33  ;;  %v1115_v42 = vrot.slane %v3864_v30, 1  ;;  %v3626_v54 = vld [vmem:[%s5528_s3 + $0x8] sm:$0x3f]  }
  0x29   : > { %v1070_v39 = vrot.slane %v1068_v32, 1  ;;  %v1380_v43 = vsel %vm5540_vm5, %v1377_v4, %v1379_v35  ;;  %v1188_v44 = vrot.slane %v1072_v36, 5  ;;  %v1189_v45 = vrot.slane %v1068_v32, 6  ;;  %v991_v32 = vld [vmem:[%s3766_s29 + $0x34] sm:$0xf] }
  0x2a   : > { %1278 = vrot.lane.b32.xlu0 %v1265_v53, %s3697_s12  ;;  %v1321_v37 = vsel %vm5534_vm4, %v1311_v63, %v3876_v29  ;;  %v3261_v46 = vcombine.low %v3892_v41, %v3771_v2  ;;  %v1155_v49 = vrot.slane %v3889_v40, 1  ;;  %v1323_v50 = vshrl.u32 %v3889_v40, 16 }
  0x2b   : > { %v1071_v48 = vsel %vm5541_vm1, %v1066_v38, %v1070_v39  ;;  %v1326_v51 = vshll.u32 %v3889_v40, 16  ;;  %v1116_v53 = vsel %vm648_vm0, %v1113_v13, %v1115_v42  ;;  %v1190_v55 = vor.u32 %v1189_v45, %v1188_v44 }
  0x2c   : > { %1280 = vrot.lane.b32.xlu1 %v1267_v61, %s3697_s12  ;;  %v3700_v56 = vmov 0.0   ;;  %v1237_v57 = vrot.slane %v3864_v30, 6  ;;  %v3921_v58 = vcombine.low %v984_v33, %v985_v52  ;;  %v3701_v59 = vmov 65535  }
  0x2d   : > { %3511 = vmatprep.subr.bf16.mxu1 %v3700_v56  ;;  %3475 = vmatprep.subr.bf16.mxu0 %v3700_v56  ;;  %v1625_v61 = vsel %vm5533_vm6, 4294967295, %v3701_v59  ;;  %v1325_v63 = vrot.slane %v1323_v50, 6  ;;  %v1328_v0 = vrot.slane %v1326_v51, 7  ;;  %v1381_v14 = vrot.slane %v3889_v40, 7 }
  0x2e   : > { %1358 = vrot.lane.b32.xlu0 %v1303_v62, %s3698_s13  ;;  %3512 = vmatpush3.bf16.msra.mxu1 %v3625_v47  ;;  %v1156_v62 = vsel %vm648_vm0, %v1153_v17, %v1155_v49  ;;  %v1626_v1 = vsel %vm1624_vm7, %v1625_v61, 0  ;;  %v1238_v7 = vsel %vm1231_vm2, %v1235_v25, %v1237_v57  ;;  %v1076_v11 = vshll.u32 %v3921_v58, 16  ;;  %v992_v47 = vld [vmem:[%s3766_s29 + $0x38] sm:$0x3] }
  0x2f   : > { %3513 = vmatprep.subr.bf16.mxu1 %v3700_v56  ;;  %3515 = vmatprep.mubr.msk.bf16.mxu1 %vm5536_vm8, %v3700_v56  ;;  %v1628_v4 = vand.u32 %v3626_v54, %v1626_v1  ;;  %v1329_v9 = vor.u32 %v1328_v0, %v1325_v63  ;;  %v1080_v15 = vshrl.u32 %v3921_v58, 16  ;;  %v1382_v22 = vsel %vm5540_vm5, %v1379_v35, %v1381_v14 }
  0x30   : > { %1360 = vrot.lane.b32.xlu1 %v1312_v5, %s3698_s13  ;;  %3483 = vmatprep.mubr.msk.bf16.mxu0 %vm5536_vm8, %v3700_v56  ;;  %v1191_v5 = vsel %vm678_vm3, %v3857_v24, %v1190_v55  ;;  %v1078_v20 = vrot.slane %v1076_v11, 1  ;;  %v1193_v25 = vrot.slane %v1076_v11, 6  ;;  %vm1509_vm7 = vcmask 195584  }
  0x31   : > { %v1330_v17 = vsel %vm5534_vm4, %v3876_v29, %v1329_v9  ;;  %v1192_v24 = vrot.slane %v1080_v15, 5  ;;  %v1239_v29 = vrot.slane %v3921_v58, 6  ;;  %vm5539_vm6 = vsmask.f32 5376 }
  0x32   : > { %1389 = vrot.lane.b32.xlu0 %v1376_v6, %s3699_s14  ;;  %v1270_v6 = vrot.slane %v3889_v40, 6  ;;  %3514 = vmatpush3.bf16.msra.mxu1 %v1628_v4 }
  0x33   : > { %v1240_v40 = vsel %vm1231_vm2, %v1237_v57, %v1239_v29  ;;  %v3276_v57 = vcombine.low %v991_v32, %v992_v47 }
  0x34   : > { %1391 = vrot.lane.b32.xlu1 %v1378_v12, %s3699_s14  ;;  %v986_v12 = vld [vmem:[%s3766_s29 + $0x30] sm:$0xf]  ;;  %v1271_v13 = vsel %vm1231_vm2, %v1268_v31, %v1270_v6 }
  0x35   : > { %v3951_v21 = vcombine.low %v985_v52, %v986_v12  ;;  %v1159_v4 = vrot.slane %v3276_v57, 1 }
  0x36   : > { %1095 = vrot.lane.b32.xlu0 %v1063_v19, %s3696_s11  ;;  %v1074_v19 = vor.u32 %v1072_v36, %v1070_v39  ;;  %v3974_v36 = vcombine.low %v986_v12, %v987_v8  ;;  %v3979_v39 = vcombine.low %v986_v12, %v991_v32 }
  0x37   : > { %v1157_v27 = vrot.slane %v3951_v21, 1  ;;  %v1332_v28 = vshrl.u32 %v3951_v21, 16 }
  0x38   : > { %1125 = vrot.lane.b32.xlu1 %v1114_v23, %s3693_s8  ;;  %v1117_v23 = vrot.slane %v3921_v58, 1  ;;  %v1084_v44 = vshll.u32 %v3974_v36, 16  ;;  %v1197_v51 = vshrl.u32 %v3979_v39, 16  ;;  %v1200_v52 = vshll.u32 %v3979_v39, 16 }
  0x39   : > { %v1158_v33 = vsel %vm648_vm0, %v1155_v49, %v1157_v27  ;;  %v1383_v49 = vrot.slane %v3951_v21, 7  ;;  %v1160_v11 = vsel %vm648_vm0, %v1157_v27, %v1159_v4  ;;  %v3622_v27 = vld [vmem:[%s3766_s29 + $0x3c] ss:$0 sps:$4 sm:$0x77]  }
  0x3a   : > { %1165 = vrot.lane.b32.xlu0 %v1154_v26, %s3694_s9  ;;  %v1079_v26 = vsel %vm5541_vm1, %v1074_v19, %v1078_v20  ;;  %v1118_v31 = vsel %vm648_vm0, %v1115_v42, %v1117_v23  ;;  %v989_v42 = vld [vmem:[%s3766_s29 + $0x34] sm:$0x3]  ;;  %v1199_v63 = vrot.slane %v1197_v51, 5  ;;  %v1202_v0 = vrot.slane %v1200_v52, 6  ;;  %v513_v51 = vld [vmem:[%s4033_s21 + $0x10] sm:$0xf] }
  0x3b   : > { %v3269_v50 = vcombine.low %v986_v12, %v989_v42  ;;  %v1384_v61 = vsel %vm5540_vm5, %v1381_v14, %v1383_v49  ;;  %v1241_v12 = vrot.slane %v3979_v39, 6  ;;  %v1276_v42 = vrot.slane %v3622_v27, 6  ;;  %v514_v52 = vld [vmem:[%s4033_s21 + $0x14] sm:$0xf] }
  0x3c   : > { %1218 = vrot.lane.b32.xlu1 %v1187_v18, %s3695_s10  ;;  %v1335_v18 = vshll.u32 %v3951_v21, 16  ;;  %v4050_v57 = vcombine.low %v513_v51, %v514_v52 }
  0x3e   : > { %1249 = vrot.lane.b32.xlu0 %v1236_v16, %s3692_s30  ;;  %v1194_v16 = vor.u32 %v1193_v25, %v1192_v24  ;;  %v1337_v35 = vrot.slane %v1335_v18, 7 }
  0x40   : > { %1282 = vrot.lane.b32.xlu1 %v1269_v34, %s3697_s12  ;;  %v1334_v34 = vrot.slane %v1332_v28, 6  ;;  %v1195_v38 = vsel %vm678_vm3, %v1190_v55, %v1194_v16  ;;  %v1086_v55 = vrot.slane %v1084_v44, 1  ;;  %v511_v44 = vld [vmem:[%s4033_s21 + $0x8] sm:$0xf] }
  0x42   : > { %1362 = vrot.lane.b32.xlu0 %v1321_v37, %s3698_s13  ;;  %v1272_v37 = vrot.slane %v3951_v21, 6 }
  0x44   : > { %1393 = vrot.lane.b32.xlu1 %v1380_v43, %s3699_s14  ;;  %v1338_v43 = vor.u32 %v1337_v35, %v1334_v34  ;;  %v1273_v45 = vsel %vm1231_vm2, %v1270_v6, %v1272_v37 }
  0x46   : > { %1097 = vrot.lane.b32.xlu0 %v1071_v48, %s3696_s11  ;;  %v994_v48 = vld [vmem:[%s3766_s29 + $0x38] sm:$0xf]  ;;  %v1339_v54 = vsel %vm5534_vm4, %v1329_v9, %v1338_v43  ;;  %v1203_v9 = vor.u32 %v1202_v0, %v1199_v63 }
  0x47   : > { %v3994_v59 = vcombine.low %v991_v32, %v994_v48  ;;  %v1353_v32 = vshll.u32 %v3622_v27, 16 }
  0x48   : > { %1127 = vrot.lane.b32.xlu1 %v1116_v53, %s3693_s8  ;;  %v1082_v53 = vor.u32 %v1080_v15, %v1078_v20  ;;  %v3278_v15 = vcombine.low %v992_v47, %v992_v47  ;;  %v1242_v20 = vsel %vm1231_vm2, %v1239_v29, %v1241_v12  ;;  %v1350_v29 = vshrl.u32 %v3622_v27, 16  ;;  %v4039_v47 = vld [vmem:[%s4033_s21 + $0x4] sm:$0xf] }
  0x49   : > { %v1344_v6 = vshll.u32 %v3994_v59, 16  ;;  %v1274_v19 = vrot.slane %v3994_v59, 6 }
  0x4a   : > { %1167 = vrot.lane.b32.xlu0 %v1156_v62, %s3694_s9  ;;  %v1119_v62 = vrot.slane %v3269_v50, 1  ;;  %v1087_v1 = vsel %vm5541_vm1, %v1082_v53, %v1086_v55  ;;  %v1206_v24 = vshrl.u32 %v3278_v15, 16  ;;  %v1209_v25 = vshll.u32 %v3278_v15, 16  ;;  %v523_v50 = vld [vmem:[%s4033_s21] sm:$0x8] }
  0x4b   : > { %v1346_v14 = vrot.slane %v1344_v6, 7  ;;  %v1352_v35 = vrot.slane %v1350_v29, 6  ;;  %v3240_v53 = vcombine.low %v523_v50, %v4039_v47  ;;  %v517_v29 = vld [vmem:[%s4033_s21 + $0x20] sm:$0xf] }
  0x4c   : > { %1220 = vrot.lane.b32.xlu1 %v1191_v5, %s3695_s10  ;;  %v1341_v5 = vshrl.u32 %v3994_v59, 16  ;;  %v1208_v8 = vrot.slane %v1206_v24, 5  ;;  %v586_v24 = vshrl.u32 %v4050_v57, 16 }
  0x4e   : > { %1251 = vrot.lane.b32.xlu0 %v1238_v7, %s3692_s30  ;;  %v1120_v7 = vsel %vm648_vm0, %v1117_v23, %v1119_v62  ;;  %v1385_v23 = vrot.slane %v3994_v59, 7 }
  0x50   : > { %1284 = vrot.lane.b32.xlu1 %v1271_v13, %s3697_s12  ;;  %v1343_v13 = vrot.slane %v1341_v5, 6  ;;  %v1386_v18 = vsel %vm5540_vm5, %v1383_v49, %v1385_v23 }
  0x52   : > { %1364 = vrot.lane.b32.xlu0 %v1330_v17, %s3698_s13  ;;  %v1204_v17 = vsel %vm678_vm3, %v1194_v16, %v1203_v9  ;;  %v1347_v21 = vor.u32 %v1346_v14, %v1343_v13  ;;  %v524_v13 = vld [vmem:[%s4033_s21 + $0x4] sm:$0x8] }
  0x54   : > { %1395 = vrot.lane.b32.xlu1 %v1382_v22, %s3699_s14  ;;  %v1275_v22 = vsel %vm1231_vm2, %v1272_v37, %v1274_v19  ;;  %v1348_v28 = vsel %vm5534_vm4, %v1338_v43, %v1347_v21  ;;  %v1355_v37 = vrot.slane %v1353_v32, 7  ;;  %v518_v32 = vld [vmem:[%s4033_s21 + $0x24] sm:$0xf] }
  0x56   : > { %1099 = vrot.lane.b32.xlu0 %v1079_v26, %s3696_s11  ;;  %v1088_v26 = vshrl.u32 %v3974_v36, 16  ;;  %v1356_v43 = vor.u32 %v1355_v37, %v1352_v35  ;;  %v4077_v35 = vcombine.low %v517_v29, %v518_v32 }
  0x58   : > { %1129 = vrot.lane.b32.xlu1 %v1118_v31, %s3693_s8  ;;  %v1211_v31 = vrot.slane %v1209_v25, 6  ;;  %v1090_v16 = vor.u32 %v1088_v26, %v1086_v55  ;;  %v516_v25 = vld [vmem:[%s4033_s21 + $0x1c] sm:$0xf] }
  0x59   : > { %v3244_v37 = vcombine.low %v516_v25, %v517_v29 }
  0x5a   : > { %1169 = vrot.lane.b32.xlu0 %v1158_v33, %s3694_s9  ;;  %v3621_v33 = vld [vmem:[%s3766_s29 + $0x38] ss:$0 sps:$4 sm:$0x77]   ;;  %v1212_v34 = vor.u32 %v1211_v31, %v1208_v8  ;;  %v682_v31 = vrot.slane %v586_v24, 5 }
  0x5c   : > { %1222 = vrot.lane.b32.xlu1 %v1195_v38, %s3695_s10  ;;  %v1243_v38 = vrot.slane %v3621_v33, 6  ;;  %v1213_v39 = vsel %vm678_vm3, %v1203_v9, %v1212_v34 }
  0x5e   : > { %1253 = vrot.lane.b32.xlu0 %v1240_v40, %s3692_s30  ;;  %v3623_v40 = vld [vmem:[%s3766_s29 + $0x3c] ss:$0 sps:$4 sm:$0xff]   ;;  %v1244_v48 = vsel %vm1231_vm2, %v1241_v12, %v1243_v38  ;;  %v515_v12 = vld [vmem:[%s4033_s21 + $0x18] sm:$0xf] }
  0x5f   : > { %v1387_v55 = vrot.slane %v3623_v40, 7  ;;  %v3243_v15 = vcombine.low %v514_v52, %v515_v12  ;;  %v4072_v8 = vcombine.low %v515_v12, %v516_v25 }
  0x60   : > { %1286 = vrot.lane.b32.xlu1 %v1273_v45, %s3697_s12  ;;  %v512_v45 = vld [vmem:[%s4033_s21 + $0xc] sm:$0xf] }
  0x61   : > { %v4042_v49 = vcombine.low %v511_v44, %v512_v45  ;;  %v1388_v6 = vsel %vm5540_vm5, %v1385_v23, %v1387_v55  ;;  %v3242_v14 = vcombine.low %v512_v45, %v513_v51  ;;  %v594_v40 = vshrl.u32 %v4072_v8, 16  ;;  %v3644_v45 = vld [vmem:[%s5527_s2] sm:$0xff]  }
  0x62   : > { %1366 = vrot.lane.b32.xlu0 %v1339_v54, %s3698_s13  ;;  %v1277_v54 = vsel %vm1231_vm2, %v1274_v19, %v1276_v42  ;;  %v590_v42 = vshll.u32 %v4072_v8, 16  ;;  %3476 = vmatpush3.bf16.msra.mxu0 %v3644_v45 }
  0x63   : > { %v574_v59 = vshll.u32 %v4042_v49, 16  ;;  %v578_v0 = vshrl.u32 %v4042_v49, 16  ;;  %v686_v51 = vrot.slane %v594_v40, 5  ;;  %3477 = vmatprep.subr.bf16.mxu0 %v3700_v56 }
  0x64   : > { %1397 = vrot.lane.b32.xlu1 %v1384_v61, %s3699_s14  ;;  %v1357_v61 = vsel %vm5534_vm4, %v1347_v21, %v1356_v43  ;;  %v650_v21 = vrot.slane %v3242_v14, 1  ;;  %v592_v50 = vrot.slane %v590_v42, 1  ;;  %v687_v52 = vrot.slane %v590_v42, 6 }
  0x65   : > { %v576_v63 = vrot.slane %v574_v59, 1  ;;  %v679_v27 = vrot.slane %v578_v0, 5  ;;  %vm1601_vm4 = vcmask 220160  }
  0x66   : > { %1101 = vrot.lane.b32.xlu0 %v1087_v1, %s3696_s11  ;;  %v582_v1 = vshll.u32 %v4050_v57, 16 }
  0x68   : > { %1131 = vrot.lane.b32.xlu1 %v1120_v7, %s3693_s8  ;;  %v580_v7 = vor.u32 %v578_v0, %v576_v63  ;;  %v584_v9 = vrot.slane %v582_v1, 1 }
  0x6a   : > { %1171 = vrot.lane.b32.xlu0 %v1160_v11, %s3694_s9  ;;  %v585_v19 = vsel %vm5541_vm1, %v580_v7, %v584_v9  ;;  %v588_v43 = vor.u32 %v586_v24, %v584_v9 }
  0x6c   : > { %1224 = vrot.lane.b32.xlu1 %v1204_v17, %s3695_s10  ;;  %v3241_v17 = vcombine.low %v524_v13, %v511_v44  ;;  %v519_v44 = vld [vmem:[%s4033_s21 + $0x28] sm:$0xf]  ;;  %v593_v0 = vsel %vm5541_vm1, %v588_v43, %v592_v50  ;;  %v596_v13 = vor.u32 %v594_v40, %v592_v50  ;;  %v526_v43 = vld [vmem:[%s4033_s21 + $0x38] sm:$0x3] }
  0x6e   : > { %1255 = vrot.lane.b32.xlu0 %v1242_v20, %s3692_s30  ;;  %v649_v23 = vrot.slane %v3241_v17, 1  ;;  %v4110_v17 = vld [vmem:[%s4033_s21 + $0x34] sm:$0xf] }
  0x70   : > { %1288 = vrot.lane.b32.xlu1 %v1275_v22, %s3697_s12  ;;  %v652_v22 = vrot.slane %v3243_v15, 1  ;;  %v651_v26 = vsel %vm648_vm0, %v649_v23, %v650_v21  ;;  %v522_v15 = vld [vmem:[%s4033_s21 + $0x34] sm:$0x1] }
  0x72   : > { %1368 = vrot.lane.b32.xlu0 %v1348_v28, %s3698_s13  ;;  %v680_v28 = vrot.slane %v574_v59, 6  ;;  %v653_v33 = vsel %vm648_vm0, %v650_v21, %v652_v22  ;;  %v654_v59 = vrot.slane %v3244_v37, 1  ;;  %v4131_v37 = vld [vmem:[%s4033_s21] sm:$0xc] }
  0x74   : > { %1399 = vrot.lane.b32.xlu1 %v1386_v18, %s3699_s14  ;;  %v681_v34 = vor.u32 %v680_v28, %v679_v27  ;;  %v655_v12 = vsel %vm648_vm0, %v652_v22, %v654_v59 }
  0x76   : > { %1103 = vrot.lane.b32.xlu0 %v1090_v16, %s3696_s11  ;;  %v683_v16 = vrot.slane %v582_v1, 6  ;;  %v688_v1 = vor.u32 %v687_v52, %v686_v51  ;;  %s3708_s11 = smov 96  }
  0x78   : > { %1133 = vrot.lane.b32.xlu1 %v1119_v62, %s3693_s8  ;;  %v569_v62 = vshll.u32 %v3240_v53, 16 }
  0x7a   : > { %1173 = vrot.lane.b32.xlu0 %v1159_v4, %s3694_s9  ;;  %v567_v4 = vshrl.u32 %v3240_v53, 16  ;;  %v571_v5 = vrot.slane %v569_v62, 1  ;;  %v520_v53 = vld [vmem:[%s4033_s21 + $0x2c] sm:$0xf] }
  0x7b   : > { %v3645_v62 = vld [vmem:[%s5527_s2 + $0x8] sm:$0xff]  }
  0x7c   : > { %1226 = vrot.lane.b32.xlu1 %v1213_v39, %s3695_s10  ;;  %v572_v11 = vor.u32 %v571_v5, %v567_v4  ;;  %v684_v39 = vor.u32 %v683_v16, %v682_v31  ;;  %v4101_v4 = vcombine.low %v519_v44, %v520_v53  ;;  %v3245_v5 = vcombine.low %v518_v32, %v519_v44 }
  0x7d   : > { %3478 = vmatpush3.bf16.msra.mxu0 %v3645_v62 }
  0x7e   : > { %1257 = vrot.lane.b32.xlu0 %v1244_v48, %s3692_s30  ;;  %v577_v20 = vsel %vm5541_vm1, %v572_v11, %v576_v63  ;;  %v685_v55 = vsel %vm678_vm3, %v681_v34, %v684_v39  ;;  %s3705_s30 = smov 48   ;;  %v521_v11 = vld [vmem:[%s4033_s21 + $0x30] sm:$0xf]  ;;  %v610_v21 = vshrl.u32 %v4101_v4, 16  ;;  %3479 = vmatprep.subr.bf16.mxu0 %v3700_v56  ;;  %v689_v22 = vsel %vm678_vm3, %v684_v39, %v688_v1 }
  0x7f   : > { %v656_v23 = vrot.slane %v3245_v5, 1  ;;  %v606_v24 = vshll.u32 %v4101_v4, 16  ;;  %v3246_v27 = vcombine.low %v520_v53, %v521_v11  ;;  %v4121_v28 = vcombine.low %v521_v11, %v522_v15 }
  0x80   : > { %1290 = vrot.lane.b32.xlu1 %v1277_v54, %s3697_s12  ;;  %v602_v54 = vshrl.u32 %v4077_v35, 16  ;;  %v3248_v31 = vcombine.low %v521_v11, %v4110_v17  ;;  %v3233_v53 = vcombine.low %v4131_v37, %v4039_v47 }
  0x81   : > { %v657_v39 = vsel %vm648_vm0, %v654_v59, %v656_v23  ;;  %v608_v40 = vrot.slane %v606_v24, 1  ;;  %v658_v41 = vrot.slane %v3246_v27, 1 }
  0x82   : > { %1370 = vrot.lane.b32.xlu0 %v1357_v61, %s3698_s13  ;;  %v598_v61 = vshll.u32 %v4077_v35, 16  ;;  %v690_v7 = vrot.slane %v602_v54, 5  ;;  %v699_v45 = vshrl.u32 %v3248_v31, 16  ;;  %v702_v52 = vshll.u32 %v3248_v31, 16 }
  0x83   : > { %v612_v5 = vor.u32 %v610_v21, %v608_v40 }
  0x84   : > { %1401 = vrot.lane.b32.xlu1 %v1388_v6, %s3699_s14  ;;  %v691_v9 = vrot.slane %v598_v61, 6  ;;  %v600_v14 = vrot.slane %v598_v61, 1  ;;  %v3247_v61 = vcombine.low %v4110_v17, %v526_v43  ;;  %v704_v11 = vrot.slane %v702_v52, 6  ;;  %s3366_s14 = sshll.u32 %s5643_s25, 5 }
  0x85   : > { %s5488_s17 = scalar_lea.vmem %s5532_s7, %s3366_s14 }
  0x86   : > { %621 = vrot.lane.b32.xlu0 %v577_v20, %s3703_s22  ;;  %v601_v16 = vsel %vm5541_vm1, %v596_v13, %v600_v14  ;;  %v604_v42 = vor.u32 %v602_v54, %v600_v14  ;;  %v660_v14 = vrot.slane %v3247_v61, 1 }
  0x88   : > { %v4069_v18 = vpop.permute.xlu0 %1245  ;;  %623 = vrot.lane.b32.xlu1 %v585_v19, %s3703_s22  ;;  %v3646_v19 = vld [vmem:[%s5527_s2 + $0x10] sm:$0xff]   ;;  %v609_v62 = vsel %vm5541_vm1, %v604_v42, %v608_v40  ;;  %v661_v27 = vsel %vm648_vm0, %v658_v41, %v660_v14 }
  0x89   : > { %3480 = vmatpush3.bf16.msra.mxu0 %v3646_v19 }
  0x8a   : > { %v4079_v38 = vpop.permute.xlu1 %1121  ;;  %662 = vrot.lane.b32.xlu0 %v651_v26, %s3704_s23  ;;  %v692_v26 = vor.u32 %v691_v9, %v690_v7  ;;  %3481 = vmatprep.subr.bf16.mxu0 %v3700_v56  ;;  %v701_v9 = vrot.slane %v699_v45, 5 }
  0x8c   : > { %v4088_v48 = vpop.permute.xlu0 %1161  ;;  %664 = vrot.lane.b32.xlu1 %v653_v33, %s3704_s23  ;;  %v694_v33 = vrot.slane %v610_v21, 5  ;;  %v693_v2 = vsel %vm678_vm3, %v688_v1, %v692_v26 }
  0x8e   : > { %v1124_v63 = vpop.permute.xlu1 %1123  ;;  %716 = vrot.lane.b32.xlu0 %v681_v34, %s3705_s30  ;;  %v695_v34 = vrot.slane %v606_v24, 6 }
  0x90   : > { %v4103_v6 = vpop.permute.xlu0 %1214  ;;  %718 = vrot.lane.b32.xlu1 %v685_v55, %s3705_s30  ;;  %v696_v59 = vor.u32 %v695_v34, %v694_v33 }
  0x92   : > { %v1164_v20 = vpop.permute.xlu1 %1163  ;;  %625 = vrot.lane.b32.xlu0 %v593_v0, %s3703_s22  ;;  %v3249_v0 = vcombine.low %v526_v43, %v526_v43  ;;  %v697_v13 = vsel %vm678_vm3, %v692_v26, %v696_v59 }
  0x94   : > { %v1092_v25 = vpop.permute.xlu0 %1091  ;;  %666 = vrot.lane.b32.xlu1 %v655_v12, %s3704_s23  ;;  %v708_v17 = vshrl.u32 %v3249_v0, 16  ;;  %v711_v19 = vshll.u32 %v3249_v0, 16 }
  0x95   : > { %v1406_v29 = vsel %vm1403_vm9, %v3261_v46, %v1092_v25  ;;  %v614_v46 = vshll.u32 %v4121_v28, 16 }
  0x96   : > { %v1248_v32 = vpop.permute.xlu1 %1247  ;;  %720 = vrot.lane.b32.xlu0 %v689_v22, %s3705_s30  ;;  %v1421_v50 = vsel %vm1419_vm10, %v1406_v29, %v4079_v38  ;;  %v705_v22 = vor.u32 %v704_v11, %v701_v9  ;;  %v710_v31 = vrot.slane %v708_v17, 5 }
  0x97   : > { %v1436_v38 = vsel %vm1434_vm11, %v1421_v50, %v4088_v48  ;;  %v616_v7 = vrot.slane %v614_v46, 1 }
  0x98   : > { %v1094_v44 = vpop.permute.xlu0 %1093  ;;  %627 = vrot.lane.b32.xlu1 %v601_v16, %s3703_s22  ;;  %v1451_v15 = vsel %vm1449_vm12, %v1436_v38, %v4103_v6  ;;  %v618_v6 = vshrl.u32 %v4121_v28, 16  ;;  %v713_v16 = vrot.slane %v711_v19, 6  ;;  %v706_v34 = vsel %vm678_vm3, %v696_v59, %v705_v22 }
  0x99   : > { %v1408_v51 = vsel %vm1403_vm9, %v3773_v3, %v1094_v44  ;;  %v617_v21 = vsel %vm5541_vm1, %v612_v5, %v616_v7 }
  0x9a   : > { %v1423_v54 = vsel %vm1419_vm10, %v1408_v51, %v1124_v63  ;;  %v1217_v55 = vpop.permute.xlu1 %1216  ;;  %668 = vrot.lane.b32.xlu0 %v657_v39, %s3704_s23  ;;  %v659_v63 = vsel %vm648_vm0, %v656_v23, %v658_v41  ;;  %v1466_v23 = vsel %vm1464_vm13, %v1451_v15, %v4069_v18  ;;  %v620_v44 = vor.u32 %v618_v6, %v616_v7 }
  0x9b   : > { %v1438_v3 = vsel %vm1434_vm11, %v1423_v54, %v1164_v20  ;;  %v714_v41 = vor.u32 %v713_v16, %v710_v31 }
  0x9c   : > { %v1279_v1 = vpop.permute.xlu0 %1278  ;;  %722 = vrot.lane.b32.xlu1 %v693_v2, %s3705_s30  ;;  %v1453_v48 = vsel %vm1449_vm12, %v1438_v3, %v1217_v55 }
  0x9d   : > { %v1468_v24 = vsel %vm1464_vm13, %v1453_v48, %v1248_v32  ;;  %v1481_v26 = vsel %vm1479_vm14, %v1466_v23, %v1279_v1  ;;  %v715_v0 = vsel %vm678_vm3, %v705_v22, %v714_v41 }
  0x9e   : > { %v1281_v12 = vpop.permute.xlu1 %1280  ;;  %629 = vrot.lane.b32.xlu0 %v609_v62, %s3703_s22 }
  0x9f   : > { %v1483_v18 = vsel %vm1479_vm14, %v1468_v24, %v1281_v12 }
  0xa0   : > { %v1359_v20 = vpop.permute.xlu0 %1358  ;;  %670 = vrot.lane.b32.xlu1 %v659_v63, %s3704_s23 }
  0xa1   : > { %v1496_v29 = vsel %vm1494_vm15, %v1481_v26, %v1359_v20 }
  0xa2   : > { %v1361_v25 = vpop.permute.xlu1 %1360  ;;  %724 = vrot.lane.b32.xlu0 %v697_v13, %s3705_s30 }
  0xa3   : > { %v1498_v39 = vsel %vm1494_vm15, %v1483_v18, %v1361_v25 }
  0xa4   : > { %v1390_v33 = vpop.permute.xlu0 %1389  ;;  %631 = vrot.lane.b32.xlu1 %v617_v21, %s3703_s22 }
  0xa5   : > { %v1511_v32 = vsel %vm1509_vm7, %v1496_v29, %v1390_v33 }
  0xa6   : > { %v1535_v42 = vshrl.u32 %v1511_v32, 16  ;;  %v1538_v40 = vshll.u32 %v1511_v32, 16  ;;  %v1392_v43 = vpop.permute.xlu1 %1391  ;;  %672 = vrot.lane.b32.xlu0 %v661_v27, %s3704_s23 }
  0xa7   : > { %v1513_v2 = vsel %vm1509_vm7, %v1498_v39, %v1392_v43 }
  0xa8   : > { %v1537_v46 = vrot.slane %v1535_v42, 2  ;;  %v1540_v45 = vrot.slane %v1538_v40, 3  ;;  %v1542_v50 = vshrl.u32 %v1513_v2, 16  ;;  %v1545_v51 = vshll.u32 %v1513_v2, 16  ;;  %v1096_v52 = vpop.permute.xlu0 %1095  ;;  %726 = vrot.lane.b32.xlu1 %v706_v34, %s3705_s30 }
  0xa9   : > { %v1410_v54 = vsel %vm1403_vm9, %v3783_v10, %v1096_v52 }
  0xaa   : > { %v1541_v55 = vor.u32 %v1540_v45, %v1537_v46  ;;  %v1544_v59 = vrot.slane %v1542_v50, 2  ;;  %v1547_v61 = vrot.slane %v1545_v51, 3  ;;  %v1126_v62 = vpop.permute.xlu1 %1125  ;;  %633 = vrot.lane.b32.xlu0 %v620_v44, %s3703_s22 }
  0xab   : > { %v1425_v3 = vsel %vm1419_vm10, %v1410_v54, %v1126_v62 }
  0xac   : > { %v1548_v38 = vor.u32 %v1547_v61, %v1544_v59  ;;  %v1166_v1 = vpop.permute.xlu0 %1165  ;;  %674 = vrot.lane.b32.xlu1 %v660_v14, %s3704_s23 }
  0xad   : > { %v1440_v63 = vsel %vm1434_vm11, %v1425_v3, %v1166_v1 }
  0xae   : > { %v1219_v5 = vpop.permute.xlu1 %1218  ;;  %v1549_v10 = vsel %vm5539_vm6, %v1541_v55, %v1548_v38  ;;  %728 = vrot.lane.b32.xlu0 %v715_v0, %s3705_s30 }
  0xaf   : > { %3516 = vmatmul.mubr.msk.bf16.vlgmr.msra.gmra.mrb[0].mxu1 %vm1601_vm4, %v1549_v10  ;;  %v1455_v7 = vsel %vm1449_vm12, %v1440_v63, %v1219_v5 }
  0xb0   : > { %v1250_v9 = vpop.permute.xlu0 %1249  ;;  %3519 = vmatprep.mubr.msk.bf16.mxu1 %vm5536_vm8, %v3700_v56 }
  0xb1   : > { %v1470_v11 = vsel %vm1464_vm13, %v1455_v7, %v1250_v9 }
  0xb2   : > { %v1283_v12 = vpop.permute.xlu1 %1282 }
  0xb3   : > { %v1485_v13 = vsel %vm1479_vm14, %v1470_v11, %v1283_v12 }
  0xb4   : > { %v1363_v14 = vpop.permute.xlu0 %1362 }
  0xb5   : > { %v1500_v48 = vsel %vm1494_vm15, %v1485_v13, %v1363_v14 }
  0xb6   : > { %v1394_v15 = vpop.permute.xlu1 %1393 }
  0xb7   : > { %v1515_v17 = vsel %vm1509_vm7, %v1500_v48, %v1394_v15 }
  0xb8   : > { %v1550_v19 = vshrl.u32 %v1515_v17, 16  ;;  %v1553_v20 = vshll.u32 %v1515_v17, 16  ;;  %v1098_v21 = vpop.permute.xlu0 %1097 }
  0xb9   : > { %v1412_v22 = vsel %vm1403_vm9, %v3830_v60, %v1098_v21 }
  0xba   : > { %v1552_v23 = vrot.slane %v1550_v19, 2  ;;  %v1555_v24 = vrot.slane %v1553_v20, 3  ;;  %v1128_v25 = vpop.permute.xlu1 %1127 }
  0xbb   : > { %v1427_v26 = vsel %vm1419_vm10, %v1412_v22, %v1128_v25 }
  0xbc   : > { %v1556_v6 = vor.u32 %v1555_v24, %v1552_v23  ;;  %v1168_v27 = vpop.permute.xlu0 %1167 }
  0xbd   : > { %v1442_v31 = vsel %vm1434_vm11, %v1427_v26, %v1168_v27 }
  0xbe   : > { %v1221_v16 = vpop.permute.xlu1 %1220  ;;  %v1557_v29 = vsel %vm5539_vm6, %v1548_v38, %v1556_v6 }
  0xbf   : > { %3520 = vmatmul.mubr.msk.bf16.gmra.mrb[4].mxu1 %vm1601_vm4, %v1557_v29  ;;  %v1457_v33 = vsel %vm1449_vm12, %v1442_v31, %v1221_v16 }
  0xc0   : > { %v1252_v18 = vpop.permute.xlu0 %1251  ;;  %3523 = vmatprep.mubr.msk.bf16.mxu1 %vm5536_vm8, %v3700_v56 }
  0xc1   : > { %v1472_v60 = vsel %vm1464_vm13, %v1457_v33, %v1252_v18 }
  0xc2   : > { %v1285_v32 = vpop.permute.xlu1 %1284 }
  0xc3   : > { %v1487_v34 = vsel %vm1479_vm14, %v1472_v60, %v1285_v32 }
  0xc4   : > { %v1365_v39 = vpop.permute.xlu0 %1364 }
  0xc5   : > { %v1502_v42 = vsel %vm1494_vm15, %v1487_v34, %v1365_v39 }
  0xc6   : > { %v1396_v40 = vpop.permute.xlu1 %1395 }
  0xc7   : > { %v1517_v43 = vsel %vm1509_vm7, %v1502_v42, %v1396_v40 }
  0xc8   : > { %v1558_v44 = vshrl.u32 %v1517_v43, 16  ;;  %v1561_v2 = vshll.u32 %v1517_v43, 16  ;;  %v1100_v41 = vpop.permute.xlu0 %1099 }
  0xc9   : > { %v1414_v46 = vsel %vm1403_vm9, %v3864_v30, %v1100_v41 }
  0xca   : > { %v1560_v45 = vrot.slane %v1558_v44, 2  ;;  %v1563_v50 = vrot.slane %v1561_v2, 3  ;;  %v1130_v51 = vpop.permute.xlu1 %1129 }
  0xcb   : > { %v1429_v54 = vsel %vm1419_vm10, %v1414_v46, %v1130_v51 }
  0xcc   : > { %v1564_v52 = vor.u32 %v1563_v50, %v1560_v45  ;;  %v1170_v55 = vpop.permute.xlu0 %1169 }
  0xcd   : > { %v1444_v59 = vsel %vm1434_vm11, %v1429_v54, %v1170_v55 }
  0xce   : > { %v1223_v61 = vpop.permute.xlu1 %1222  ;;  %v1565_v62 = vsel %vm5539_vm6, %v1556_v6, %v1564_v52 }
  0xcf   : > { %3524 = vmatmul.mubr.msk.bf16.gmra.mrb[8].mxu1 %vm1601_vm4, %v1565_v62  ;;  %v1459_v0 = vsel %vm1449_vm12, %v1444_v59, %v1223_v61 }
  0xd0   : > { %v1254_v38 = vpop.permute.xlu0 %1253  ;;  %3527 = vmatprep.mubr.msk.bf16.mxu1 %vm5536_vm8, %v3700_v56 }
  0xd1   : > { %v1474_v30 = vsel %vm1464_vm13, %v1459_v0, %v1254_v38 }
  0xd2   : > { %v1287_v3 = vpop.permute.xlu1 %1286 }
  0xd3   : > { %v1489_v1 = vsel %vm1479_vm14, %v1474_v30, %v1287_v3 }
  0xd4   : > { %v1367_v63 = vpop.permute.xlu0 %1366 }
  0xd5   : > { %v1504_v5 = vsel %vm1494_vm15, %v1489_v1, %v1367_v63 }
  0xd6   : > { %v1398_v10 = vpop.permute.xlu1 %1397 }
  0xd7   : > { %v1519_v7 = vsel %vm1509_vm7, %v1504_v5, %v1398_v10 }
  0xd8   : > { %v1566_v9 = vshrl.u32 %v1519_v7, 16  ;;  %v1569_v11 = vshll.u32 %v1519_v7, 16  ;;  %v1102_v12 = vpop.permute.xlu0 %1101 }
  0xd9   : > { %v1416_v13 = vsel %vm1403_vm9, %v3921_v58, %v1102_v12 }
  0xda   : > { %v1568_v14 = vrot.slane %v1566_v9, 2  ;;  %v1571_v48 = vrot.slane %v1569_v11, 3  ;;  %v1132_v15 = vpop.permute.xlu1 %1131 }
  0xdb   : > { %v1431_v19 = vsel %vm1419_vm10, %v1416_v13, %v1132_v15 }
  0xdc   : > { %v1572_v17 = vor.u32 %v1571_v48, %v1568_v14  ;;  %v1172_v20 = vpop.permute.xlu0 %1171 }
  0xdd   : > { %v1446_v21 = vsel %vm1434_vm11, %v1431_v19, %v1172_v20 }
  0xde   : > { %v1225_v22 = vpop.permute.xlu1 %1224  ;;  %v1573_v23 = vsel %vm5539_vm6, %v1564_v52, %v1572_v17 }
  0xdf   : > { %3528 = vmatmul.mubr.msk.bf16.gmra.mrb[12].mxu1 %vm1601_vm4, %v1573_v23  ;;  %v1461_v24 = vsel %vm1449_vm12, %v1446_v21, %v1225_v22 }
  0xe0   : > { %v1256_v25 = vpop.permute.xlu0 %1255  ;;  %3531 = vmatprep.mubr.msk.bf16.mxu1 %vm5536_vm8, %v3700_v56 }
  0xe1   : > { %v1476_v58 = vsel %vm1464_vm13, %v1461_v24, %v1256_v25 }
  0xe2   : > { %v1289_v6 = vpop.permute.xlu1 %1288 }
  0xe3   : > { %v1491_v26 = vsel %vm1479_vm14, %v1476_v58, %v1289_v6 }
  0xe4   : > { %v1369_v27 = vpop.permute.xlu0 %1368 }
  0xe5   : > { %v1506_v31 = vsel %vm1494_vm15, %v1491_v26, %v1369_v27 }
  0xe6   : > { %v1400_v16 = vpop.permute.xlu1 %1399 }
  0xe7   : > { %v1521_v29 = vsel %vm1509_vm7, %v1506_v31, %v1400_v16 }
  0xe8   : > { %v1574_v33 = vshrl.u32 %v1521_v29, 16  ;;  %v1577_v18 = vshll.u32 %v1521_v29, 16  ;;  %v1104_v60 = vpop.permute.xlu0 %1103 }
  0xe9   : > { %v1418_v32 = vsel %vm1403_vm9, %v3974_v36, %v1104_v60  ;;  %vm730_vm9 = vcmask 130048  }
  0xea   : > { %v1576_v34 = vrot.slane %v1574_v33, 2  ;;  %v1579_v39 = vrot.slane %v1577_v18, 3  ;;  %v1134_v42 = vpop.permute.xlu1 %1133 }
  0xeb   : > { %v1433_v43 = vsel %vm1419_vm10, %v1418_v32, %v1134_v42  ;;  %vm5538_vm10 = vcmask 261120  }
  0xec   : > { %v1580_v40 = vor.u32 %v1579_v39, %v1576_v34  ;;  %v1174_v44 = vpop.permute.xlu0 %1173  ;;  %v3706_v34 = vmov 0  }
  0xed   : > { %v1448_v2 = vsel %vm1434_vm11, %v1433_v43, %v1174_v44  ;;  %vm761_vm11 = vcmask 392192  }
  0xee   : > { %v1227_v41 = vpop.permute.xlu1 %1226  ;;  %v1581_v46 = vsel %vm5539_vm6, %v1572_v17, %v1580_v40 }
  0xef   : > { %3532 = vmatmul.mubr.msk.bf16.gmra.mrb[16].mxu1 %vm1601_vm4, %v1581_v46  ;;  %v1463_v45 = vsel %vm1449_vm12, %v1448_v2, %v1227_v41  ;;  %vm5535_vm12 = vcmask 523264  }
  0xf0   : > { %v1258_v50 = vpop.permute.xlu0 %1257  ;;  %3535 = vmatprep.mubr.msk.bf16.mxu1 %vm5536_vm8, %v3700_v56 }
  0xf1   : > { %v1478_v36 = vsel %vm1464_vm13, %v1463_v45, %v1258_v50  ;;  %vm1744_vm13 = vcmask 257024  }
  0xf2   : > { %v1291_v51 = vpop.permute.xlu1 %1290  ;;  %1745 = vst.msk [vmem:[#allocation2] sm:$0xf] %vm1744_vm13, %v3706_v34  ;;  %1746 = vst.msk [vmem:[#allocation2 + $0x4] sm:$0xf] %vm1744_vm13, %v3706_v34 }
  0xf3   : > { %v1493_v52 = vsel %vm1479_vm14, %v1478_v36, %v1291_v51  ;;  %1749 = vst.msk [vmem:[#allocation2 + $0x3c] sm:$0xf] %vm1744_vm13, %v3706_v34  ;;  %vm1747_vm14 = vcmask 257026  }
  0xf4   : > { %v1371_v54 = vpop.permute.xlu0 %1370  ;;  %1748 = vst.msk [vmem:[#allocation2 + $0x38] sm:$0xc] %vm1747_vm14, %v3706_v34 }
  0xf5   : > { %v1508_v55 = vsel %vm1494_vm15, %v1493_v52, %v1371_v54 }
  0xf6   : > { %v1402_v59 = vpop.permute.xlu1 %1401 }
  0xf7   : > { %v1523_v61 = vsel %vm1509_vm7, %v1508_v55, %v1402_v59 }
  0xf8   : > { %v1582_v62 = vshrl.u32 %v1523_v61, 16  ;;  %v1585_v0 = vshll.u32 %v1523_v61, 16  ;;  %v622_v38 = vpop.permute.xlu0 %621 }
  0xf9   : > { %v733_v63 = vsel %vm730_vm9, %v3233_v53, %v622_v38 }
  0xfa   : > { %v1584_v30 = vrot.slane %v1582_v62, 2  ;;  %v1587_v3 = vrot.slane %v1585_v0, 3  ;;  %v624_v1 = vpop.permute.xlu1 %623 }
  0xfb   : > { %v735_v7 = vsel %vm730_vm9, %v4042_v49, %v624_v1  ;;  %v3647_v49 = vld [vmem:[%s5527_s2 + $0x18] sm:$0xff]  }
  0xfc   : > { %v1588_v5 = vor.u32 %v1587_v3, %v1584_v30  ;;  %v663_v10 = vpop.permute.xlu0 %662  ;;  %3482 = vmatpush3.bf16.msra.mxu0 %v3647_v49 }
  0xfd   : > { %v748_v12 = vsel %vm5538_vm10, %v733_v63, %v663_v10  ;;  %3543 = vmatprep.subr.bf16.mxu0 %v3700_v56 }
  0xfe   : > { %v1589_v9 = vsel %vm5539_vm6, %v1580_v40, %v1588_v5  ;;  %v665_v11 = vpop.permute.xlu1 %664 }
  0xff   : > { %3536 = vmatmul.mubr.msk.bf16.gmra.mrb[20].mxu1 %vm1601_vm4, %v1589_v9  ;;  %v750_v47 = vsel %vm5538_vm10, %v735_v7, %v665_v11 }
 0x100   : > { %3539 = vmatprep.mubr.msk.bf16.mxu1 %vm5536_vm8, %v3700_v56  ;;  %v717_v37 = vpop.permute.xlu0 %716 }
 0x101   : > { %v763_v53 = vsel %vm761_vm11, %v748_v12, %v717_v37 }
 0x102   : > { %v719_v13 = vpop.permute.xlu1 %718  ;;  %v785_v14 = vshrl.u32 %v763_v53, 16  ;;  %v788_v48 = vshll.u32 %v763_v53, 16 }
 0x103   : > { %v765_v15 = vsel %vm761_vm11, %v750_v47, %v719_v13 }
 0x104   : > { %v792_v17 = vshrl.u32 %v765_v15, 16  ;;  %v795_v19 = vshll.u32 %v765_v15, 16  ;;  %v787_v20 = vrot.slane %v785_v14, 2  ;;  %v790_v21 = vrot.slane %v788_v48, 3  ;;  %v626_v22 = vpop.permute.xlu0 %625 }
 0x105   : > { %v737_v23 = vsel %vm730_vm9, %v4050_v57, %v626_v22 }
 0x106   : > { %v794_v24 = vrot.slane %v792_v17, 2  ;;  %v797_v25 = vrot.slane %v795_v19, 3  ;;  %v791_v58 = vor.u32 %v790_v21, %v787_v20  ;;  %v667_v6 = vpop.permute.xlu1 %666 }
 0x107   : > { %3540 = vmatmul.mubr.msk.bf16.gmra.mrb[24].mxu1 %vm1601_vm4, %v1588_v5  ;;  %v752_v26 = vsel %vm5538_vm10, %v737_v23, %v667_v6  ;;  %v300_v6 = vlaneseq }
 0x108   : > { %v798_v27 = vor.u32 %v797_v25, %v794_v24  ;;  %v721_v31 = vpop.permute.xlu0 %720  ;;  %v3654_v25 = vld [vmem:[%s5530_s5 + $0x80] sm:$0xff]  }
 0x109   : > { %v767_v16 = vsel %vm761_vm11, %v752_v26, %v721_v31  ;;  %v4325_v26 = vshrl.u32 %v300_v6, 7 }
 0x10a   : > { %v800_v29 = vshrl.u32 %v767_v16, 16  ;;  %v803_v33 = vshll.u32 %v767_v16, 16  ;;  %v799_v57 = vsel %vm5539_vm6, %v791_v58, %v798_v27  ;;  %v628_v18 = vpop.permute.xlu1 %627  ;;  %v3655_v58 = vld [vmem:[%s5530_s5 + $0x88] sm:$0xff]  }
 0x10b   : > { %3484 = vmatmul.mubr.msk.bf16.vlgmr.msra.gmra.mrb[0].mxu0 %vm5535_vm12, %v799_v57  ;;  %v739_v39 = vsel %vm730_vm9, %v4072_v8, %v628_v18  ;;  %v302_v31 = vadd.s32 8, %v4325_v26  ;;  %v303_v18 = vadd.s32 16, %v4325_v26  ;;  %v4333_v34 = vadd.s32 32, %v4325_v26 }
 0x10c   : > { %v802_v60 = vrot.slane %v800_v29, 2  ;;  %v805_v32 = vrot.slane %v803_v33, 3  ;;  %3487 = vmatprep.mubr.msk.bf16.mxu0 %vm5536_vm8, %v3700_v56  ;;  %v669_v42 = vpop.permute.xlu0 %668  ;;  %3544 = vmatpush3.bf16.msra.mxu0 %v3654_v25 }
 0x10d   : > { %v754_v43 = vsel %vm5538_vm10, %v739_v39, %v669_v42  ;;  %3545 = vmatprep.subr.bf16.mxu0 %v3700_v56  ;;  %v315_v29 = vcvt.s32.f32 %v302_v31  ;;  %v316_v39 = vcvt.s32.f32 %v303_v18  ;;  %v304_v42 = vadd.s32 24, %v4325_v26 }
 0x10e   : > { %v806_v40 = vor.u32 %v805_v32, %v802_v60  ;;  %v723_v44 = vpop.permute.xlu1 %722 }
 0x10f   : > { %v769_v2 = vsel %vm761_vm11, %v754_v43, %v723_v44  ;;  %v328_v57 = vadd.f32 0.5, %v315_v29  ;;  %v329_v44 = vadd.f32 0.5, %v316_v39 }
 0x110   : > { %v808_v41 = vshrl.u32 %v769_v2, 16  ;;  %v811_v46 = vshll.u32 %v769_v2, 16  ;;  %v807_v45 = vsel %vm5539_vm6, %v798_v27, %v806_v40  ;;  %v630_v51 = vpop.permute.xlu0 %629  ;;  %3546 = vmatpush3.bf16.msra.mxu0 %v3655_v58  ;;  %v314_v27 = vcvt.s32.f32 %v4325_v26 }
 0x111   : > { %v741_v8 = vsel %vm730_vm9, %v4077_v35, %v630_v51  ;;  %v341_v32 = vmul.f32 0.1, %v328_v57  ;;  %v317_v2 = vcvt.s32.f32 %v304_v42  ;;  %v4336_v51 = vadd.s32 40, %v4325_v26 }
 0x112   : > { %v810_v50 = vrot.slane %v808_v41, 2  ;;  %v813_v36 = vrot.slane %v811_v46, 3  ;;  %v671_v54 = vpop.permute.xlu1 %670  ;;  %v327_v16 = vadd.f32 0.5, %v314_v27 }
 0x113   : > { %3488 = vmatmul.mubr.msk.bf16.gmra.mrb[4].mxu0 %vm5535_vm12, %v807_v45  ;;  %v756_v55 = vsel %vm5538_vm10, %v741_v8, %v671_v54  ;;  %v354_v43 = vfloor.f32 %v341_v32  ;;  %v342_v45 = vmul.f32 0.1, %v329_v44  ;;  %v318_v54 = vcvt.s32.f32 %v4333_v34 }
 0x114   : > { %v814_v52 = vor.u32 %v813_v36, %v810_v50  ;;  %3491 = vmatprep.mubr.msk.bf16.mxu0 %vm5536_vm8, %v3700_v56  ;;  %v725_v59 = vpop.permute.xlu0 %724  ;;  %v340_v33 = vmul.f32 0.1, %v327_v16  ;;  %v330_v50 = vadd.f32 0.5, %v317_v2  ;;  %v4378_v16 = vadd.s32 64, %v4325_v26 }
 0x115   : > { %v771_v61 = vsel %vm761_vm11, %v756_v55, %v725_v59  ;;  %v367_v46 = vmul.f32 10.0, %v354_v43  ;;  %vm393_vm14 = vcmp.gt.f32.partialorder %v354_v43, 0.5  ;;  %v319_v55 = vcvt.s32.f32 %v4336_v51  ;;  %v4343_v59 = vld [vmem:[%s5529_s4] ss:$0 sm:$0xff] }
 0x116   : > { %v816_v62 = vshrl.u32 %v771_v61, 16  ;;  %v819_v0 = vshll.u32 %v771_v61, 16  ;;  %v815_v38 = vsel %vm5539_vm6, %v806_v40, %v814_v52  ;;  %v632_v1 = vpop.permute.xlu1 %631  ;;  %v353_v60 = vfloor.f32 %v340_v33 }
 0x117   : > { %v743_v35 = vsel %vm730_vm9, %v4101_v4, %v632_v1  ;;  %v380_v36 = vsub.f32 %v315_v29, %v367_v46  ;;  %v343_v8 = vmul.f32 0.1, %v330_v50  ;;  %v322_v44 = vcvt.s32.f32 %v4378_v16 }
 0x118   : > { %v818_v30 = vrot.slane %v816_v62, 2  ;;  %v821_v3 = vrot.slane %v819_v0, 3  ;;  %v673_v5 = vpop.permute.xlu0 %672  ;;  %v366_v40 = vmul.f32 10.0, %v353_v60  ;;  %vm392_vm15 = vcmp.gt.f32.partialorder %v353_v60, 0.5 }
 0x119   : > { %v758_v10 = vsel %vm5538_vm10, %v743_v35, %v673_v5  ;;  %vm405_vm7 = vcmp.lt.f32.partialorder %v353_v60, 8.5  ;;  %v356_v62 = vfloor.f32 %v343_v8  ;;  %v331_v0 = vadd.f32 0.5, %v318_v54 }
 0x11a   : > { %v822_v63 = vor.u32 %v821_v3, %v818_v30  ;;  %v727_v7 = vpop.permute.xlu1 %726  ;;  %v379_v41 = vsub.f32 %v314_v27, %v366_v40  ;;  %v332_v30 = vadd.f32 0.5, %v319_v55  ;;  %v4399_v46 = vadd.s32 72, %v4325_v26 }
 0x11b   : > { %3492 = vmatmul.mubr.msk.bf16.gmra.mrb[8].mxu0 %vm5535_vm12, %v815_v38  ;;  %v773_v9 = vsel %vm761_vm11, %v758_v10, %v727_v7  ;;  %v369_v10 = vmul.f32 10.0, %v356_v62  ;;  %v344_v7 = vmul.f32 0.1, %v331_v0  ;;  %v335_v0 = vadd.f32 0.5, %v322_v44 }
 0x11c   : > { %3495 = vmatprep.mubr.msk.bf16.mxu0 %vm5536_vm8, %v3700_v56  ;;  %v824_v11 = vshrl.u32 %v773_v9, 16  ;;  %v827_v12 = vshll.u32 %v773_v9, 16  ;;  %v823_v47 = vsel %vm5539_vm6, %v814_v52, %v822_v63  ;;  %v634_v13 = vpop.permute.xlu0 %633  ;;  %v355_v52 = vfloor.f32 %v342_v45 }
 0x11d   : > { %v745_v4 = vsel %vm730_vm9, %v4121_v28, %v634_v13  ;;  %vm418_vm9 = vmand %vm392_vm15, %vm405_vm7  ;;  %vm458_vm7 = vcmp.lt.f32.partialorder %v380_v36, 8.5  ;;  %v1832_v13 = vld [vmem:[#allocation2] sm:$0x8] }
 0x11e   : > { %v826_v37 = vrot.slane %v824_v11, 2  ;;  %v829_v53 = vrot.slane %v827_v12, 3  ;;  %v675_v48 = vpop.permute.xlu1 %674  ;;  %v368_v61 = vmul.f32 10.0, %v355_v52 }
 0x11f   : > { %v760_v49 = vsel %vm5538_vm10, %v745_v4, %v675_v48  ;;  %v4361_v4 = vadd.s32 56, %v4325_v26 }
 0x120   : > { %v830_v14 = vor.u32 %v829_v53, %v826_v37  ;;  %v729_v15 = vpop.permute.xlu0 %728  ;;  %v381_v5 = vsub.f32 %v316_v39, %v368_v61  ;;  %v4355_v37 = vadd.s32 48, %v4325_v26 }
 0x121   : > { %v775_v17 = vsel %vm761_vm11, %v760_v49, %v729_v15  ;;  %vm431_vm11 = vcmp.gt.f32.partialorder %v379_v41, 0.5  ;;  %v382_v15 = vsub.f32 %v317_v2, %v369_v10 }
 0x122   : > { %v831_v19 = vsel %vm5539_vm6, %v822_v63, %v830_v14  ;;  %v832_v20 = vshrl.u32 %v775_v17, 16  ;;  %v835_v21 = vshll.u32 %v775_v17, 16  ;;  %vm444_vm4 = vmand %vm418_vm9, %vm431_vm11  ;;  %v357_v17 = vfloor.f32 %v344_v7 }
 0x123   : > { %3496 = vmatmul.mubr.msk.bf16.gmra.mrb[12].mxu0 %vm5535_vm12, %v823_v47  ;;  %v1819_v47 = vld [vmem:[#allocation2 + $0x4] sm:$0xf]  ;;  %vm408_vm9 = vcmp.lt.f32.partialorder %v356_v62, 8.5 }
 0x124   : > { %3499 = vmatprep.mubr.msk.bf16.mxu0 %vm5536_vm8, %v3700_v56  ;;  %v834_v22 = vrot.slane %v832_v20, 2  ;;  %v837_v23 = vrot.slane %v835_v21, 3  ;;  %v4366_v21 = vcombine.low %v1832_v13, %v1819_v47  ;;  %v370_v25 = vmul.f32 10.0, %v357_v17 }
 0x126   : > { %v838_v24 = vor.u32 %v837_v23, %v834_v22  ;;  %v320_v22 = vcvt.s32.f32 %v4355_v37  ;;  %v1883_v58 = vshll.u32 %v4366_v21, 16  ;;  %v1952_v33 = vrot.slane %v4366_v21, 1 }
 0x127   : > { %v1881_v57 = vshrl.u32 %v4366_v21, 16  ;;  %v383_v18 = vsub.f32 %v318_v54, %v370_v25  ;;  %v4458_v21 = vadd.s32 80, %v4325_v26 }
 0x128   : > { %v839_v28 = vsel %vm5539_vm6, %v830_v14, %v838_v24  ;;  %vm432_vm6 = vcmp.gt.f32.partialorder %v380_v36, 0.5  ;;  %v345_v14 = vmul.f32 0.1, %v332_v30  ;;  %v333_v6 = vadd.f32 0.5, %v320_v22 }
 0x129   : > { %v1885_v32 = vrot.slane %v1883_v58, 1  ;;  %v4473_v58 = vadd.s32 88, %v4325_v26 }
 0x12a   : > { %v358_v23 = vfloor.f32 %v345_v14  ;;  %v346_v39 = vmul.f32 0.1, %v333_v6 }
 0x12b   : > { %3500 = vmatmul.mubr.msk.bf16.gmra.mrb[16].mxu0 %vm5535_vm12, %v831_v19 }
 0x12c   : > { %3503 = vmatprep.mubr.msk.bf16.mxu0 %vm5536_vm8, %v3700_v56  ;;  %v371_v27 = vmul.f32 10.0, %v358_v23  ;;  %v4412_v54 = vfloor.f32 %v346_v39 }
 0x12e   : > { %v384_v40 = vsub.f32 %v319_v55, %v371_v27 }
 0x133   : > { %3504 = vmatmul.mubr.msk.bf16.gmra.mrb[20].mxu0 %vm5535_vm12, %v839_v28 }
 0x134   : > { %3507 = vmatprep.mubr.msk.bf16.mxu0 %vm5536_vm8, %v3700_v56 }
 0x13b   : > { %3508 = vmatmul.mubr.msk.bf16.gmra.mrb[24].mxu0 %vm5535_vm12, %v838_v24  ;;  %vm406_vm12 = vcmp.lt.f32.partialorder %v354_v43, 8.5  ;;  %v321_v24 = vcvt.s32.f32 %v4361_v4 }
 0x13c   : > { %3547 = vmatprep.mubr.msk.bf16.mxu0 %vm5536_vm8, %v3700_v56  ;;  %vm457_vm8 = vcmp.lt.f32.partialorder %v379_v41, 8.5  ;;  %vm419_vm10 = vmand %vm393_vm14, %vm406_vm12  ;;  %vm433_vm12 = vcmp.gt.f32.partialorder %v381_v5, 0.5  ;;  %vm459_vm14 = vcmp.lt.f32.partialorder %v381_v5, 8.5 }
 0x13d   : > { %vm470_vm5 = vmand %vm444_vm4, %vm457_vm8  ;;  %vm395_vm4 = vcmp.gt.f32.partialorder %v356_v62, 0.5  ;;  %v334_v31 = vadd.f32 0.5, %v321_v24 }
 0x13e   : > { %vm445_vm15 = vmand %vm419_vm10, %vm432_vm6  ;;  %v4350_v3 = vsel %vm470_vm5, 1.0, %v3700_v56  ;;  %vm394_vm6 = vcmp.gt.f32.partialorder %v355_v52, 0.5  ;;  %vm407_vm10 = vcmp.lt.f32.partialorder %v355_v52, 8.5 }
 0x13f   : > { %vm471_vm8 = vmand %vm445_vm15, %vm458_vm7  ;;  %vm434_vm7 = vcmp.gt.f32.partialorder %v382_v15, 0.5  ;;  %v347_v43 = vmul.f32 0.1, %v334_v31  ;;  %v1834_v31 = vld [vmem:[#allocation2 + $0x4] sm:$0x8] }
 0x140   : > { %v4358_v53 = vsel %vm471_vm8, 1.0, %v3700_v56  ;;  %vm420_vm5 = vmand %vm394_vm6, %vm407_vm10  ;;  %vm460_vm10 = vcmp.lt.f32.partialorder %v382_v15, 8.5  ;;  %v348_v15 = vmul.f32 0.1, %v335_v0 }
 0x141   : > { %vm446_vm11 = vmand %vm420_vm5, %vm433_vm12  ;;  %vm396_vm5 = vcmp.gt.f32.partialorder %v357_v17, 0.5  ;;  %vm409_vm12 = vcmp.lt.f32.partialorder %v357_v17, 8.5  ;;  %v4421_v62 = vfloor.f32 %v347_v43  ;;  %v3665_v43 = vld [vmem:[%s5530_s5 + $0x40] sm:$0xff]  }
 0x142   : > { %vm421_vm15 = vmand %vm395_vm4, %vm408_vm9  ;;  %vm397_vm9 = vcmp.gt.f32.partialorder %v358_v23, 0.5  ;;  %3408 = vmatprep.subr.bf16.mxu1 %v3665_v43 }
 0x143   : > { %vm472_vm8 = vmand %vm446_vm11, %vm459_vm14  ;;  %vm410_vm11 = vcmp.lt.f32.partialorder %v358_v23, 8.5  ;;  %vm435_vm14 = vcmp.gt.f32.partialorder %v383_v18, 0.5  ;;  %v373_v47 = vmul.f32 10.0, %v4421_v62 }
 0x144   : > { %vm4380_vm6 = vmand %vm421_vm15, %vm434_vm7  ;;  %v4389_v60 = vsel %vm472_vm8, 1.0, %v3700_v56  ;;  %vm436_vm8 = vcmp.gt.f32.partialorder %v384_v40, 0.5 }
 0x145   : > { %vm473_vm4 = vmand %vm4380_vm6, %vm460_vm10  ;;  %vm461_vm10 = vcmp.lt.f32.partialorder %v383_v18, 8.5  ;;  %v4470_v25 = vsub.f32 %v321_v24, %v373_v47  ;;  %v324_v24 = vcvt.s32.f32 %v4458_v21  ;;  %v325_v18 = vcvt.s32.f32 %v4473_v58 }
 0x146   : > { %vm422_vm15 = vmand %vm396_vm5, %vm409_vm12  ;;  %v4415_v55 = vsel %vm473_vm4, 1.0, %v3700_v56  ;;  %vm462_vm12 = vcmp.lt.f32.partialorder %v384_v40, 8.5 }
 0x147   : > { %vm4417_vm7 = vmand %vm397_vm9, %vm410_vm11  ;;  %vm398_vm11 = vcmp.gt.f32.partialorder %v4412_v54, 0.5 }
 0x148   : > { %vm4431_vm6 = vmand %vm422_vm15, %vm435_vm14  ;;  %vm411_vm14 = vcmp.lt.f32.partialorder %v4412_v54, 8.5 }
 0x149   : > { %vm449_vm5 = vmand %vm4417_vm7, %vm436_vm8  ;;  %vm399_vm8 = vcmp.gt.f32.partialorder %v4421_v62, 0.5 }
 0x14a   : > { %vm474_vm4 = vmand %vm4431_vm6, %vm461_vm10  ;;  %vm412_vm6 = vcmp.lt.f32.partialorder %v4421_v62, 8.5  ;;  %vm438_vm10 = vcmp.gt.f32.partialorder %v4470_v25, 0.5  ;;  %v3667_v62 = vld [vmem:[%s5530_s5 + $0x48] sm:$0xff]  }
 0x14b   : > { %vm475_vm9 = vmand %vm449_vm5, %vm462_vm12  ;;  %v4476_v6 = vsel %vm474_vm4, 1.0, %v3700_v56  ;;  %vm464_vm5 = vcmp.lt.f32.partialorder %v4470_v25, 8.5  ;;  %v3672_v25 = vld [vmem:[%s5530_s5 + $0x18] sm:$0xff]  }
 0x14c   : > { %v4479_v27 = vsel %vm475_vm9, 1.0, %v3700_v56  ;;  %vm4525_vm12 = vmand %vm398_vm11, %vm411_vm14 }
 0x14d   : > { %vm4536_vm4 = vmand %vm399_vm8, %vm412_vm6 }
 0x14e   : > { %vm4583_vm11 = vmand %vm4536_vm4, %vm438_vm10 }
 0x182   : > { %v1664_v38 = vpop.f32.mrb[0].mxu1 }
 0x183   : > { %v1665_v1 = vadd.f32 %v4343_v59, %v1664_v38  ;;  %v3517_v63 = vpop.f32.mrb[1].mxu1 }
 0x184   : > { %v1667_v35 = vpop.f32.mrb[2].mxu1  ;;  %v323_v63 = vcvt.s32.f32 %v4399_v46 }
 0x185   : > { %v1718_v9 = vmax.f32 %v1665_v1, 0.0  ;;  %v1668_v11 = vadd.f32 %v4343_v59, %v1667_v35  ;;  %v3518_v12 = vpop.f32.mrb[3].mxu1 }
 0x186   : > { %v372_v12 = vmul.f32 10.0, %v4412_v54  ;;  %v336_v17 = vadd.f32 0.5, %v323_v63  ;;  %v338_v54 = vadd.f32 0.5, %v325_v18 }
 0x187   : > { %v1731_v48 = vmul.f32 %v4350_v3, %v1718_v9  ;;  %v1719_v49 = vmax.f32 %v1668_v11, 0.0 }
 0x188   : > { %v349_v4 = vmul.f32 0.1, %v336_v17 }
 0x189   : > { %v3367_v19 = vpack.c.bf16 %v1731_v48, %v1731_v48  ;;  %v1732_v20 = vmul.f32 %v4358_v53, %v1719_v49  ;;  %v1886_v49 = vor.u32 %v1885_v32, %v1881_v57 }
 0x18b   : > { %1805 = vst.msk [vmem:[#allocation2 + $0x8] sm:$0xf] %vm1744_vm13, %v3367_v19  ;;  %v3368_v28 = vpack.c.bf16 %v1732_v20, %v1732_v20 }
 0x18d   : > { %1806 = vst.msk [vmem:[#allocation2 + $0xc] sm:$0xf] %vm1744_vm13, %v3368_v28  ;;  %v4466_v28 = vsub.f32 %v320_v22, %v372_v12  ;;  %v4485_v22 = vfloor.f32 %v348_v15  ;;  %v3669_v15 = vld [vmem:[%s5530_s5 + $0x50] sm:$0xff]  }
 0x18f   : > { %vm437_vm15 = vcmp.gt.f32.partialorder %v4466_v28, 0.5  ;;  %vm463_vm7 = vcmp.lt.f32.partialorder %v4466_v28, 8.5  ;;  %vm413_vm8 = vcmp.lt.f32.partialorder %v4485_v22, 8.5 }
 0x190   : > { %vm4564_vm9 = vmand %vm4525_vm12, %vm437_vm15 }
 0x191   : > { %vm476_vm14 = vmand %vm4564_vm9, %vm463_vm7  ;;  %vm400_vm7 = vcmp.gt.f32.partialorder %v4485_v22, 0.5 }
 0x192   : > { %v1672_v42 = vpop.f32.mrb[4].mxu1  ;;  %v4401_v50 = vld [vmem:[#allocation2 + $0x8] sm:$0xf]  ;;  %vm477_vm15 = vmand %vm4583_vm11, %vm464_vm5 }
 0x193   : > { %v1673_v2 = vadd.f32 %v4343_v59, %v1672_v42  ;;  %v3521_v41 = vpop.f32.mrb[5].mxu1  ;;  %vm4710_vm11 = vmand %vm400_vm7, %vm413_vm8 }
 0x194   : > { %v1675_v45 = vpop.f32.mrb[6].mxu1  ;;  %v4403_v34 = vld [vmem:[#allocation2 + $0xc] sm:$0xf] }
 0x195   : > { %v1720_v36 = vmax.f32 %v1673_v2, 0.0  ;;  %v1676_v51 = vadd.f32 %v4343_v59, %v1675_v45  ;;  %v3522_v52 = vpop.f32.mrb[7].mxu1  ;;  %v4408_v8 = vcombine.low %v4401_v50, %v4403_v34  ;;  %v1840_v57 = vld [vmem:[#allocation2 + $0xc] sm:$0xe]  ;;  %v3666_v2 = vld [vmem:[%s5530_s5] sm:$0xff]  }
 0x196   : > { %v337_v52 = vadd.f32 0.5, %v324_v24  ;;  %3409 = vmatpush3.bf16.msra.mxu1 %v3666_v2 }
 0x197   : > { %v1733_v38 = vmul.f32 %v4389_v60, %v1720_v36  ;;  %v1721_v30 = vmax.f32 %v1676_v51, 0.0  ;;  %v2061_v1 = vrot.slane %v4408_v8, 6  ;;  %v1953_v35 = vrot.slane %v4408_v8, 1  ;;  %3410 = vmatprep.subr.bf16.mxu1 %v3667_v62 }
 0x198   : > { %v1888_v5 = vshll.u32 %v4408_v8, 16  ;;  %v1892_v7 = vshrl.u32 %v4408_v8, 16  ;;  %v3316_v36 = vcombine.low %v1834_v31, %v4401_v50  ;;  %v4512_v51 = vfloor.f32 %v349_v4 }
 0x199   : > { %v3369_v9 = vpack.c.bf16 %v1733_v38, %v1733_v38  ;;  %v1734_v11 = vmul.f32 %v4415_v55, %v1721_v30  ;;  %2074 = vrot.lane.b32.xlu1 %v2061_v1, %s3704_s23  ;;  %v1954_v19 = vsel %vm648_vm0, %v1952_v33, %v1953_v35  ;;  %v350_v2 = vmul.f32 0.1, %v337_v52 }
 0x19a   : > { %v2021_v13 = vrot.slane %v1892_v7, 5  ;;  %v2022_v14 = vrot.slane %v1888_v5, 6  ;;  %v4455_v20 = vrot.slane %v1888_v5, 1  ;;  %v1992_v17 = vrot.slane %v3316_v36, 1 }
 0x19b   : > { %1807 = vst.msk [vmem:[#allocation2 + $0x10] sm:$0xf] %vm1744_vm13, %v3369_v9  ;;  %v3370_v48 = vpack.c.bf16 %v1734_v11, %v1734_v11  ;;  %v375_v43 = vmul.f32 10.0, %v4512_v51  ;;  %vm401_vm10 = vcmp.gt.f32.partialorder %v4512_v51, 0.5  ;;  %vm414_vm5 = vcmp.lt.f32.partialorder %v4512_v51, 8.5 }
 0x19c   : > { %v4460_v23 = vor.u32 %v2022_v14, %v2021_v13  ;;  %v1891_v37 = vsel %vm5541_vm1, %v1886_v49, %v4455_v20  ;;  %v3668_v49 = vld [vmem:[%s5530_s5 + $0x8] sm:$0xff]   ;;  %v1894_v46 = vor.u32 %v1892_v7, %v4455_v20 }
 0x19d   : > { %1808 = vst.msk [vmem:[#allocation2 + $0x14] sm:$0xf] %vm1744_vm13, %v3370_v48  ;;  %1965 = vrot.lane.b32.xlu1 %v1954_v19, %s3707_s18  ;;  %v4548_v48 = vadd.s32 96, %v4325_v26  ;;  %3411 = vmatpush3.bf16.msra.mxu1 %v3668_v49 }
 0x19e   : > { %3412 = vmatprep.subr.bf16.mxu1 %v3669_v15 }
 0x1a1   : > { %1935 = vrot.lane.b32.xlu1 %v1891_v37, %s3704_s23 }
 0x1a2   : > { %v1680_v29 = vpop.f32.mrb[8].mxu1  ;;  %v1822_v33 = vld [vmem:[#allocation2 + $0x10] sm:$0xf] }
 0x1a3   : > { %v1681_v32 = vadd.f32 %v4343_v59, %v1680_v29  ;;  %v3525_v39 = vpop.f32.mrb[9].mxu1  ;;  %v4497_v42 = vcombine.low %v4403_v34, %v1822_v33  ;;  %v4499_v40 = vcombine.low %v1840_v57, %v1822_v33  ;;  %v374_v34 = vmul.f32 10.0, %v4485_v22 }
 0x1a4   : > { %v1683_v41 = vpop.f32.mrb[10].mxu1  ;;  %v4508_v45 = vld [vmem:[#allocation2 + $0x14] sm:$0xf]  ;;  %v3675_v39 = vld [vmem:[%s5530_s5 + $0x68] sm:$0xff]  }
 0x1a5   : > { %v1722_v61 = vmax.f32 %v1681_v32, 0.0  ;;  %v1684_v0 = vadd.f32 %v4343_v59, %v1683_v41  ;;  %v3526_v38 = vpop.f32.mrb[11].mxu1  ;;  %v4518_v30 = vcombine.low %v1822_v33, %v4508_v45  ;;  %v2094_v5 = vrot.slane %v4497_v42, 6  ;;  %v3670_v41 = vld [vmem:[%s5530_s5 + $0x10] sm:$0xff]  }
 0x1a6   : > { %v1993_v10 = vrot.slane %v4497_v42, 1  ;;  %v2125_v9 = vshrl.u32 %v4499_v40, 16  ;;  %v2128_v11 = vshll.u32 %v4499_v40, 16  ;;  %v3671_v38 = vld [vmem:[%s5530_s5 + $0x58] sm:$0xff]   ;;  %v4604_v50 = vsub.f32 %v322_v44, %v374_v34  ;;  %3413 = vmatpush3.bf16.msra.mxu1 %v3670_v41 }
 0x1a7   : > { %v1735_v47 = vmul.f32 %v4476_v6, %v1722_v61  ;;  %v1723_v13 = vmax.f32 %v1684_v0, 0.0  ;;  %2107 = vrot.lane.b32.xlu1 %v2094_v5, %s3707_s18  ;;  %v2062_v14 = vrot.slane %v4518_v30, 6  ;;  %v1955_v19 = vrot.slane %v4518_v30, 1  ;;  %3414 = vmatprep.subr.bf16.mxu1 %v3671_v38 }
 0x1a8   : > { %v2127_v37 = vrot.slane %v2125_v9, 6  ;;  %v1896_v4 = vshll.u32 %v4518_v30, 16  ;;  %v2130_v57 = vrot.slane %v2128_v11, 7  ;;  %v1994_v32 = vsel %vm648_vm0, %v1992_v17, %v1993_v10 }
 0x1a9   : > { %v3371_v31 = vpack.c.bf16 %v1735_v47, %v1735_v47  ;;  %v1736_v29 = vmul.f32 %v4479_v27, %v1723_v13  ;;  %v2063_v33 = vsel %vm1231_vm2, %v2061_v1, %v2062_v14  ;;  %v351_v1 = vmul.f32 0.1, %v338_v54 }
 0x1aa   : > { %2076 = vrot.lane.b32.xlu0 %v2063_v33, %s3704_s23  ;;  %v2025_v61 = vrot.slane %v1896_v4, 6  ;;  %v1900_v52 = vshrl.u32 %v4518_v30, 16  ;;  %v326_v0 = vcvt.s32.f32 %v4548_v48  ;;  %v1956_v28 = vsel %vm648_vm0, %v1953_v35, %v1955_v19  ;;  %3415 = vmatpush3.bf16.msra.mxu1 %v3672_v25  ;;  %v3676_v25 = vld [vmem:[%s5530_s5 + $0x28] sm:$0xff]  }
 0x1ab   : > { %1809 = vst.msk [vmem:[#allocation2 + $0x18] sm:$0xf] %vm1744_vm13, %v3371_v31  ;;  %v3372_v36 = vpack.c.bf16 %v1736_v29, %v1736_v29  ;;  %2005 = vrot.lane.b32.xlu1 %v1994_v32, %s3708_s11  ;;  %v4612_v9 = vor.u32 %v2130_v57, %v2127_v37  ;;  %v4614_v11 = vrot.slane %v1896_v4, 1  ;;  %v4624_v44 = vsel %vm476_vm14, 1.0, %v3700_v56  ;;  %v3673_v29 = vld [vmem:[%s5530_s5 + $0x60] sm:$0xff]  }
 0x1ac   : > { %v2024_v16 = vrot.slane %v1900_v52, 5  ;;  %v4628_v35 = vsub.f32 %v323_v63, %v375_v43  ;;  %v4630_v34 = vfloor.f32 %v350_v2  ;;  %v4632_v12 = vfloor.f32 %v351_v1  ;;  %3416 = vmatprep.subr.bf16.mxu1 %v3673_v29 }
 0x1ad   : > { %1810 = vst.msk [vmem:[#allocation2 + $0x1c] sm:$0xf] %vm1744_vm13, %v3372_v36  ;;  %v2203_v54 = vrot.slane %v4499_v40, 7  ;;  %v339_v63 = vadd.f32 0.5, %v326_v0  ;;  %v4648_v13 = vsel %vm477_vm15, 1.0, %v3700_v56  ;;  %vm439_vm6 = vcmp.gt.f32.partialorder %v4604_v50, 0.5  ;;  %vm4727_vm15 = vmand %vm401_vm10, %vm414_vm5 }
 0x1ae   : > { %1967 = vrot.lane.b32.xlu0 %v1956_v28, %s3707_s18  ;;  %v4645_v47 = vor.u32 %v2025_v61, %v2024_v16  ;;  %v1899_v40 = vsel %vm5541_vm1, %v1894_v46, %v4614_v11  ;;  %vm465_vm12 = vcmp.lt.f32.partialorder %v4604_v50, 8.5  ;;  %vm440_vm4 = vcmp.gt.f32.partialorder %v4628_v35, 0.5  ;;  %vm4743_vm7 = vmand %vm4710_vm11, %vm439_vm6 }
 0x1af   : > { %2186 = vrot.lane.b32.xlu1 %v4612_v9, %s3708_s11  ;;  %v4666_v49 = vmul.f32 10.0, %v4630_v34  ;;  %v4669_v15 = vmul.f32 10.0, %v4632_v12  ;;  %v2383_v4 = vshrl.u32 %v2203_v54, 16  ;;  %vm466_vm9 = vcmp.lt.f32.partialorder %v4628_v35, 8.5  ;;  %vm4753_vm8 = vmand %vm4727_vm15, %vm440_vm4 }
 0x1b0   : > { %v4660_v7 = vsel %vm678_vm3, %v4460_v23, %v4645_v47  ;;  %v352_v31 = vmul.f32 0.1, %v339_v63  ;;  %v2386_v32 = vshll.u32 %v2203_v54, 16  ;;  %vm5558_vm14 = vcmask 1040384   ;;  %vm4775_vm6 = vmand %vm4743_vm7, %vm465_vm12 }
 0x1b1   : > { %vm479_vm10 = vmand %vm4753_vm8, %vm466_vm9  ;;  %v4790_v50 = vsub.f32 %v324_v24, %v4666_v49  ;;  %vm5567_vm5 = vsmask.f32 5376  ;;  %v4815_v49 = vsel %vm4775_vm6, 1.0, %v3700_v56  ;;  %vm5568_vm12 = vcmask 261120  }
 0x1b2   : > { %v1824_v20 = vld [vmem:[#allocation2 + $0x18] sm:$0xf]  ;;  %v1688_v62 = vpop.f32.mrb[12].mxu1  ;;  %1937 = vrot.lane.b32.xlu0 %v1899_v40, %s3704_s23  ;;  %v2388_v29 = vrot.slane %v2386_v32, 3  ;;  %v4822_v58 = vsel %vm479_vm10, 1.0, %v3700_v56  ;;  %vm402_vm4 = vcmp.gt.f32.partialorder %v4630_v34, 0.5 }
 0x1b3   : > { %v4672_v17 = vcombine.low %v4508_v45, %v1824_v20  ;;  %v1689_v37 = vadd.f32 %v4343_v59, %v1688_v62  ;;  %v3529_v26 = vpop.f32.mrb[13].mxu1  ;;  %v3674_v45 = vld [vmem:[%s5530_s5 + $0x20] sm:$0xff]   ;;  %v3678_v62 = vld [vmem:[%s5530_s5 + $0x30] sm:$0xff]   ;;  %vm415_vm9 = vcmp.lt.f32.partialorder %v4630_v34, 8.5  ;;  %vm5569_vm11 = vmmov 0  }
 0x1b4   : > { %v4679_v33 = vld [vmem:[#allocation2 + $0x1c] sm:$0xf]  ;;  %v1691_v57 = vpop.f32.mrb[14].mxu1  ;;  %3417 = vmatpush3.bf16.msra.mxu1 %v3674_v45  ;;  %v2385_v26 = vrot.slane %v2383_v4, 2  ;;  %vm403_vm15 = vcmp.gt.f32.partialorder %v4632_v12, 0.5  ;;  %vm416_vm7 = vcmp.lt.f32.partialorder %v4632_v12, 8.5 }
 0x1b5   : > { %v4688_v43 = vcombine.low %v1824_v20, %v4679_v33  ;;  %v1724_v2 = vmax.f32 %v1689_v37, 0.0  ;;  %v1692_v1 = vadd.f32 %v4343_v59, %v1691_v57  ;;  %v3530_v41 = vpop.f32.mrb[15].mxu1  ;;  %v2095_v36 = vrot.slane %v4672_v17, 6  ;;  %3418 = vmatprep.subr.bf16.mxu1 %v3675_v39 }
 0x1b6   : > { %v1995_v61 = vrot.slane %v4672_v17, 1  ;;  %v2204_v38 = vrot.slane %v4672_v17, 7  ;;  %v2133_v28 = vshrl.u32 %v4672_v17, 16  ;;  %v2136_v16 = vshll.u32 %v4672_v17, 16 }
 0x1b7   : > { %v1737_v46 = vmul.f32 %v4624_v44, %v1724_v2  ;;  %v1725_v63 = vmax.f32 %v1692_v1, 0.0  ;;  %v2096_v40 = vsel %vm1231_vm2, %v2094_v5, %v2095_v36  ;;  %v2064_v20 = vrot.slane %v4688_v43, 6 }
 0x1b8   : > { %2109 = vrot.lane.b32.xlu0 %v2096_v40, %s3707_s18  ;;  %v1996_v37 = vsel %vm648_vm0, %v1993_v10, %v1995_v61  ;;  %v2205_v5 = vsel %vm5558_vm14, %v2203_v54, %v2204_v38  ;;  %v1957_v4 = vrot.slane %v4688_v43, 1  ;;  %v2135_v32 = vrot.slane %v2133_v28, 6  ;;  %3419 = vmatpush3.bf16.msra.mxu1 %v3676_v25  ;;  %v3677_v28 = vld [vmem:[%s5530_s5 + $0x70] sm:$0xff]  }
 0x1b9   : > { %v3373_v57 = vpack.c.bf16 %v1737_v46, %v1737_v46  ;;  %v1738_v45 = vmul.f32 %v4648_v13, %v1725_v63  ;;  %v2065_v42 = vsel %vm1231_vm2, %v2062_v14, %v2064_v20  ;;  %v2391_v10 = vshrl.u32 %v2205_v5, 16  ;;  %3420 = vmatprep.subr.bf16.mxu1 %v3677_v28 }
 0x1ba   : > { %2078 = vrot.lane.b32.xlu1 %v2065_v42, %s3704_s23  ;;  %v2394_v54 = vshll.u32 %v2205_v5, 16  ;;  %v1904_v39 = vshll.u32 %v4688_v43, 16  ;;  %v2138_v41 = vrot.slane %v2136_v16, 7  ;;  %v1908_v46 = vshrl.u32 %v4688_v43, 16  ;;  %v3679_v16 = vld [vmem:[%s5530_s5 + $0x78] sm:$0xff]  }
 0x1bb   : > { %1811 = vst.msk [vmem:[#allocation2 + $0x20] sm:$0xf] %vm1744_vm13, %v3373_v57  ;;  %v3374_v14 = vpack.c.bf16 %v1738_v45, %v1738_v45  ;;  %v2393_v2 = vrot.slane %v2391_v10, 2  ;;  %v4762_v40 = vfloor.f32 %v352_v31  ;;  %v2389_v5 = vor.u32 %v2388_v29, %v2385_v26  ;;  %v3680_v57 = vld [vmem:[%s5530_s5 + $0x38] sm:$0xff]  }
 0x1bc   : > { %2007 = vrot.lane.b32.xlu0 %v1996_v37, %s3708_s11  ;;  %v2396_v25 = vrot.slane %v2394_v54, 3  ;;  %v2029_v63 = vrot.slane %v1904_v39, 6  ;;  %v2028_v31 = vrot.slane %v1908_v46, 5  ;;  %3421 = vmatpush3.bf16.msra.mxu1 %v3678_v62  ;;  %v1958_v26 = vsel %vm648_vm0, %v1955_v19, %v1957_v4 }
 0x1bd   : > { %1812 = vst.msk [vmem:[#allocation2 + $0x24] sm:$0xf] %vm1744_vm13, %v3374_v14  ;;  %v4800_v35 = vor.u32 %v2138_v41, %v2135_v32  ;;  %v4805_v29 = vsub.f32 %v325_v18, %v4669_v15  ;;  %3422 = vmatprep.subr.bf16.mxu1 %v3679_v16  ;;  %v4817_v19 = vrot.slane %v1904_v39, 1  ;;  %v378_v45 = vmul.f32 10.0, %v4762_v40 }
 0x1be   : > { %v4781_v22 = vor.u32 %v2396_v25, %v2393_v2  ;;  %v4807_v21 = vor.u32 %v2029_v63, %v2028_v31  ;;  %v1902_v10 = vor.u32 %v1900_v52, %v4614_v11  ;;  %vm441_vm14 = vcmp.gt.f32.partialorder %v4790_v50, 0.5 }
 0x1bf   : > { %vm5570_vm8 = vsmask.f32 1280  ;;  %vm442_vm6 = vcmp.gt.f32.partialorder %v4805_v29, 0.5  ;;  %v391_v14 = vsub.f32 %v326_v0, %v378_v45  ;;  %vm404_vm10 = vcmp.gt.f32.partialorder %v4762_v40, 0.5 }
 0x1c0   : > { %v2398_v24 = vsel %vm5567_vm5, %v2389_v5, %v4781_v22  ;;  %1969 = vrot.lane.b32.xlu0 %v1958_v26, %s3707_s18  ;;  %v4829_v18 = vsel %vm678_vm3, %v4645_v47, %v4807_v21  ;;  %3423 = vmatpush3.bf16.msra.mxu1 %v3680_v57  ;;  %v2140_v51 = vsel %vm5570_vm8, %v4612_v9, %v4800_v35  ;;  %vm417_vm5 = vcmp.lt.f32.partialorder %v4762_v40, 8.5 }
 0x1c1   : > { %3548 = vmatmul.mubr.msk.bf16.vlgmr.msra.gmra.mrb[28].mxu0 %vm5568_vm12, %v2398_v24  ;;  %v1907_v11 = vsel %vm5541_vm1, %v1902_v10, %v4817_v19  ;;  %vm5571_vm12 = vcmask 1040384   ;;  %vm443_vm8 = vcmp.gt.f32.partialorder %v391_v14, 0.5  ;;  %vm4889_vm1 = vmand %vm402_vm4, %vm415_vm9 }
 0x1c2   : > { %v1696_v15 = vpop.f32.mrb[16].mxu1  ;;  %v1826_v42 = vld [vmem:[#allocation2 + $0x20] sm:$0xf]  ;;  %3551 = vmatprep.mubr.msk.bf16.mxu0 %vm5569_vm11, %v3700_v56  ;;  %vm430_vm4 = vmand %vm404_vm10, %vm417_vm5  ;;  %vm468_vm10 = vcmp.lt.f32.partialorder %v4805_v29, 8.5  ;;  %vm5576_vm5 = vsmask.f32 1280 }
 0x1c3   : > { %v1697_v54 = vadd.f32 %v4343_v59, %v1696_v15  ;;  %v3533_v47 = vpop.f32.mrb[17].mxu1  ;;  %v4844_v32 = vcombine.low %v4679_v33, %v1826_v42  ;;  %vm454_vm9 = vmand %vm4889_vm1, %vm441_vm14  ;;  %vm469_vm14 = vcmp.lt.f32.partialorder %v391_v14, 8.5 }
 0x1c4   : > { %v1699_v52 = vpop.f32.mrb[18].mxu1  ;;  %2188 = vrot.lane.b32.xlu0 %v2140_v51, %s3708_s11  ;;  %v4850_v39 = vld [vmem:[#allocation2 + $0x24] sm:$0xf]  ;;  %vm456_vm1 = vmand %vm430_vm4, %vm443_vm8  ;;  %vm5579_vm8 = vsmask.f32 5376  ;;  %vm5580_vm4 = vcmask 261120  }
 0x1c5   : > { %v1726_v9 = vmax.f32 %v1697_v54, 0.0  ;;  %v1700_v33 = vadd.f32 %v4343_v59, %v1699_v52  ;;  %v3534_v2 = vpop.f32.mrb[19].mxu1  ;;  %v2097_v1 = vrot.slane %v4844_v32, 6  ;;  %v4859_v41 = vcombine.low %v1826_v42, %v4850_v39 }
 0x1c6   : > { %v1997_v28 = vrot.slane %v4844_v32, 1  ;;  %v2206_v25 = vrot.slane %v4844_v32, 7  ;;  %v2142_v48 = vshrl.u32 %v4844_v32, 16  ;;  %v2145_v0 = vshll.u32 %v4844_v32, 16 }
 0x1c7   : > { %v1739_v63 = vmul.f32 %v4815_v49, %v1726_v9  ;;  %v1727_v62 = vmax.f32 %v1700_v33, 0.0  ;;  %v2098_v16 = vsel %vm1231_vm2, %v2095_v36, %v2097_v1  ;;  %v2066_v37 = vrot.slane %v4859_v41, 6 }
 0x1c8   : > { %2111 = vrot.lane.b32.xlu1 %v2098_v16, %s3707_s18  ;;  %1939 = vrot.lane.b32.xlu0 %v1907_v11, %s3704_s23  ;;  %v2207_v31 = vsel %vm5571_vm12, %v2204_v38, %v2206_v25  ;;  %v2144_v5 = vrot.slane %v2142_v48, 6  ;;  %v2147_v57 = vrot.slane %v2145_v0, 7  ;;  %v1998_v36 = vsel %vm648_vm0, %v1995_v61, %v1997_v28  ;;  %vm429_vm12 = vmand %vm403_vm15, %vm416_vm7 }
 0x1c9   : > { %v3375_v26 = vpack.c.bf16 %v1739_v63, %v1739_v63  ;;  %v1740_v24 = vmul.f32 %v4822_v58, %v1727_v62  ;;  %v2416_v45 = vshrl.u32 %v2207_v31, 16  ;;  %v2067_v38 = vsel %vm1231_vm2, %v2064_v20, %v2066_v37  ;;  %vm4922_vm7 = vmand %vm429_vm12, %vm442_vm6 }
 0x1ca   : > { %v2419_v42 = vshll.u32 %v2207_v31, 16  ;;  %v4898_v10 = vor.u32 %v2147_v57, %v2144_v5  ;;  %v1912_v34 = vshll.u32 %v4859_v41, 16  ;;  %v1959_v54 = vrot.slane %v4859_v41, 1  ;;  %vm481_vm12 = vmand %vm4922_vm7, %vm468_vm10 }
 0x1cb   : > { %1813 = vst.msk [vmem:[#allocation2 + $0x28] sm:$0xf] %vm1744_vm13, %v3375_v26  ;;  %v3376_v17 = vpack.c.bf16 %v1740_v24, %v1740_v24  ;;  %v2418_v61 = vrot.slane %v2416_v45, 2  ;;  %v1916_v20 = vshrl.u32 %v4859_v41, 16  ;;  %vm467_vm15 = vcmp.lt.f32.partialorder %v4790_v50, 8.5  ;;  %vm5583_vm10 = vmmov %vm5579_vm8 }
 0x1cc   : > { %2080 = vrot.lane.b32.xlu1 %v2067_v38, %s3704_s23  ;;  %2009 = vrot.lane.b32.xlu0 %v1998_v36, %s3708_s11  ;;  %v2421_v12 = vrot.slane %v2419_v42, 3  ;;  %v2033_v51 = vrot.slane %v1912_v34, 6  ;;  %v2149_v50 = vsel %vm5576_vm5, %v4800_v35, %v4898_v10  ;;  %v1960_v11 = vsel %vm648_vm0, %v1957_v4, %v1959_v54  ;;  %vm4940_vm6 = vmand %vm454_vm9, %vm467_vm15 }
 0x1cd   : > { %1814 = vst.msk [vmem:[#allocation2 + $0x2c] sm:$0xf] %vm1744_vm13, %v3376_v17  ;;  %v2032_v47 = vrot.slane %v1916_v20, 5  ;;  %v4944_v9 = vrot.slane %v1912_v34, 1  ;;  %v1910_v4 = vor.u32 %v1908_v46, %v4817_v19  ;;  %vm482_vm9 = vmand %vm456_vm1, %vm469_vm14  ;;  %vm5581_vm15 = vsmask.f32 7424 }
 0x1ce   : > { %v4929_v52 = vor.u32 %v2421_v12, %v2418_v61  ;;  %v4975_v46 = vsel %vm4940_vm6, 1.0, %v3700_v56  ;;  %v4982_v16 = vsel %vm482_vm9, 1.0, %v3700_v56  ;;  %vm5582_vm7 = vcmask 1040384   ;;  %vm5584_vm1 = vmmov %vm5576_vm5 }
 0x1cf   : > { %v4946_v33 = vor.u32 %v2033_v51, %v2032_v47  ;;  %v1915_v63 = vsel %vm5581_vm15, %v1910_v4, %v4944_v9  ;;  %vm5586_vm14 = vmmov %vm5581_vm15  ;;  %vm5587_vm5 = vcmask 254976  }
 0x1d0   : > { %v2423_v14 = vsel %vm5579_vm8, %v4781_v22, %v4929_v52  ;;  %2190 = vrot.lane.b32.xlu1 %v2149_v50, %s3708_s11  ;;  %1971 = vrot.lane.b32.xlu0 %v1960_v11, %s3707_s18  ;;  %vm5588_vm6 = vmmov %vm5582_vm7 }
 0x1d1   : > { %3552 = vmatmul.mubr.msk.bf16.gmra.mrb[32].mxu0 %vm5580_vm4, %v2423_v14  ;;  %v4962_v35 = vsel %vm678_vm3, %v4807_v21, %v4946_v33  ;;  %v4978_v21 = vsel %vm481_vm12, 1.0, %v3700_v56  ;;  %vm5589_vm8 = vmmov %vm5584_vm1 }
 0x1d2   : > { %v1704_v22 = vpop.f32.mrb[20].mxu1  ;;  %v1828_v2 = vld [vmem:[#allocation2 + $0x28] sm:$0xf]  ;;  %3555 = vmatprep.mubr.msk.bf16.mxu0 %vm5569_vm11, %v3700_v56  ;;  %vm5590_vm12 = vmmov %vm5586_vm14 }
 0x1d3   : > { %v1705_v48 = vadd.f32 %v4343_v59, %v1704_v22  ;;  %v3537_v0 = vpop.f32.mrb[21].mxu1  ;;  %v4970_v62 = vcombine.low %v4850_v39, %v1828_v2  ;;  %vm5592_vm9 = vmmov %vm5588_vm6 }
 0x1d4   : > { %v1707_v19 = vpop.f32.mrb[22].mxu1  ;;  %1941 = vrot.lane.b32.xlu0 %v1915_v63, %s3704_s23  ;;  %v1829_v31 = vld [vmem:[#allocation2 + $0x2c] sm:$0xf] }
 0x1d5   : > { %v1728_v5 = vmax.f32 %v1705_v48, 0.0  ;;  %v1708_v57 = vadd.f32 %v4343_v59, %v1707_v19  ;;  %v3538_v39 = vpop.f32.mrb[23].mxu1  ;;  %v2099_v26 = vrot.slane %v4970_v62, 6  ;;  %v1999_v24 = vrot.slane %v4970_v62, 1 }
 0x1d6   : > { %v4987_v36 = vcombine.low %v1828_v2, %v1829_v31  ;;  %v2208_v45 = vrot.slane %v4970_v62, 7  ;;  %v2151_v15 = vshrl.u32 %v4970_v62, 16  ;;  %v2154_v38 = vshll.u32 %v4970_v62, 16 }
 0x1d7   : > { %v1741_v42 = vmul.f32 %v4975_v46, %v1728_v5  ;;  %v1729_v34 = vmax.f32 %v1708_v57, 0.0  ;;  %v2100_v17 = vsel %vm1231_vm2, %v2097_v1, %v2099_v26  ;;  %v2000_v61 = vsel %vm648_vm0, %v1997_v28, %v1999_v24 }
 0x1d8   : > { %2113 = vrot.lane.b32.xlu1 %v2100_v17, %s3707_s18  ;;  %2011 = vrot.lane.b32.xlu0 %v2000_v61, %s3708_s11  ;;  %v2068_v12 = vrot.slane %v4987_v36, 6  ;;  %v1961_v40 = vrot.slane %v4987_v36, 1  ;;  %v2209_v1 = vsel %vm5582_vm7, %v2206_v25, %v2208_v45  ;;  %v2153_v47 = vrot.slane %v2151_v15, 6  ;;  %vm5594_vm7 = vmmov %vm5588_vm6 }
 0x1d9   : > { %v3377_v51 = vpack.c.bf16 %v1741_v42, %v1741_v42  ;;  %v1742_v50 = vmul.f32 %v4978_v21, %v1729_v34  ;;  %v2441_v11 = vshrl.u32 %v2209_v1, 16  ;;  %v2444_v28 = vshll.u32 %v2209_v1, 16 }
 0x1da   : > { %v1712_v29 = vpop.f32.mrb[24].mxu1  ;;  %v2069_v14 = vsel %vm1231_vm2, %v2066_v37, %v2068_v12  ;;  %v1962_v32 = vsel %vm648_vm0, %v1959_v54, %v1961_v40  ;;  %v2156_v25 = vrot.slane %v2154_v38, 7  ;;  %v1920_v4 = vshll.u32 %v4987_v36, 16 }
 0x1db   : > { %1815 = vst.msk [vmem:[#allocation2 + $0x30] sm:$0xf] %vm1744_vm13, %v3377_v51  ;;  %v3378_v22 = vpack.c.bf16 %v1742_v50, %v1742_v50  ;;  %v1713_v2 = vadd.f32 %v4343_v59, %v1712_v29  ;;  %v3541_v48 = vpop.f32.mrb[25].mxu1  ;;  %v2443_v0 = vrot.slane %v2441_v11, 2  ;;  %v2446_v63 = vrot.slane %v2444_v28, 3 }
 0x1dc   : > { %v1715_v19 = vpop.f32.mrb[26].mxu1  ;;  %2082 = vrot.lane.b32.xlu1 %v2069_v14, %s3704_s23  ;;  %1973 = vrot.lane.b32.xlu0 %v1962_v32, %s3707_s18  ;;  %v5028_v37 = vor.u32 %v2156_v25, %v2153_v47  ;;  %v1922_v5 = vrot.slane %v1920_v4, 1  ;;  %v1924_v54 = vshrl.u32 %v4987_v36, 16  ;;  %v2037_v57 = vrot.slane %v1920_v4, 6 }
 0x1dd   : > { %1816 = vst.msk [vmem:[#allocation2 + $0x34] sm:$0xf] %vm1744_vm13, %v3378_v22  ;;  %v1730_v39 = vmax.f32 %v1713_v2, 0.0  ;;  %v3542_v15 = vpop.f32.mrb[27].mxu1  ;;  %v5032_v38 = vor.u32 %v2446_v63, %v2443_v0  ;;  %v1918_v59 = vor.u32 %v1916_v20, %v4944_v9  ;;  %vm5585_vm13 = vmmov %vm5580_vm4 }
 0x1de   : > { %v2036_v42 = vrot.slane %v1924_v54, 5  ;;  %v2158_v61 = vsel %vm5584_vm1, %v4898_v10, %v5028_v37  ;;  %vm5591_vm4 = vmmov %vm5583_vm10 }
 0x1df   : > { %v1743_v34 = vmul.f32 %v4982_v16, %v1730_v39  ;;  %v2448_v17 = vsel %vm5583_vm10, %v4929_v52, %v5032_v38  ;;  %v1923_v1 = vsel %vm5586_vm14, %v1918_v59, %v1922_v5  ;;  %v3663_v39 = vld [vmem:[#allocation2 + $0x3c] ss:$0 sps:$4 sm:$0xff]   ;;  %vm5593_vm15 = vmmov %vm5585_vm13  ;;  %vm2852_vm14 = vcmask 64512  }
 0x1e0   : > { %3556 = vmatmul.mubr.msk.bf16.gmra.mrb[36].mxu0 %vm5585_vm13, %v2448_v17  ;;  %2192 = vrot.lane.b32.xlu1 %v2158_v61, %s3708_s11  ;;  %v5047_v47 = vor.u32 %v2037_v57, %v2036_v42  ;;  %vm5595_vm10 = vmmov %vm5591_vm4 }
 0x1e1   : > { %v3379_v20 = vpack.c.bf16 %v1743_v34, %v1743_v34  ;;  %1943 = vrot.lane.b32.xlu0 %v1923_v1, %s3704_s23  ;;  %3559 = vmatprep.mubr.msk.bf16.mxu0 %vm5569_vm11, %v3700_v56  ;;  %vm5596_vm1 = vmmov %vm5585_vm13 }
 0x1e2   : > { %v1830_v9 = vld [vmem:[#allocation2 + $0x30] sm:$0xf]  ;;  %v5055_v52 = vsel %vm678_vm3, %v4946_v33, %v5047_v47  ;;  %vm5597_vm13 = vmmov %vm5589_vm8 }
 0x1e3   : > { %1817 = vst.msk [vmem:[#allocation2 + $0x38] sm:$0x3] %vm5587_vm5, %v3379_v20  ;;  %v5058_v10 = vcombine.low %v1829_v31, %v1830_v9  ;;  %v1926_v20 = vor.u32 %v1924_v54, %v1922_v5  ;;  %vm5599_vm5 = vmmov %vm5596_vm1 }
 0x1e4   : > { %v5060_v51 = vld [vmem:[#allocation2 + $0x34] sm:$0xf] }
 0x1e5   : > { %v1833_v50 = vld [vmem:[#allocation2 + $0x34] sm:$0x3]  ;;  %v2101_v28 = vrot.slane %v5058_v10, 6  ;;  %v2001_v29 = vrot.slane %v5058_v10, 1  ;;  %v5065_v14 = vcombine.low %v1830_v9, %v5060_v51  ;;  %v2210_v25 = vrot.slane %v5058_v10, 7 }
 0x1e6   : > { %v1831_v11 = vld [vmem:[#allocation2 + $0x34] sm:$0x1]  ;;  %v3315_v32 = vcombine.low %v1830_v9, %v1833_v50  ;;  %v2160_v33 = vshrl.u32 %v5058_v10, 16  ;;  %v2163_v4 = vshll.u32 %v5058_v10, 16  ;;  %v2214_v50 = vrot.slane %v3663_v39, 7  ;;  %v5153_v10 = vpop.f32.mrb[0].mxu0 }
 0x1e7   : > { %v5070_v31 = vcombine.low %v1830_v9, %v1831_v11  ;;  %v2102_v22 = vsel %vm1231_vm2, %v2099_v26, %v2101_v28  ;;  %v2002_v2 = vsel %vm648_vm0, %v1999_v24, %v2001_v29  ;;  %v2070_v48 = vrot.slane %v5065_v14, 6 }
 0x1e8   : > { %v5081_v0 = vrot.slane %v3315_v32, 1  ;;  %2115 = vrot.lane.b32.xlu1 %v2102_v22, %s3707_s18  ;;  %2013 = vrot.lane.b32.xlu0 %v2002_v2, %s3708_s11  ;;  %v2211_v63 = vsel %vm5588_vm6, %v2208_v45, %v2210_v25  ;;  %v2162_v19 = vrot.slane %v2160_v33, 6  ;;  %v2165_v26 = vrot.slane %v2163_v4, 7 }
 0x1e9   : > { %v1928_v57 = vshll.u32 %v5070_v31, 16  ;;  %v2466_v15 = vshrl.u32 %v2211_v63, 16  ;;  %v2469_v59 = vshll.u32 %v2211_v63, 16  ;;  %v2071_v24 = vsel %vm1231_vm2, %v2068_v12, %v2070_v48 }
 0x1ea   : > { %v5094_v42 = vor.u32 %v2165_v26, %v2162_v19  ;;  %v1838_v17 = vld [vmem:[#allocation2 + $0x38] sm:$0xf]  ;;  %v1964_v62 = vsel %vm648_vm0, %v1961_v40, %v5081_v0  ;;  %v1932_v12 = vshrl.u32 %v5070_v31, 16  ;;  %v2041_v4 = vshrl.u32 %v5065_v14, 16 }
 0x1eb   : > { %v1930_v34 = vrot.slane %v1928_v57, 1  ;;  %v2468_v45 = vrot.slane %v2466_v15, 2  ;;  %v2471_v61 = vrot.slane %v2469_v59, 3  ;;  %v5101_v1 = vcombine.low %v5060_v51, %v1838_v17  ;;  %v1836_v9 = vld [vmem:[#allocation2 + $0x38] sm:$0x3] }
 0x1ec   : > { %2084 = vrot.lane.b32.xlu1 %v2071_v24, %s3704_s23  ;;  %1975 = vrot.lane.b32.xlu0 %v1964_v62, %s3707_s18  ;;  %v3661_v40 = vld [vmem:[#allocation2 + $0x38] ss:$0 sps:$4 sm:$0x77]   ;;  %v2167_v22 = vsel %vm5589_vm8, %v5028_v37, %v5094_v42  ;;  %v3324_v26 = vcombine.low %v1836_v9, %v1836_v9  ;;  %v2044_v57 = vshll.u32 %v5065_v14, 16  ;;  %v3322_v59 = vcombine.low %v5060_v51, %v1836_v9 }
 0x1ed   : > { %v2472_v11 = vor.u32 %v2471_v61, %v2468_v45  ;;  %v2103_v32 = vrot.slane %v5101_v1, 6  ;;  %v2212_v33 = vrot.slane %v5101_v1, 7  ;;  %v1931_v2 = vsel %vm5590_vm12, %v1926_v20, %v1930_v34  ;;  %v3664_v17 = vld [vmem:[#allocation2 + $0x3c] ss:$0 sps:$4 sm:$0x77]   ;;  %vm5603_vm12 = vmmov %vm5596_vm1 }
 0x1ee   : > { %v2169_v5 = vshrl.u32 %v5101_v1, 16  ;;  %v2172_v54 = vshll.u32 %v5101_v1, 16  ;;  %v1934_v39 = vor.u32 %v1932_v12, %v1930_v34  ;;  %v2043_v62 = vrot.slane %v2041_v4, 5 }
 0x1ef   : > { %v2473_v63 = vsel %vm5591_vm4, %v5032_v38, %v2472_v11  ;;  %v2213_v19 = vsel %vm5592_vm9, %v2210_v25, %v2212_v33  ;;  %v2104_v38 = vsel %vm1231_vm2, %v2101_v28, %v2103_v32  ;;  %v2072_v25 = vrot.slane %v3661_v40, 6 }
 0x1f0   : > { %3560 = vmatmul.mubr.msk.bf16.gmra.mrb[40].mxu0 %vm5593_vm15, %v2473_v63  ;;  %2194 = vrot.lane.b32.xlu1 %v2167_v22, %s3708_s11  ;;  %v2491_v37 = vshrl.u32 %v2213_v19, 16  ;;  %v2494_v15 = vshll.u32 %v2213_v19, 16  ;;  %v2215_v24 = vsel %vm5594_vm7, %v2212_v33, %v2214_v50  ;;  %v2171_v61 = vrot.slane %v2169_v5, 6 }
 0x1f1   : > { %1945 = vrot.lane.b32.xlu0 %v1931_v2, %s3704_s23  ;;  %3563 = vmatprep.mubr.msk.bf16.mxu0 %vm5569_vm11, %v3700_v56  ;;  %v2174_v20 = vrot.slane %v2172_v54, 7  ;;  %v2516_v12 = vshrl.u32 %v2215_v24, 16  ;;  %v2519_v51 = vshll.u32 %v2215_v24, 16  ;;  %v2046_v9 = vrot.slane %v2044_v57, 6  ;;  %v3485_v24 = vpop.f32.mrb[1].mxu0 }
 0x1f2   : > { %v2493_v45 = vrot.slane %v2491_v37, 2  ;;  %v2496_v34 = vrot.slane %v2494_v15, 3  ;;  %v2050_v22 = vshrl.u32 %v3324_v26, 16  ;;  %v2003_v28 = vrot.slane %v3322_v59, 1 }
 0x1f3   : > { %v2053_v63 = vshll.u32 %v3324_v26, 16  ;;  %v2178_v40 = vshrl.u32 %v3664_v17, 16  ;;  %v2181_v19 = vshll.u32 %v3664_v17, 16  ;;  %v2047_v50 = vor.u32 %v2046_v9, %v2043_v62 }
 0x1f4   : > { %2117 = vrot.lane.b32.xlu1 %v2104_v38, %s3707_s18  ;;  %v2497_v2 = vor.u32 %v2496_v34, %v2493_v45  ;;  %v2073_v4 = vsel %vm1231_vm2, %v2070_v48, %v2072_v25  ;;  %v2052_v5 = vrot.slane %v2050_v22, 5  ;;  %v2175_v57 = vor.u32 %v2174_v20, %v2171_v61  ;;  %v5159_v45 = vpop.f32.mrb[2].mxu0 }
 0x1f5   : > { %1947 = vrot.lane.b32.xlu0 %v1934_v39, %s3704_s23  ;;  %v2055_v54 = vrot.slane %v2053_v63, 6  ;;  %v2518_v37 = vrot.slane %v2516_v12, 2  ;;  %v2521_v15 = vrot.slane %v2519_v51, 3  ;;  %v5137_v59 = vsel %vm678_vm3, %v5047_v47, %v2047_v50  ;;  %v3486_v20 = vpop.f32.mrb[3].mxu0 }
 0x1f6   : > { %v2498_v33 = vsel %vm5595_vm10, %v2472_v11, %v2497_v2  ;;  %v2004_v11 = vsel %vm648_vm0, %v2001_v29, %v2003_v28  ;;  %v2180_v48 = vrot.slane %v2178_v40, 6  ;;  %v2183_v26 = vrot.slane %v2181_v19, 7 }
 0x1f7   : > { %v2056_v14 = vor.u32 %v2055_v54, %v2052_v5  ;;  %v2176_v47 = vsel %vm5597_vm13, %v5094_v42, %v2175_v57  ;;  %v2522_v38 = vor.u32 %v2521_v15, %v2518_v37  ;;  %v2105_v25 = vrot.slane %v3664_v17, 6 }
 0x1f8   : > { %3564 = vmatmul.mubr.msk.bf16.gmra.mrb[44].mxu0 %vm5596_vm1, %v2498_v33  ;;  %2086 = vrot.lane.b32.xlu1 %v2073_v4, %s3704_s23  ;;  %v2839_v29 = vmul.f32 %v4350_v3, %v5153_v10  ;;  %v2184_v62 = vor.u32 %v2183_v26, %v2180_v48  ;;  %v2840_v61 = vmul.f32 %v4358_v53, %v5159_v45  ;;  %vm2876_vm6 = vcmask 60416  }
 0x1f9   : > { %2015 = vrot.lane.b32.xlu0 %v2004_v11, %s3708_s11  ;;  %3567 = vmatprep.mubr.msk.bf16.mxu0 %vm5569_vm11, %v3700_v56  ;;  %v5148_v39 = vsel %vm678_vm3, %v2047_v50, %v2056_v14  ;;  %vm5598_vm3 = vmmov %vm5591_vm4  ;;  %v2106_v42 = vsel %vm1231_vm2, %v2103_v32, %v2105_v25  ;;  %vm5605_vm9 = vcmask 523264   ;;  %vm2245_vm15 = vcmask 785408  }
 0x1fa   : > { %v2523_v34 = vsel %vm5598_vm3, %v2497_v2, %v2522_v38  ;;  %v2853_v17 = vsel %vm2852_vm14, %v2839_v29, 0.0  ;;  %v2854_v1 = vsel %vm2852_vm14, %v2840_v61, 0.0  ;;  %vm5600_vm2 = vmmov %vm5589_vm8 }
 0x1fb   : > { %v2855_v51 = vadd.f32 %v2854_v1, %v2853_v17  ;;  %v2185_v22 = vsel %vm5600_vm2, %v2175_v57, %v2184_v62  ;;  %vm5602_vm8 = vmmov %vm5596_vm1  ;;  %vm5611_vm2 = vsmask.f32 5376 }
 0x1fc   : > { %2196 = vrot.lane.b32.xlu1 %v2176_v47, %s3708_s11  ;;  %vm5604_vm4 = vmmov %vm5596_vm1 }
 0x1fd   : > { %1977 = vrot.lane.b32.xlu0 %v5081_v0, %s3707_s18  ;;  %v5170_v0 = vpop.f32.mrb[4].mxu0  ;;  %vm5606_vm7 = vmmov %vm5605_vm9 }
 0x1fe   : > { %v2841_v32 = vmul.f32 %v4389_v60, %v5170_v0  ;;  %v3489_v12 = vpop.f32.mrb[5].mxu0  ;;  %vm5607_vm10 = vmmov %vm5606_vm7 }
 0x1ff   : > { %v5178_v9 = vpop.f32.mrb[6].mxu0  ;;  %vm5608_vm13 = vmmov %vm5606_vm7 }
 0x200   : > { %3568 = vmatmul.mubr.msk.bf16.gmra.mrb[48].mxu0 %vm5599_vm5, %v2523_v34  ;;  %2119 = vrot.lane.b32.xlu1 %v2106_v42, %s3707_s18  ;;  %v2856_v2 = vsel %vm2852_vm14, %v2841_v32, 0.0  ;;  %v2842_v63 = vmul.f32 %v4415_v55, %v5178_v9  ;;  %vm5609_vm3 = vmmov %vm5596_vm1 }
 0x201   : > { %2017 = vrot.lane.b32.xlu0 %v2003_v28, %s3708_s11  ;;  %3571 = vmatprep.mubr.msk.bf16.mxu0 %vm5569_vm11, %v3700_v56  ;;  %v3490_v28 = vpop.f32.mrb[7].mxu0  ;;  %v2857_v56 = vadd.f32 %v2856_v2, %v2855_v51  ;;  %vm5601_vm11 = vmmov %vm5596_vm1 }
 0x202   : > { %v5185_v40 = vpop.f32.mrb[8].mxu0  ;;  %v2858_v19 = vsel %vm2852_vm14, %v2842_v63, 0.0  ;;  %vm5610_vm5 = vmmov %vm5606_vm7 }
 0x203   : > { %v2843_v50 = vmul.f32 %v4476_v6, %v5185_v40  ;;  %v3493_v33 = vpop.f32.mrb[9].mxu0  ;;  %v2859_v4 = vadd.f32 %v2858_v19, %v2857_v56 }
 0x204   : > { %2198 = vrot.lane.b32.xlu1 %v2185_v22, %s3708_s11  ;;  %v5190_v5 = vpop.f32.mrb[10].mxu0  ;;  %s3709_s11 = smov 120  }
 0x205   : > { %v2860_v54 = vsel %vm2852_vm14, %v2843_v50, 0.0  ;;  %v2844_v57 = vmul.f32 %v4479_v27, %v5190_v5  ;;  %v3494_v37 = vpop.f32.mrb[11].mxu0 }
 0x206   : > { %v2861_v15 = vadd.f32 %v2860_v54, %v2859_v4  ;;  %v944_v11 = vpop.f32.mrb[12].mxu0 }
 0x207   : > { %v2862_v14 = vsel %vm2852_vm14, %v2844_v57, 0.0  ;;  %v2845_v48 = vmul.f32 %v4624_v44, %v944_v11  ;;  %v3497_v26 = vpop.f32.mrb[13].mxu0 }
 0x208   : > { %3572 = vmatmul.mubr.msk.bf16.gmra.mrb[52].mxu0 %vm5601_vm11, %v2522_v38  ;;  %v2863_v47 = vadd.f32 %v2862_v14, %v2861_v15  ;;  %v947_v25 = vpop.f32.mrb[14].mxu0  ;;  %vm5612_vm11 = vmmov %vm5611_vm2 }
 0x209   : > { %v2864_v29 = vsel %vm2852_vm14, %v2845_v48, 0.0  ;;  %v2846_v24 = vmul.f32 %v4648_v13, %v947_v25  ;;  %v3498_v62 = vpop.f32.mrb[15].mxu0 }
 0x20a   : > { %v2865_v34 = vadd.f32 %v2864_v29, %v2863_v47  ;;  %v952_v42 = vpop.f32.mrb[16].mxu0 }
 0x20b   : > { %v2866_v17 = vsel %vm2852_vm14, %v2846_v24, 0.0  ;;  %v2847_v38 = vmul.f32 %v4815_v49, %v952_v42  ;;  %v3501_v61 = vpop.f32.mrb[17].mxu0  ;;  %v2075_v32 = vpop.permute.xlu1 %2074 }
 0x20c   : > { %v2867_v20 = vadd.f32 %v2866_v17, %v2865_v34  ;;  %v955_v1 = vpop.f32.mrb[18].mxu0 }
 0x20d   : > { %v2868_v12 = vsel %vm2852_vm14, %v2847_v38, 0.0  ;;  %v2848_v51 = vmul.f32 %v4822_v58, %v955_v1  ;;  %v3502_v22 = vpop.f32.mrb[19].mxu0 }
 0x20e   : > { %v2869_v2 = vadd.f32 %v2868_v12, %v2867_v20  ;;  %v960_v63 = vpop.f32.mrb[20].mxu0 }
 0x20f   : > { %v2870_v28 = vsel %vm2852_vm14, %v2848_v51, 0.0  ;;  %v2849_v56 = vmul.f32 %v4975_v46, %v960_v63  ;;  %v3505_v19 = vpop.f32.mrb[21].mxu0  ;;  %v1966_v14 = vpop.permute.xlu1 %1965 }
 0x210   : > { %v2871_v50 = vadd.f32 %v2870_v28, %v2869_v2  ;;  %v963_v33 = vpop.f32.mrb[22].mxu0  ;;  %v1818_v19 = vld [vmem:[#allocation2] sm:$0xc] }
 0x211   : > { %v2872_v4 = vsel %vm2852_vm14, %v2849_v56, 0.0  ;;  %v2850_v54 = vmul.f32 %v4978_v21, %v963_v33  ;;  %v3506_v57 = vpop.f32.mrb[23].mxu0 }
 0x212   : > { %v2873_v37 = vadd.f32 %v2872_v4, %v2871_v50  ;;  %v5208_v15 = vpop.f32.mrb[24].mxu0 }
 0x213   : > { %v2874_v48 = vsel %vm2852_vm14, %v2850_v54, 0.0  ;;  %v2851_v26 = vmul.f32 %v4982_v16, %v5208_v15  ;;  %v3509_v47 = vpop.f32.mrb[25].mxu0  ;;  %v1936_v61 = vpop.permute.xlu1 %1935 }
 0x214   : > { %v2875_v29 = vadd.f32 %v2874_v48, %v2873_v37  ;;  %v971_v24 = vpop.f32.mrb[26].mxu0  ;;  %v3683_v37 = vld [vmem:[#allocation2 + $0x4] sm:$0xf] }
 0x215   : > { %v2877_v62 = vsel %vm2876_vm6, %v2851_v26, 0.0  ;;  %v3510_v34 = vpop.f32.mrb[27].mxu0  ;;  %v3307_v48 = vcombine.low %v1818_v19, %v3683_v37 }
 0x216   : > { %v2878_v17 = vadd.f32 %v2877_v62, %v2875_v29 }
 0x218   : > { %v2879_v38 = vrot.slane %v2878_v17, 4 }
 0x219   : > { %v2108_v22 = vpop.permute.xlu1 %2107 }
 0x21a   : > { %v2880_v12 = vadd.f32 %v2879_v38, %v2878_v17 }
 0x21c   : > { %v2077_v20 = vpop.permute.xlu0 %2076  ;;  %v2881_v51 = vrot.slane %v2880_v12, 2 }
 0x21d   : > { %v2006_v4 = vpop.permute.xlu1 %2005 }
 0x21e   : > { %v2882_v28 = vadd.f32 %v2881_v51, %v2880_v12 }
 0x220   : > { %v1968_v2 = vpop.permute.xlu0 %1967  ;;  %v2883_v56 = vrot.slane %v2882_v28, 1 }
 0x222   : > { %v2884_v50 = vadd.f32 %v2883_v56, %v2882_v28 }
 0x224   : > { %v1938_v54 = vpop.permute.xlu0 %1937  ;;  %v5214_v57 = vmul.f32 0.015625, %v2884_v50 }
 0x226   : > { %v5218_v26 = vsub.f32 %v5170_v0, %v5214_v57  ;;  %v5222_v47 = vsub.f32 %v5178_v9, %v5214_v57  ;;  %v5226_v29 = vsub.f32 %v5185_v40, %v5214_v57  ;;  %v5230_v24 = vsub.f32 %v5190_v5, %v5214_v57 }
 0x227   : > { %v5233_v62 = vsub.f32 %v944_v11, %v5214_v57  ;;  %v5236_v34 = vsub.f32 %v947_v25, %v5214_v57  ;;  %v5239_v0 = vsub.f32 %v952_v42, %v5214_v57  ;;  %v5242_v9 = vsub.f32 %v955_v1, %v5214_v57  ;;  %v2187_v25 = vpop.permute.xlu1 %2186 }
 0x228   : > { %v5245_v40 = vsub.f32 %v960_v63, %v5214_v57  ;;  %v5248_v38 = vsub.f32 %v963_v33, %v5214_v57  ;;  %v2898_v5 = vsub.f32 %v5208_v15, %v5214_v57  ;;  %v2262_v11 = vsel %vm5602_vm8, %v4460_v23, %v2075_v32  ;;  %vm5613_vm8 = vmmov %vm5596_vm1 }
 0x229   : > { %v2218_v42 = vsel %vm5603_vm12, %v3307_v48, %v1936_v61  ;;  %v2220_v1 = vsel %vm5604_vm4, %v4408_v8, %v1938_v54  ;;  %v2886_v12 = vsub.f32 %v5153_v10, %v5214_v57  ;;  %v5261_v63 = vsub.f32 %v5159_v45, %v5214_v57  ;;  %vm5614_vm12 = vmmov %vm5610_vm5 }
 0x22a   : > { %v2110_v17 = vpop.permute.xlu0 %2109  ;;  %v2282_v33 = vsel %vm5605_vm9, %v2262_v11, %v2108_v22  ;;  %v2232_v8 = vsel %vm5606_vm7, %v2218_v42, %v1966_v14  ;;  %v2234_v61 = vsel %vm5607_vm10, %v2220_v1, %v1968_v2  ;;  %v2901_v22 = vmul.f32 %v4389_v60, %v5218_v26  ;;  %vm5615_vm4 = vmmov %vm5596_vm1 }
 0x22b   : > { %v2296_v51 = vsel %vm2245_vm15, %v2282_v33, %v2187_v25  ;;  %v2899_v23 = vmul.f32 %v4350_v3, %v2886_v12  ;;  %v2900_v32 = vmul.f32 %v4358_v53, %v5261_v63  ;;  %v2247_v10 = vsel %vm2245_vm15, %v2232_v8, %v2006_v4  ;;  %vm5616_vm9 = vmmov %vm5611_vm2 }
 0x22c   : > { %v2367_v56 = vshrl.u32 %v2296_v51, 16  ;;  %v2370_v19 = vshll.u32 %v2296_v51, 16  ;;  %v2265_v3 = vsel %vm5596_vm1, %v4660_v7, %v2077_v20  ;;  %v2902_v53 = vmul.f32 %v4415_v55, %v5222_v47  ;;  %v2079_v51 = vpop.permute.xlu1 %2078  ;;  %vm5617_vm7 = vmmov %vm5610_vm5 }
 0x22d   : > { %v2912_v50 = vmul.f32 %v2899_v23, %v2899_v23  ;;  %v2913_v54 = vmul.f32 %v2900_v32, %v2900_v32  ;;  %v2914_v14 = vmul.f32 %v2901_v22, %v2901_v22  ;;  %v2352_v25 = vshrl.u32 %v2247_v10, 16  ;;  %vm5618_vm10 = vmmov %vm5611_vm2 }
 0x22e   : > { %v2008_v28 = vpop.permute.xlu0 %2007  ;;  %v2903_v60 = vmul.f32 %v4476_v6, %v5226_v29  ;;  %v2915_v42 = vmul.f32 %v2902_v53, %v2902_v53  ;;  %v2355_v12 = vshll.u32 %v2247_v10, 16  ;;  %v2369_v33 = vrot.slane %v2367_v56, 2 }
 0x22f   : > { %v2249_v45 = vsel %vm2245_vm15, %v2234_v61, %v2008_v28  ;;  %v2925_v4 = vsel %vm2852_vm14, %v2912_v50, 0.0  ;;  %v2926_v11 = vsel %vm2852_vm14, %v2913_v54, 0.0  ;;  %v2372_v7 = vrot.slane %v2370_v19, 3 }
 0x230   : > { %v2359_v2 = vshrl.u32 %v2249_v45, 16  ;;  %v2362_v48 = vshll.u32 %v2249_v45, 16  ;;  %v2927_v1 = vadd.f32 %v2926_v11, %v2925_v4  ;;  %v2928_v20 = vsel %vm2852_vm14, %v2914_v14, 0.0 }
 0x231   : > { %v2284_v55 = vsel %vm5608_vm13, %v2265_v3, %v2110_v17  ;;  %v2904_v23 = vmul.f32 %v4479_v27, %v5230_v24  ;;  %v2916_v32 = vmul.f32 %v2903_v60, %v2903_v60  ;;  %v2930_v22 = vsel %vm2852_vm14, %v2915_v42, 0.0  ;;  %vm5621_vm13 = vmmov %vm5609_vm3 }
 0x232   : > { %v1970_v37 = vpop.permute.xlu0 %1969  ;;  %v2929_v8 = vadd.f32 %v2928_v20, %v2927_v1  ;;  %v2361_v61 = vrot.slane %v2359_v2, 2  ;;  %v2364_v45 = vrot.slane %v2362_v48, 3  ;;  %v2905_v19 = vmul.f32 %v4624_v44, %v5233_v62 }
 0x233   : > { %v2917_v50 = vmul.f32 %v2904_v23, %v2904_v23  ;;  %v2354_v17 = vrot.slane %v2352_v25, 2  ;;  %v2357_v54 = vrot.slane %v2355_v12, 3  ;;  %v2932_v53 = vsel %vm2852_vm14, %v2916_v32, 0.0 }
 0x234   : > { %v2931_v3 = vadd.f32 %v2930_v22, %v2929_v8  ;;  %v2906_v48 = vmul.f32 %v4648_v13, %v5236_v34  ;;  %v2918_v11 = vmul.f32 %v2905_v19, %v2905_v19  ;;  %v5293_v60 = vor.u32 %v2364_v45, %v2361_v61 }
 0x235   : > { %v2934_v25 = vsel %vm2852_vm14, %v2917_v50, 0.0  ;;  %v2373_v1 = vor.u32 %v2372_v7, %v2369_v33  ;;  %v2907_v20 = vmul.f32 %v4815_v49, %v5239_v0  ;;  %v2268_v50 = vsel %vm5613_vm8, %v4829_v18, %v2079_v51 }
 0x236   : > { %v2189_v28 = vpop.permute.xlu0 %2188  ;;  %v2933_v44 = vadd.f32 %v2932_v53, %v2931_v3  ;;  %v2936_v13 = vsel %vm2852_vm14, %v2918_v11, 0.0 }
 0x237   : > { %v2298_v6 = vsel %vm2245_vm15, %v2284_v55, %v2189_v28  ;;  %v2919_v55 = vmul.f32 %v2906_v48, %v2906_v48  ;;  %v2358_v28 = vor.u32 %v2357_v54, %v2354_v17 }
 0x238   : > { %v2374_v10 = vshrl.u32 %v2298_v6, 16  ;;  %v2377_v56 = vshll.u32 %v2298_v6, 16  ;;  %v2935_v32 = vadd.f32 %v2934_v25, %v2933_v44  ;;  %v2920_v6 = vmul.f32 %v2907_v20, %v2907_v20 }
 0x239   : > { %v2938_v33 = vsel %vm2852_vm14, %v2919_v55, 0.0  ;;  %v2366_v49 = vsel %vm5612_vm11, %v2358_v28, %v5293_v60  ;;  %vm5624_vm11 = vmmov %vm5615_vm4 }
 0x23a   : > { %v2376_v27 = vrot.slane %v2374_v10, 2  ;;  %v2379_v14 = vrot.slane %v2377_v56, 3  ;;  %v2112_v4 = vpop.permute.xlu1 %2111  ;;  %v1940_v2 = vpop.permute.xlu0 %1939  ;;  %v2937_v22 = vadd.f32 %v2936_v13, %v2935_v32  ;;  %v2940_v54 = vsel %vm2852_vm14, %v2920_v6, 0.0 }
 0x23b   : > { %v2222_v42 = vsel %vm5609_vm3, %v4518_v30, %v1940_v2  ;;  %v2908_v30 = vmul.f32 %v4822_v58, %v5242_v9  ;;  %v2909_v58 = vmul.f32 %v4975_v46, %v5245_v40  ;;  %v2286_v3 = vsel %vm5614_vm12, %v2268_v50, %v2112_v4  ;;  %vm5622_vm3 = vmmov %vm5611_vm2 }
 0x23c   : > { %v2380_v12 = vor.u32 %v2379_v14, %v2376_v27  ;;  %v2236_v23 = vsel %vm5610_vm5, %v2222_v42, %v1970_v37  ;;  %v2911_v37 = vmul.f32 %v4982_v16, %v2898_v5  ;;  %v2939_v17 = vadd.f32 %v2938_v33, %v2937_v22  ;;  %vm5626_vm12 = vmmov %vm5615_vm4 }
 0x23d   : > { %v2921_v19 = vmul.f32 %v2908_v30, %v2908_v30  ;;  %v2910_v16 = vmul.f32 %v4978_v21, %v5248_v38  ;;  %v2922_v5 = vmul.f32 %v2909_v58, %v2909_v58 }
 0x23e   : > { %v2081_v8 = vpop.permute.xlu1 %2080  ;;  %v2010_v61 = vpop.permute.xlu0 %2009  ;;  %v2381_v45 = vsel %vm5611_vm2, %v2373_v1, %v2380_v12  ;;  %v2941_v46 = vadd.f32 %v2940_v54, %v2939_v17  ;;  %v2924_v51 = vmul.f32 %v2911_v37, %v2911_v37 }
 0x23f   : > { %v2251_v7 = vsel %vm2245_vm15, %v2236_v23, %v2010_v61  ;;  %2699 = vmatprep.mubr.bf16.mxu1 %v2381_v45  ;;  %v2942_v2 = vsel %vm2852_vm14, %v2921_v19, 0.0  ;;  %v2923_v11 = vmul.f32 %v2910_v16, %v2910_v16  ;;  %v2944_v4 = vsel %vm2852_vm14, %v2922_v5, 0.0 }
 0x240   : > { %v2399_v10 = vshrl.u32 %v2251_v7, 16  ;;  %v2402_v56 = vshll.u32 %v2251_v7, 16  ;;  %2700 = vmatmul.mubr.bf16.vlgmr.msra.gmra.mrb[28].mxu1 %v2366_v49  ;;  %v2943_v42 = vadd.f32 %v2942_v2, %v2941_v46  ;;  %v2948_v32 = vsel %vm2876_vm6, %v2924_v51, 0.0 }
 0x241   : > { %v2946_v20 = vsel %vm2852_vm14, %v2923_v11, 0.0  ;;  %vm5619_vm14 = vmmov %vm5596_vm1 }
 0x242   : > { %v2401_v53 = vrot.slane %v2399_v10, 2  ;;  %v2191_v15 = vpop.permute.xlu1 %2190  ;;  %v1972_v57 = vpop.permute.xlu0 %1971  ;;  %v2404_v27 = vrot.slane %v2402_v56, 3  ;;  %v2945_v55 = vadd.f32 %v2944_v4, %v2943_v42  ;;  %v2271_v19 = vsel %vm5619_vm14, %v4962_v35, %v2081_v8  ;;  %vm5620_vm1 = vmmov %vm5610_vm5 }
 0x243   : > { %v2300_v14 = vsel %vm2245_vm15, %v2286_v3, %v2191_v15  ;;  %vm5623_vm5 = vmmov %vm5620_vm1 }
 0x244   : > { %v2407_v48 = vshrl.u32 %v2300_v14, 16  ;;  %v2410_v18 = vshll.u32 %v2300_v14, 16  ;;  %v2405_v21 = vor.u32 %v2404_v27, %v2401_v53  ;;  %v2947_v13 = vadd.f32 %v2946_v20, %v2945_v55  ;;  %vm5625_vm8 = vmmov %vm5620_vm1 }
 0x245   : > { %vm5631_vm14 = vmmov %vm5620_vm1 }
 0x246   : > { %v2409_v44 = vrot.slane %v2407_v48, 2  ;;  %v2412_v25 = vrot.slane %v2410_v18, 3  ;;  %v1942_v1 = vpop.permute.xlu0 %1941  ;;  %v2406_v33 = vsel %vm5618_vm10, %v5293_v60, %v2405_v21  ;;  %v2949_v7 = vadd.f32 %v2948_v32, %v2947_v13  ;;  %vm5630_vm10 = vmmov %vm5624_vm11 }
 0x247   : > { %v2224_v23 = vsel %vm5615_vm4, %v4688_v43, %v1942_v1  ;;  %vm5627_vm4 = vmmov %vm5611_vm2 }
 0x248   : > { %v2413_v28 = vor.u32 %v2412_v25, %v2409_v44  ;;  %v2238_v6 = vsel %vm5617_vm7, %v2224_v23, %v1972_v57  ;;  %v2950_v37 = vrot.slane %v2949_v7, 4  ;;  %vm5629_vm7 = vmmov %vm5611_vm2 }
 0x24a   : > { %v2114_v61 = vpop.permute.xlu1 %2113  ;;  %v2012_v45 = vpop.permute.xlu0 %2011  ;;  %v2414_v30 = vsel %vm5616_vm9, %v2380_v12, %v2413_v28  ;;  %v2951_v58 = vadd.f32 %v2950_v37, %v2949_v7  ;;  %vm5628_vm9 = vmmov %vm5620_vm1 }
 0x24b   : > { %2706 = vmatprep.mubr.bf16.mxu1 %v2414_v30  ;;  %v2253_v49 = vsel %vm2245_vm15, %v2238_v6, %v2012_v45  ;;  %v2288_v50 = vsel %vm5620_vm1, %v2271_v19, %v2114_v61  ;;  %vm5632_vm1 = vmmov %vm5630_vm10 }
 0x24c   : > { %2707 = vmatmul.mubr.bf16.gmra.mrb[32].mxu1 %v2406_v33  ;;  %v2424_v43 = vshrl.u32 %v2253_v49, 16  ;;  %v2427_v10 = vshll.u32 %v2253_v49, 16  ;;  %v2952_v12 = vrot.slane %v2951_v58, 2 }
 0x24e   : > { %v2083_v22 = vpop.permute.xlu1 %2082  ;;  %v1974_v56 = vpop.permute.xlu0 %1973  ;;  %v2426_v54 = vrot.slane %v2424_v43, 2  ;;  %v2429_v3 = vrot.slane %v2427_v10, 3  ;;  %v2953_v53 = vadd.f32 %v2952_v12, %v2951_v58 }
 0x250   : > { %v2954_v5 = vrot.slane %v2953_v53, 1  ;;  %v2430_v46 = vor.u32 %v2429_v3, %v2426_v54 }
 0x252   : > { %v2193_v17 = vpop.permute.xlu1 %2192  ;;  %v2955_v2 = vadd.f32 %v2954_v5, %v2953_v53  ;;  %v2431_v4 = vsel %vm5611_vm2, %v2405_v21, %v2430_v46 }
 0x253   : > { %v2302_v60 = vsel %vm2245_vm15, %v2288_v50, %v2193_v17  ;;  %v1944_v16 = vpop.permute.xlu0 %1943 }
 0x254   : > { %v2432_v15 = vshrl.u32 %v2302_v60, 16  ;;  %v2435_v57 = vshll.u32 %v2302_v60, 16  ;;  %v2226_v35 = vsel %vm5621_vm13, %v4859_v41, %v1944_v16  ;;  %v2956_v8 = vmul.f32 0.015625, %v2955_v2  ;;  %vm5633_vm13 = vmmov %vm5623_vm5 }
 0x255   : > { %v2240_v42 = vsel %vm5623_vm5, %v2226_v35, %v1974_v56  ;;  %v2274_v41 = vsel %vm5624_vm11, %v5055_v52, %v2083_v22  ;;  %vm5635_vm11 = vmmov %vm5611_vm2 }
 0x256   : > { %v2434_v27 = vrot.slane %v2432_v15, 2  ;;  %v2437_v14 = vrot.slane %v2435_v57, 3  ;;  %v2957_v44 = vadd.f32 1e-05, %v2956_v8 }
 0x258   : > { %v2438_v48 = vor.u32 %v2437_v14, %v2434_v27  ;;  %3681 = vrsqrt.f32 %v2957_v44 }
 0x25a   : > { %v2116_v18 = vpop.permute.xlu1 %2115  ;;  %v2014_v51 = vpop.permute.xlu0 %2013  ;;  %v2439_v11 = vsel %vm5622_vm3, %v2413_v28, %v2438_v48  ;;  %vm5634_vm3 = vmmov %vm5632_vm1 }
 0x25b   : > { %2714 = vmatprep.mubr.bf16.mxu1 %v2439_v11  ;;  %v2255_v25 = vsel %vm2245_vm15, %v2240_v42, %v2014_v51  ;;  %v2290_v32 = vsel %vm5625_vm8, %v2274_v41, %v2116_v18  ;;  %vm5636_vm8 = vmmov %vm5611_vm2 }
 0x25c   : > { %2715 = vmatmul.mubr.bf16.gmra.mrb[36].mxu1 %v2431_v4  ;;  %v2449_v55 = vshrl.u32 %v2255_v25, 16  ;;  %v2452_v23 = vshll.u32 %v2255_v25, 16 }
 0x25e   : > { %v2085_v1 = vpop.permute.xlu1 %2084  ;;  %v1976_v20 = vpop.permute.xlu0 %1975  ;;  %v2451_v13 = vrot.slane %v2449_v55, 2  ;;  %v2454_v61 = vrot.slane %v2452_v23, 3 }
 0x260   : > { %v2455_v43 = vor.u32 %v2454_v61, %v2451_v13 }
 0x262   : > { %v2195_v28 = vpop.permute.xlu1 %2194  ;;  %v5347_v37 = vpop.eup %3681 }
 0x263   : > { %v2304_v45 = vsel %vm2245_vm15, %v2290_v32, %v2195_v28  ;;  %v1946_v21 = vpop.permute.xlu0 %1945  ;;  %v5353_v22 = vmul.f32 %v5347_v37, %v5261_v63  ;;  %v5357_v58 = vmul.f32 %v5347_v37, %v5218_v26  ;;  %v5361_v19 = vmul.f32 %v5347_v37, %v5222_v47 }
 0x264   : > { %v2457_v30 = vshrl.u32 %v2304_v45, 16  ;;  %v2460_v6 = vshll.u32 %v2304_v45, 16  ;;  %v2228_v52 = vsel %vm5626_vm12, %v4987_v36, %v1946_v21  ;;  %v2456_v36 = vsel %vm5629_vm7, %v2430_v46, %v2455_v43 }
 0x265   : > { %v2242_v17 = vsel %vm5628_vm9, %v2228_v52, %v1976_v20  ;;  %v2277_v26 = vsel %vm5630_vm10, %v5137_v59, %v2085_v1  ;;  %v5375_v59 = vmul.f32 %v5347_v37, %v5226_v29  ;;  %v5379_v8 = vmul.f32 %v5347_v37, %v5230_v24 }
 0x266   : > { %v2459_v33 = vrot.slane %v2457_v30, 2  ;;  %v2462_v7 = vrot.slane %v2460_v6, 3  ;;  %v2118_v49 = vpop.permute.xlu1 %2117  ;;  %v5396_v6 = vmul.f32 %v5347_v37, %v5242_v9  ;;  %vm3065_vm12 = vcmask 1042432  }
 0x267   : > { %v1948_v10 = vpop.permute.xlu0 %1947  ;;  %v2292_v47 = vsel %vm5631_vm14, %v2277_v26, %v2118_v49  ;;  %vm5639_vm9 = vcmask 1040384  }
 0x268   : > { %v2463_v56 = vor.u32 %v2462_v7, %v2459_v33  ;;  %v2230_v46 = vsel %vm5632_vm1, %v5070_v31, %v1948_v10  ;;  %vm5641_vm10 = vmmov %vm5639_vm9 }
 0x26a   : > { %v2087_v12 = vpop.permute.xlu1 %2086  ;;  %v2464_v50 = vsel %vm5627_vm4, %v2438_v48, %v2463_v56  ;;  %vm5638_vm4 = vcmask 1044480  }
 0x26b   : > { %v2016_v54 = vpop.permute.xlu0 %2015  ;;  %2722 = vmatprep.mubr.bf16.mxu1 %v2464_v50  ;;  %v2280_v31 = vsel %vm5634_vm3, %v5148_v39, %v2087_v12  ;;  %v5391_v39 = vmul.f32 %v5347_v37, %v5236_v34  ;;  %vm5640_vm7 = vmmov %vm5638_vm4 }
 0x26c   : > { %v2257_v63 = vsel %vm2245_vm15, %v2242_v17, %v2016_v54  ;;  %2723 = vmatmul.mubr.bf16.gmra.mrb[40].mxu1 %v2456_v36 }
 0x26d   : > { %v2474_v3 = vshrl.u32 %v2257_v63, 16  ;;  %v2477_v60 = vshll.u32 %v2257_v63, 16 }
 0x26e   : > { %v2197_v53 = vpop.permute.xlu1 %2196 }
 0x26f   : > { %v2476_v15 = vrot.slane %v2474_v3, 2  ;;  %v2479_v57 = vrot.slane %v2477_v60, 3  ;;  %v2306_v16 = vsel %vm2245_vm15, %v2292_v47, %v2197_v53  ;;  %v1978_v5 = vpop.permute.xlu0 %1977 }
 0x270   : > { %v2482_v27 = vshrl.u32 %v2306_v16, 16  ;;  %v2485_v14 = vshll.u32 %v2306_v16, 16  ;;  %v2244_v51 = vsel %vm5633_vm13, %v2230_v46, %v1978_v5 }
 0x271   : > { %v2480_v18 = vor.u32 %v2479_v57, %v2476_v15 }
 0x272   : > { %v2484_v2 = vrot.slane %v2482_v27, 2  ;;  %v2487_v48 = vrot.slane %v2485_v14, 3  ;;  %v2120_v35 = vpop.permute.xlu1 %2119 }
 0x273   : > { %v2018_v11 = vpop.permute.xlu0 %2017  ;;  %v2294_v1 = vsel %vm5623_vm5, %v2280_v31, %v2120_v35  ;;  %v2481_v41 = vsel %vm5635_vm11, %v2455_v43, %v2480_v18 }
 0x274   : > { %v2488_v42 = vor.u32 %v2487_v48, %v2484_v2  ;;  %v2259_v4 = vsel %vm2245_vm15, %v2244_v51, %v2018_v11  ;;  %v5414_v11 = vld [vmem:[%s5531_s6] ss:$0 sm:$0xff] }
 0x275   : > { %v2499_v44 = vshrl.u32 %v2259_v4, 16  ;;  %v2502_v25 = vshll.u32 %v2259_v4, 16 }
 0x276   : > { %v2199_v29 = vpop.permute.xlu1 %2198  ;;  %v2489_v20 = vsel %vm5611_vm2, %v2463_v56, %v2488_v42 }
 0x277   : > { %v2501_v55 = vrot.slane %v2499_v44, 2  ;;  %v2504_v24 = vrot.slane %v2502_v25, 3  ;;  %v2308_v23 = vsel %vm2245_vm15, %v2294_v1, %v2199_v29  ;;  %2730 = vmatprep.mubr.bf16.mxu1 %v2489_v20  ;;  %vm5637_vm15 = vmmov %vm5611_vm2 }
 0x278   : > { %v2507_v32 = vshrl.u32 %v2308_v23, 16  ;;  %v2510_v28 = vshll.u32 %v2308_v23, 16  ;;  %2731 = vmatmul.mubr.bf16.gmra.mrb[44].mxu1 %v2481_v41 }
 0x279   : > { %v2505_v45 = vor.u32 %v2504_v24, %v2501_v55 }
 0x27a   : > { %v2509_v13 = vrot.slane %v2507_v32, 2  ;;  %v2512_v61 = vrot.slane %v2510_v28, 3 }
 0x27b   : > { %v2506_v33 = vsel %vm5637_vm15, %v2480_v18, %v2505_v45 }
 0x27c   : > { %v2513_v21 = vor.u32 %v2512_v61, %v2509_v13 }
 0x27e   : > { %v2514_v30 = vsel %vm5636_vm8, %v2488_v42, %v2513_v21 }
 0x27f   : > { %2738 = vmatprep.mubr.bf16.mxu1 %v2514_v30 }
 0x280   : > { %2739 = vmatmul.mubr.bf16.gmra.mrb[48].mxu1 %v2506_v33 }
 0x281   : > { %2746 = vmatprep.mubr.bf16.mxu1 %v2513_v21 }
 0x288   : > { %2747 = vmatmul.mubr.bf16.gmra.mrb[52].mxu1 %v2505_v45 }
 0x294   : > { %v2787_v7 = vpop.f32.mrb[28].mxu0 }
 0x295   : > { %v3549_v49 = vpop.f32.mrb[29].mxu0 }
 0x296   : > { %v2789_v34 = vpop.f32.mrb[30].mxu0 }
 0x297   : > { %v3550_v43 = vpop.f32.mrb[31].mxu0 }
 0x2a4   : > { %v2794_v10 = vpop.f32.mrb[32].mxu0 }
 0x2a5   : > { %v3553_v56 = vpop.f32.mrb[33].mxu0 }
 0x2a6   : > { %v2797_v52 = vpop.f32.mrb[34].mxu0 }
 0x2a7   : > { %v3554_v12 = vpop.f32.mrb[35].mxu0 }
 0x2b3   : > { %v2802_v50 = vpop.f32.mrb[36].mxu0 }
 0x2b4   : > { %v3557_v17 = vpop.f32.mrb[37].mxu0 }
 0x2b5   : > { %v2805_v54 = vpop.f32.mrb[38].mxu0 }
 0x2b6   : > { %v3558_v36 = vpop.f32.mrb[39].mxu0 }
 0x2c3   : > { %v5399_v9 = vpop.f32.mrb[40].mxu0 }
 0x2c4   : > { %v3561_v63 = vpop.f32.mrb[41].mxu0 }
 0x2c5   : > { %v5401_v26 = vpop.f32.mrb[42].mxu0 }
 0x2c6   : > { %v3562_v3 = vpop.f32.mrb[43].mxu0 }
 0x2cb   : > { %v5403_v60 = vpop.f32.mrb[44].mxu0 }
 0x2cc   : > { %v3565_v47 = vpop.f32.mrb[45].mxu0 }
 0x2cd   : > { %v5405_v53 = vpop.f32.mrb[46].mxu0 }
 0x2ce   : > { %v3566_v15 = vpop.f32.mrb[47].mxu0 }
 0x2d3   : > { %v5407_v57 = vpop.f32.mrb[48].mxu0 }
 0x2d4   : > { %v3569_v16 = vpop.f32.mrb[49].mxu0 }
 0x2d5   : > { %v5409_v5 = vpop.f32.mrb[50].mxu0 }
 0x2d6   : > { %v3570_v27 = vpop.f32.mrb[51].mxu0 }
 0x2db   : > { %v2834_v14 = vpop.f32.mrb[52].mxu0 }
 0x2dc   : > { %v3573_v46 = vpop.f32.mrb[53].mxu0 }
 0x2dd   : > { %v2836_v2 = vpop.f32.mrb[54].mxu0 }
 0x2de   : > { %v3574_v48 = vpop.f32.mrb[55].mxu0 }
 0x313   : > { %v3424_v35 = vpop.f32.mrb[28].mxu1 }
 0x314   : > { %v3425_v18 = vpop.f32.mrb[29].mxu1 }
 0x315   : > { %v3427_v51 = vpop.f32.mrb[30].mxu1 }
 0x316   : > { %v3428_v42 = vpop.f32.mrb[31].mxu1 }
 0x317   : > { %v3429_v4 = vadd.f32 %v3428_v42, %v3427_v51 }
 0x319   : > { %v2704_v31 = vadd.f32 %v3429_v4, %v5414_v11 }
 0x31b   : > { %v2790_v44 = vadd.f32 %v2789_v34, %v2704_v31 }
 0x31d   : > { %3003 = vrot.lane.b32.xlu1 %v2790_v44, %s3709_s11  ;;  %v2970_v25 = vadd.f32 1.0, %v2790_v44 }
 0x31f   : > { %v3430_v1 = vpop.f32.mrb[32].mxu1  ;;  %v5419_v29 = vmul.f32 %v2970_v25, %v5353_v22 }
 0x320   : > { %v3431_v20 = vpop.f32.mrb[33].mxu1 }
 0x321   : > { %v3432_v55 = vadd.f32 %v3431_v20, %v3430_v1  ;;  %v3433_v24 = vpop.f32.mrb[34].mxu1 }
 0x322   : > { %v3434_v23 = vpop.f32.mrb[35].mxu1 }
 0x323   : > { %v2709_v41 = vadd.f32 %v3432_v55, %v5414_v11  ;;  %v3435_v32 = vadd.f32 %v3434_v23, %v3433_v24 }
 0x325   : > { %v2795_v28 = vadd.f32 %v2794_v10, %v2709_v41  ;;  %v2712_v13 = vadd.f32 %v3435_v32, %v5414_v11 }
 0x327   : > { %v2798_v61 = vadd.f32 %v2797_v52, %v2712_v13  ;;  %3005 = vrot.lane.b32.xlu0 %v2795_v28, %s3709_s11  ;;  %v2971_v45 = vadd.f32 1.0, %v2795_v28 }
 0x329   : > { %3007 = vrot.lane.b32.xlu1 %v2798_v61, %s3709_s11  ;;  %v5426_v21 = vmul.f32 %v2971_v45, %v5357_v58  ;;  %v2972_v22 = vadd.f32 1.0, %v2798_v61 }
 0x32b   : > { %v5429_v30 = vmul.f32 %v2972_v22, %v5361_v19 }
 0x32f   : > { %v3436_v33 = vpop.f32.mrb[36].mxu1 }
 0x330   : > { %v3437_v7 = vpop.f32.mrb[37].mxu1 }
 0x331   : > { %v3438_v49 = vadd.f32 %v3437_v7, %v3436_v33  ;;  %v3439_v34 = vpop.f32.mrb[38].mxu1  ;;  %v2968_v7 = vmul.f32 %v5347_v37, %v5245_v40 }
 0x332   : > { %v3440_v43 = vpop.f32.mrb[39].mxu1 }
 0x333   : > { %v2717_v10 = vadd.f32 %v3438_v49, %v5414_v11  ;;  %v3441_v56 = vadd.f32 %v3440_v43, %v3439_v34 }
 0x335   : > { %v2803_v52 = vadd.f32 %v2802_v50, %v2717_v10  ;;  %v2720_v12 = vadd.f32 %v3441_v56, %v5414_v11 }
 0x337   : > { %v2806_v17 = vadd.f32 %v2805_v54, %v2720_v12  ;;  %3009 = vrot.lane.b32.xlu0 %v2803_v52, %s3709_s11  ;;  %v2973_v58 = vadd.f32 1.0, %v2803_v52 }
 0x339   : > { %3011 = vrot.lane.b32.xlu1 %v2806_v17, %s3709_s11  ;;  %v5436_v19 = vmul.f32 %v2973_v58, %v5375_v59  ;;  %v2974_v36 = vadd.f32 1.0, %v2806_v17  ;;  %v2964_v59 = vmul.f32 %v5347_v37, %v5233_v62 }
 0x33b   : > { %v5439_v63 = vmul.f32 %v2974_v36, %v5379_v8 }
 0x33f   : > { %v3442_v3 = vpop.f32.mrb[40].mxu1 }
 0x340   : > { %v3443_v47 = vpop.f32.mrb[41].mxu1 }
 0x341   : > { %v3444_v15 = vadd.f32 %v3443_v47, %v3442_v3  ;;  %v3445_v16 = vpop.f32.mrb[42].mxu1 }
 0x342   : > { %v3446_v50 = vpop.f32.mrb[43].mxu1 }
 0x343   : > { %v2725_v27 = vadd.f32 %v3444_v15, %v5414_v11  ;;  %v3447_v54 = vadd.f32 %v3446_v50, %v3445_v16 }
 0x345   : > { %v2811_v14 = vadd.f32 %v5399_v9, %v2725_v27  ;;  %v2728_v46 = vadd.f32 %v3447_v54, %v5414_v11 }
 0x347   : > { %v2814_v2 = vadd.f32 %v5401_v26, %v2728_v46  ;;  %3013 = vrot.lane.b32.xlu0 %v2811_v14, %s3709_s11  ;;  %v2975_v8 = vadd.f32 1.0, %v2811_v14 }
 0x349   : > { %3015 = vrot.lane.b32.xlu1 %v2814_v2, %s3709_s11  ;;  %v5449_v48 = vmul.f32 %v2975_v8, %v2964_v59  ;;  %v2976_v35 = vadd.f32 1.0, %v2814_v2 }
 0x34b   : > { %v3448_v18 = vpop.f32.mrb[44].mxu1  ;;  %v5452_v51 = vmul.f32 %v2976_v35, %v5391_v39  ;;  %v2966_v39 = vmul.f32 %v5347_v37, %v5239_v0 }
 0x34c   : > { %v3449_v9 = vpop.f32.mrb[45].mxu1 }
 0x34d   : > { %v3450_v42 = vadd.f32 %v3449_v9, %v3448_v18  ;;  %v3451_v4 = vpop.f32.mrb[46].mxu1 }
 0x34e   : > { %v3452_v31 = vpop.f32.mrb[47].mxu1 }
 0x34f   : > { %v2733_v26 = vadd.f32 %v3450_v42, %v5414_v11  ;;  %v3453_v44 = vadd.f32 %v3452_v31, %v3451_v4 }
 0x351   : > { %v2819_v25 = vadd.f32 %v5403_v60, %v2733_v26  ;;  %v2736_v62 = vadd.f32 %v3453_v44, %v5414_v11 }
 0x353   : > { %v2822_v1 = vadd.f32 %v5405_v53, %v2736_v62  ;;  %v3454_v20 = vpop.f32.mrb[48].mxu1  ;;  %3017 = vrot.lane.b32.xlu0 %v2819_v25, %s3709_s11  ;;  %v2977_v55 = vadd.f32 1.0, %v2819_v25 }
 0x354   : > { %v3455_v24 = vpop.f32.mrb[49].mxu1 }
 0x355   : > { %v3456_v23 = vadd.f32 %v3455_v24, %v3454_v20  ;;  %v3457_v41 = vpop.f32.mrb[50].mxu1  ;;  %3019 = vrot.lane.b32.xlu1 %v2822_v1, %s3709_s11  ;;  %v5462_v32 = vmul.f32 %v2977_v55, %v2966_v39  ;;  %v2978_v28 = vadd.f32 1.0, %v2822_v1 }
 0x356   : > { %v3458_v60 = vpop.f32.mrb[51].mxu1 }
 0x357   : > { %v2741_v13 = vadd.f32 %v3456_v23, %v5414_v11  ;;  %v3459_v61 = vadd.f32 %v3458_v60, %v3457_v41  ;;  %v5466_v53 = vmul.f32 %v2978_v28, %v5396_v6 }
 0x359   : > { %v2827_v45 = vadd.f32 %v5407_v57, %v2741_v13  ;;  %v2744_v0 = vadd.f32 %v3459_v61, %v5414_v11  ;;  %v2969_v57 = vmul.f32 %v5347_v37, %v5248_v38 }
 0x35b   : > { %v2830_v22 = vadd.f32 %v5409_v5, %v2744_v0  ;;  %v3460_v33 = vpop.f32.mrb[52].mxu1  ;;  %3021 = vrot.lane.b32.xlu0 %v2827_v45, %s3709_s11  ;;  %v2979_v49 = vadd.f32 1.0, %v2827_v45 }
 0x35c   : > { %v3461_v34 = vpop.f32.mrb[53].mxu1 }
 0x35d   : > { %v3463_v43 = vpop.f32.mrb[54].mxu1  ;;  %3023 = vrot.lane.b32.xlu1 %v2830_v22, %s3709_s11  ;;  %v5475_v6 = vmul.f32 %v2979_v49, %v2968_v7  ;;  %v2980_v11 = vadd.f32 1.0, %v2830_v22 }
 0x35e   : > { %v3464_v10 = vpop.f32.mrb[55].mxu1 }
 0x35f   : > { %v5479_v5 = vmul.f32 %v2980_v11, %v2969_v57 }
 0x38f   : > { %v3004_v56 = vpop.permute.xlu1 %3003 }
 0x390   : > { %v3036_v52 = vadd.f32 %v3004_v56, %v5419_v29 }
 0x392   : > { %v3047_v40 = vmax.f32 %v3036_v52, 0.0 }
 0x394   : > { %v3060_v47 = vrot.slane %v3047_v40, 3 }
 0x399   : > { %v3006_v12 = vpop.permute.xlu0 %3005 }
 0x39a   : > { %v3037_v17 = vadd.f32 %v3006_v12, %v5426_v21 }
 0x39b   : > { %v3008_v58 = vpop.permute.xlu1 %3007 }
 0x39c   : > { %v3048_v36 = vmax.f32 %v3037_v17, 0.0  ;;  %v3038_v3 = vadd.f32 %v3008_v58, %v5429_v30 }
 0x39e   : > { %v3061_v15 = vrot.slane %v3048_v36, 3  ;;  %v3049_v16 = vmax.f32 %v3038_v3, 0.0  ;;  %v3066_v37 = vrot.slane %v3048_v36, 5 }
 0x3a0   : > { %v3062_v38 = vsel %vm5638_vm4, %v3060_v47, %v3061_v15  ;;  %v3067_v29 = vrot.slane %v3049_v16, 5  ;;  %v3072_v46 = vrot.slane %v3049_v16, 7 }
 0x3a1   : > { %v3380_v21 = vpack.c.bf16 %v3062_v38, %v3062_v38 }
 0x3a2   : > { %v3068_v30 = vsel %vm3065_vm12, %v3066_v37, %v3067_v29 }
 0x3a3   : > { %3136 = vst.msk [vmem:[%s5488_s17] sm:$0xf] %vm2876_vm6, %v3380_v21  ;;  %v3381_v50 = vpack.c.bf16 %v3068_v30, %v3068_v30 }
 0x3a5   : > { %3137 = vst.msk [vmem:[%s5488_s17 + $0x4] sm:$0xf] %vm2876_vm6, %v3381_v50 }
 0x3a9   : > { %v3010_v27 = vpop.permute.xlu0 %3009 }
 0x3aa   : > { %v3039_v54 = vadd.f32 %v3010_v27, %v5436_v19 }
 0x3ab   : > { %v3012_v35 = vpop.permute.xlu1 %3011 }
 0x3ac   : > { %v3050_v14 = vmax.f32 %v3039_v54, 0.0  ;;  %v3040_v18 = vadd.f32 %v3012_v35, %v5439_v63 }
 0x3ae   : > { %v3073_v2 = vrot.slane %v3050_v14, 7  ;;  %v3051_v42 = vmax.f32 %v3040_v18, 0.0 }
 0x3b0   : > { %v3074_v59 = vsel %vm5639_vm9, %v3072_v46, %v3073_v2  ;;  %v3079_v44 = vrot.slane %v3051_v42, 1 }
 0x3b1   : > { %v3382_v8 = vpack.c.bf16 %v3074_v59, %v3074_v59 }
 0x3b3   : > { %3138 = vst.msk [vmem:[%s5488_s17 + $0x8] sm:$0xf] %vm2876_vm6, %v3382_v8 }
 0x3b9   : > { %v3014_v9 = vpop.permute.xlu0 %3013 }
 0x3ba   : > { %v3041_v4 = vadd.f32 %v3014_v9, %v5449_v48 }
 0x3bb   : > { %v3016_v31 = vpop.permute.xlu1 %3015 }
 0x3bc   : > { %v3052_v26 = vmax.f32 %v3041_v4, 0.0  ;;  %v3042_v19 = vadd.f32 %v3016_v31, %v5452_v51 }
 0x3be   : > { %v3080_v25 = vrot.slane %v3052_v26, 1  ;;  %v3053_v62 = vmax.f32 %v3042_v19, 0.0  ;;  %v3084_v20 = vrot.slane %v3052_v26, 3 }
 0x3c0   : > { %v3081_v1 = vsel %vm648_vm0, %v3079_v44, %v3080_v25  ;;  %v3085_v39 = vrot.slane %v3053_v62, 3  ;;  %v3089_v60 = vrot.slane %v3053_v62, 5 }
 0x3c1   : > { %v3383_v55 = vpack.c.bf16 %v3081_v1, %v3081_v1 }
 0x3c2   : > { %v3086_v24 = vsel %vm5640_vm7, %v3084_v20, %v3085_v39 }
 0x3c3   : > { %3139 = vst.msk [vmem:[%s5488_s17 + $0xc] sm:$0xf] %vm2876_vm6, %v3383_v55  ;;  %v3384_v63 = vpack.c.bf16 %v3086_v24, %v3086_v24 }
 0x3c5   : > { %3140 = vst.msk [vmem:[%s5488_s17 + $0x10] sm:$0xf] %vm2876_vm6, %v3384_v63  ;;  %v3018_v48 = vpop.permute.xlu0 %3017 }
 0x3c6   : > { %v3043_v23 = vadd.f32 %v3018_v48, %v5462_v32 }
 0x3c7   : > { %v3020_v51 = vpop.permute.xlu1 %3019 }
 0x3c8   : > { %v3054_v41 = vmax.f32 %v3043_v23, 0.0  ;;  %v3044_v28 = vadd.f32 %v3020_v51, %v5466_v53 }
 0x3ca   : > { %v3090_v13 = vrot.slane %v3054_v41, 5  ;;  %v3055_v61 = vmax.f32 %v3044_v28, 0.0  ;;  %v3094_v0 = vrot.slane %v3054_v41, 7 }
 0x3cc   : > { %v3091_v45 = vsel %vm3065_vm12, %v3089_v60, %v3090_v13  ;;  %v3095_v22 = vrot.slane %v3055_v61, 7 }
 0x3cd   : > { %v3385_v33 = vpack.c.bf16 %v3091_v45, %v3091_v45  ;;  %v3022_v7 = vpop.permute.xlu0 %3021 }
 0x3ce   : > { %v3096_v49 = vsel %vm5641_vm10, %v3094_v0, %v3095_v22  ;;  %v3045_v34 = vadd.f32 %v3022_v7, %v5475_v6 }
 0x3cf   : > { %3141 = vst.msk [vmem:[%s5488_s17 + $0x14] sm:$0xf] %vm2876_vm6, %v3385_v33  ;;  %v3386_v32 = vpack.c.bf16 %v3096_v49, %v3096_v49  ;;  %v3024_v43 = vpop.permute.xlu1 %3023 }
 0x3d0   : > { %v3056_v53 = vmax.f32 %v3045_v34, 0.0  ;;  %v3046_v57 = vadd.f32 %v3024_v43, %v5479_v5 }
 0x3d1   : > { %3142 = vst.msk [vmem:[%s5488_s17 + $0x18] sm:$0xf] %vm2876_vm6, %v3386_v32 }
 0x3d2   : > { %v3057_v11 = vmax.f32 %v3046_v57, 0.0  ;;  %v3100_v10 = vrot.slane %v3056_v53, 1 }
 0x3d4   : > { %v3101_v56 = vrot.slane %v3057_v11, 1 }
 0x3d6   : > { %v3102_v52 = vsel %vm648_vm0, %v3100_v10, %v3101_v56 }
 0x3d7   : > { %v3387_v12 = vpack.c.bf16 %v3102_v52, %v3102_v52 }
 0x3d9   : > { %3143 = vst.msk [vmem:[%s5488_s17 + $0x1c] sm:$0xf] %vm2876_vm6, %v3387_v12 }
 0x3da PF: > { %s17_s24 = sadd.s32 1, %s3690_s24  }
 0x3db   : > { %p14_p4 = scmp.ge.s32.totalorder %s17_s24, 4  }
 0x3dd   :  { %16 = sbr.rel (!%p14_p4) target bundleno = 1 (0x1), region = 81 }

</bundles_post_ra>
